<compile_context>
chip_gen: v6e
topology: v6e:2x2x1
jax: 0.10.0
libtpu: 0.0.40
codegen_flags: <defaults>
</compile_context>

<pallas_src>
import functools

import jax
import jax.numpy as jnp
from jax.experimental import pallas as pl
from jax.experimental.pallas import tpu as pltpu


MXU_DTYPE = jnp.bfloat16        # MXU operands (weights, x, h fed to dots) + inter-layer y
STATE_DTYPE = jnp.float32       # carried h/c state, gate pre-activations, gate math


# ---------------------------------------------------------------------------
# Chip-aware sizing helpers
# ---------------------------------------------------------------------------

@functools.lru_cache(maxsize=1)
def _tpu_vmem_capacity():
    """Physical VMEM bytes (per TensorCore).  Conservative fallback = v7x (64 MiB)."""
    try:
        return int(pltpu.get_tpu_info().vmem_capacity_bytes)
    except Exception:
        return 64 * 1024 * 1024


def _vmem_limit_bytes():
    """Scoped-VMEM limit: generous on v5e/v6e (128 MiB chips), tight on v7x (64 MiB)."""
    cap = _tpu_vmem_capacity()
    return max(32 * 1024 * 1024, min(cap - 16 * 1024 * 1024, 100 * 1024 * 1024))


def _vmem_tile_budget():
    """Budget for blocks + scratch, leaving headroom for compiler temporaries."""
    return int(0.7 * _vmem_limit_bytes())


def _pick_batch_block(B):
    """Batch rows per block: a multiple of 8 dividing B (or B itself).  Prefers >= 2
    blocks so the 'parallel' batch axis can split across TensorCores (v7x megacore)."""
    if B <= 8 or B % 8 != 0:
        return B
    bb, cand = 8, 8
    while cand <= min(B, 512):
        if B % cand == 0:
            bb = cand
        cand *= 2
    if bb == B and (B // 2) % 8 == 0:
        bb = B // 2                       # force >= 2 batch blocks when possible
    return bb


def _pick_time_chunk(T):
    """Timesteps per grid step (static inner loop).  Must divide T and be a multiple
    of 8 (sublane tiling of the (bb, tc, .) blocks) or equal T.  Capped at 16 to bound
    vreg pressure of the unrolled recurrence at large batch blocks."""
    if T <= 16:
        return T
    for tc in (16, 8):
        if T % tc == 0:
            return tc
    # Fallback: whole sequence in one chunk (correct; only VMEM-heavy for very long,
    # non-multiple-of-8 T).
    return T


def _kernel_vmem_bytes(bb, tc, D, H, is_last, C):
    """Approximate VMEM footprint of one layer kernel's blocks + scratch."""
    H4 = 4 * H
    weights = D * H4 * 2 + H * H4 * 2 + H4 * 4             # resident, single-buffered
    if is_last:
        weights += H * C * 2 + C * 4
        out = 2 * bb * max(C, 128) * 4                     # (bb, C) f32 logits
    else:
        out = 2 * bb * tc * H * 2                          # (bb, tc, H) bf16 y
    x_in = 2 * bb * tc * D * 2                             # (bb, tc, D) bf16 x
    scratch = 2 * bb * H * 4                               # h/c carries (f32)
    return weights + out + x_in + scratch


def _choose_tiles(B, T, D, H, is_last, C):
    """Pick (bb, tc) that respect tiling constraints and fit the chip's VMEM budget."""
    budget = _vmem_tile_budget()
    bb = _pick_batch_block(B)
    tc = _pick_time_chunk(T)
    while _kernel_vmem_bytes(bb, tc, D, H, is_last, C) > budget:
        if tc > 8 and (tc // 2) % 8 == 0 and T % (tc // 2) == 0:
            tc //= 2
        elif bb > 8 and (bb // 2) % 8 == 0 and B % (bb // 2) == 0:
            bb //= 2
        else:
            break
    return bb, tc


def _resident_spec(block_shape, index_map):
    """BlockSpec for a grid-constant (weight/bias) block: single-buffered."""
    buffered = getattr(pl, "Buffered", None)
    if buffered is not None:
        try:
            return pl.BlockSpec(block_shape, index_map, pipeline_mode=buffered(1))
        except TypeError:
            pass
    return pl.BlockSpec(block_shape, index_map)


# ---------------------------------------------------------------------------
# Kernels
# ---------------------------------------------------------------------------

def _lstm_step(gates, c_prev):
    """Apply PyTorch-ordered (i, f, g, o) gates; all math in f32 on the VPU/EUP."""
    H = c_prev.shape[-1]
    i_g = jax.nn.sigmoid(gates[:, 0 * H:1 * H])
    f_g = jax.nn.sigmoid(gates[:, 1 * H:2 * H])
    g_g = jnp.tanh(gates[:, 2 * H:3 * H])
    o_g = jax.nn.sigmoid(gates[:, 3 * H:4 * H])
    c_new = f_g * c_prev + i_g * g_g
    h_new = o_g * jnp.tanh(c_new)
    return h_new, c_new


def lstm_seq_kernel(x_ref, wih_ref, whh_ref, b_ref, y_ref, h_sc, c_sc):
    """One (batch block, time chunk) of an inner LSTM layer; x-projection fused.

    x_ref  : (BB, TC, D)  bf16  layer-input chunk
    wih_ref: (D, 4H)      bf16  input weight  (grid-constant, resident)
    whh_ref: (H, 4H)      bf16  recurrent weight (grid-constant, resident)
    b_ref  : (1, 4H)      f32   fused bias b_ih + b_hh
    y_ref  : (BB, TC, H)  bf16  hidden-state sequence output (feeds next layer's MXU)
    """
    t = pl.program_id(1)

    @pl.when(t == 0)
    def _():
        h_sc[...] = jnp.zeros_like(h_sc)
        c_sc[...] = jnp.zeros_like(c_sc)

    bias = b_ref[...]                              # (1, 4H), hoisted out of the loop
    h = h_sc[...]
    c = c_sc[...]
    tc = x_ref.shape[1]
    for k in range(tc):                            # static; tc capped (<= 16)
        gates = (jnp.dot(x_ref[:, k, :], wih_ref[...],
                         preferred_element_type=jnp.float32)
                 + jnp.dot(h.astype(whh_ref.dtype), whh_ref[...],
                           preferred_element_type=jnp.float32)
                 + bias)
        h, c = _lstm_step(gates, c)
        y_ref[:, k, :] = h.astype(y_ref.dtype)
    h_sc[...] = h
    c_sc[...] = c


def lstm_last_fc_kernel(x_ref, wih_ref, whh_ref, b_ref, wfc_ref, bfc_ref,
                        o_ref, h_sc, c_sc):
    """Final LSTM layer fused with the FC head.

    Same recurrence as lstm_seq_kernel (x-projection fused) but never writes the
    (B, T, H) sequence; at the last time chunk it emits logits = h_{T-1} @ W_fc + b_fc
    of shape (BB, C).
    """
    t = pl.program_id(1)

    @pl.when(t == 0)
    def _():
        h_sc[...] = jnp.zeros_like(h_sc)
        c_sc[...] = jnp.zeros_like(c_sc)

    bias = b_ref[...]
    h = h_sc[...]
    c = c_sc[...]
    tc = x_ref.shape[1]
    for k in range(tc):                            # static; tc capped (<= 16)
        gates = (jnp.dot(x_ref[:, k, :], wih_ref[...],
                         preferred_element_type=jnp.float32)
                 + jnp.dot(h.astype(whh_ref.dtype), whh_ref[...],
                           preferred_element_type=jnp.float32)
                 + bias)
        h, c = _lstm_step(gates, c)
    h_sc[...] = h
    c_sc[...] = c

    @pl.when(t == pl.num_programs(1) - 1)
    def _():
        logits = jnp.dot(h.astype(wfc_ref.dtype), wfc_ref[...],
                         preferred_element_type=jnp.float32) + bfc_ref[...]
        o_ref[...] = logits.astype(o_ref.dtype)


# ---------------------------------------------------------------------------
# Wrappers
# ---------------------------------------------------------------------------

def _layer_in_specs(bb, tc, D, H, H4):
    return [
        pl.BlockSpec((bb, tc, D), lambda b, t: (b, t, 0)),     # x chunk
        _resident_spec((D, H4), lambda b, t: (0, 0)),          # W_ih^T
        _resident_spec((H, H4), lambda b, t: (0, 0)),          # W_hh^T
        _resident_spec((1, H4), lambda b, t: (0, 0)),          # fused bias
    ]


def run_lstm_layer_seq(x_seq, layer):
    """x_seq: (B, T, D) bf16 -> hidden sequence (B, T, H) bf16 (inner layers)."""
    B, T, D = x_seq.shape
    H = layer["whh_t"].shape[0]
    H4 = 4 * H
    bb, tc = _choose_tiles(B, T, D, H, is_last=False, C=0)
    grid = (B // bb, T // tc)

    return pl.pallas_call(
        lstm_seq_kernel,
        out_shape=jax.ShapeDtypeStruct((B, T, H), MXU_DTYPE),
        grid_spec=pltpu.PrefetchScalarGridSpec(
            num_scalar_prefetch=0,
            grid=grid,
            in_specs=_layer_in_specs(bb, tc, D, H, H4),
            out_specs=pl.BlockSpec((bb, tc, H), lambda b, t: (b, t, 0)),
            scratch_shapes=[
                pltpu.VMEM((bb, H), STATE_DTYPE),              # h carry
                pltpu.VMEM((bb, H), STATE_DTYPE),              # c carry
            ],
        ),
        compiler_params=pltpu.CompilerParams(
            dimension_semantics=("parallel", "arbitrary"),     # batch parallel, time serial
            vmem_limit_bytes=_vmem_limit_bytes(),
        ),
    )(x_seq, layer["wih_t"], layer["whh_t"], layer["bias"])


def run_lstm_last_layer_fc(x_seq, layer, fc):
    """Final layer: recurrence + fused FC head.  Returns logits (B, C) f32."""
    B, T, D = x_seq.shape
    H = layer["whh_t"].shape[0]
    H4 = 4 * H
    C = fc["wfc_t"].shape[1]
    bb, tc = _choose_tiles(B, T, D, H, is_last=True, C=C)
    grid = (B // bb, T // tc)

    in_specs = _layer_in_specs(bb, tc, D, H, H4) + [
        _resident_spec((H, C), lambda b, t: (0, 0)),           # W_fc^T
        _resident_spec((1, C), lambda b, t: (0, 0)),           # b_fc
    ]

    return pl.pallas_call(
        lstm_last_fc_kernel,
        out_shape=jax.ShapeDtypeStruct((B, C), jnp.float32),
        grid_spec=pltpu.PrefetchScalarGridSpec(
            num_scalar_prefetch=0,
            grid=grid,
            in_specs=in_specs,
            out_specs=pl.BlockSpec((bb, C), lambda b, t: (b, 0)),
            scratch_shapes=[
                pltpu.VMEM((bb, H), STATE_DTYPE),              # h carry
                pltpu.VMEM((bb, H), STATE_DTYPE),              # c carry
            ],
        ),
        compiler_params=pltpu.CompilerParams(
            dimension_semantics=("parallel", "arbitrary"),
            vmem_limit_bytes=_vmem_limit_bytes(),
        ),
    )(x_seq, layer["wih_t"], layer["whh_t"], layer["bias"],
      fc["wfc_t"], fc["bfc"])


# ---------------------------------------------------------------------------
# Parameters
# ---------------------------------------------------------------------------

def init_params(key, input_size, hidden_size, num_layers, num_classes):
    """Deterministic init mirroring PyTorch shapes (uniform(-1/sqrt(H), 1/sqrt(H)))."""
    k = 1.0 / jnp.sqrt(jnp.float32(hidden_size))
    params = {"layers": []}
    for layer in range(num_layers):
        d_in = input_size if layer == 0 else hidden_size
        key, k1, k2, k3, k4 = jax.random.split(key, 5)
        params["layers"].append({
            "w_ih": jax.random.uniform(k1, (4 * hidden_size, d_in), jnp.float32, -k, k),
            "w_hh": jax.random.uniform(k2, (4 * hidden_size, hidden_size), jnp.float32, -k, k),
            "b_ih": jax.random.uniform(k3, (4 * hidden_size,), jnp.float32, -k, k),
            "b_hh": jax.random.uniform(k4, (4 * hidden_size,), jnp.float32, -k, k),
        })
    key, k5, k6 = jax.random.split(key, 3)
    params["fc_w"] = jax.random.uniform(k5, (num_classes, hidden_size), jnp.float32, -k, k)
    params["fc_b"] = jax.random.uniform(k6, (num_classes,), jnp.float32, -k, k)
    return params


def prepare_params(params):
    """One-time weight prep: transpose, cast to bf16 (MXU operands), fuse the biases.
    Done outside the jitted forward so no per-call transpose/cast ops remain."""
    prepared = {"layers": []}
    for lp in params["layers"]:
        prepared["layers"].append({
            "wih_t": jnp.transpose(lp["w_ih"]).astype(MXU_DTYPE),          # (D, 4H)
            "whh_t": jnp.transpose(lp["w_hh"]).astype(MXU_DTYPE),          # (H, 4H)
            "bias": (lp["b_ih"] + lp["b_hh"])[None, :].astype(jnp.float32),  # (1, 4H)
        })
    prepared["fc"] = {
        "wfc_t": jnp.transpose(params["fc_w"]).astype(MXU_DTYPE),          # (H, C)
        "bfc": params["fc_b"][None, :].astype(jnp.float32),                # (1, C)
    }
    return prepared


@jax.jit
def lstm_forward(prepared, x_btd):
    """x_btd: (B, T, input_size) batch_first -> logits (B, num_classes)."""
    h_seq = x_btd.astype(MXU_DTYPE)        # MXU operand dtype; gate math stays f32
    layers = prepared["layers"]
    num_layers = len(layers)
    logits = None
    for idx, layer in enumerate(layers):
        if idx < num_layers - 1:
            h_seq = run_lstm_layer_seq(h_seq, layer)
            # TODO(synk): inter-layer dropout (training mode) not applied — inference identity.
        else:
            logits = run_lstm_last_layer_fc(h_seq, layer, prepared["fc"])
    return logits


# ---------------------------------------------------------------------------
# Pure-JAX reference (f32) for a correctness sanity check
# ---------------------------------------------------------------------------

def lstm_reference(params, x_btd):
    x = x_btd.astype(jnp.float32)
    B, T, _ = x.shape
    h_seq = x
    for lp in params["layers"]:
        H = lp["w_hh"].shape[1]
        h = jnp.zeros((B, H), jnp.float32)
        c = jnp.zeros((B, H), jnp.float32)
        outs = []
        for t in range(T):
            gates = (h_seq[:, t, :] @ lp["w_ih"].T + h @ lp["w_hh"].T
                     + lp["b_ih"] + lp["b_hh"])
            i_g = jax.nn.sigmoid(gates[:, 0 * H:1 * H])
            f_g = jax.nn.sigmoid(gates[:, 1 * H:2 * H])
            g_g = jnp.tanh(gates[:, 2 * H:3 * H])
            o_g = jax.nn.sigmoid(gates[:, 3 * H:4 * H])
            c = f_g * c + i_g * g_g
            h = o_g * jnp.tanh(c)
            outs.append(h)
        h_seq = jnp.stack(outs, axis=1)
    return h_seq[:, -1, :] @ params["fc_w"].T + params["fc_b"]


# ---------------------------------------------------------------------------
# Main
# ---------------------------------------------------------------------------

if __name__ == "__main__":
    import numpy as np

    B, T = 2, 8
    input_size, hidden_size, num_layers, num_classes = 16, 128, 2, 5  # H lane-aligned

    key = jax.random.PRNGKey(0)
    key, xk = jax.random.split(key)
    x = jax.random.normal(xk, (B, T, input_size), jnp.float32)

    params = init_params(key, input_size, hidden_size, num_layers, num_classes)
    prepared = prepare_params(params)

    out = lstm_forward(prepared, x)
    jax.block_until_ready(out)
    assert out.shape == (B, num_classes), out.shape

    ref = lstm_reference(params, x)
    np.testing.assert_allclose(np.asarray(out), np.asarray(ref), rtol=5e-2, atol=5e-2)

    print("KERNEL_OK")
</pallas_src>

<mosaic_0001>
module attributes {stable_mosaic.version = 11 : i64} {
  func.func @lstm_last_fc_kernel(%arg0: i32, %arg1: i32, %arg2: memref<2x8x128xbf16, #tpu.memory_space<vmem>>, %arg3: memref<128x512xbf16, #tpu.memory_space<vmem>>, %arg4: memref<128x512xbf16, #tpu.memory_space<vmem>>, %arg5: memref<1x512xf32, #tpu.memory_space<vmem>>, %arg6: memref<128x5xbf16, #tpu.memory_space<vmem>>, %arg7: memref<1x5xf32, #tpu.memory_space<vmem>>, %arg8: memref<2x5xf32, #tpu.memory_space<vmem>>, %arg9: memref<2x128xf32, #tpu.memory_space<vmem>>, %arg10: memref<2x128xf32, #tpu.memory_space<vmem>>) attributes {dimension_semantics = [#tpu.dimension_semantics<parallel>, #tpu.dimension_semantics<arbitrary>], iteration_bounds = array<i64: 1, 1>, scalar_prefetch = 0 : i64, scratch_operands = 2 : i64, tpu.core_type = #tpu.core_type<tc>, window_params = [{transform_indices = @transform_0, window_bounds = array<i64: 2, 8, 128>}, {pipeline_mode = #tpu.pipeline_mode<synchronous>, transform_indices = @transform_1, window_bounds = array<i64: 128, 512>}, {pipeline_mode = #tpu.pipeline_mode<synchronous>, transform_indices = @transform_2, window_bounds = array<i64: 128, 512>}, {pipeline_mode = #tpu.pipeline_mode<synchronous>, transform_indices = @transform_3, window_bounds = array<i64: 1, 512>}, {pipeline_mode = #tpu.pipeline_mode<synchronous>, transform_indices = @transform_4, window_bounds = array<i64: 128, 5>}, {pipeline_mode = #tpu.pipeline_mode<synchronous>, transform_indices = @transform_5, window_bounds = array<i64: 1, 5>}, {transform_indices = @transform_6, window_bounds = array<i64: 2, 5>}]} {
    %c0_i32 = arith.constant 0 : i32
    %0 = arith.cmpi eq, %arg1, %c0_i32 : i32
    %1 = arith.extui %0 : i1 to i32
    %c0_i32_0 = arith.constant 0 : i32
    %2 = arith.cmpi ne, %1, %c0_i32_0 : i32
    scf.if %2 {
      %cst_100 = arith.constant 0.000000e+00 : f32
      %291 = vector.broadcast %cst_100 : f32 to vector<2x128xf32>
      %c0_101 = arith.constant 0 : index
      %c0_102 = arith.constant 0 : index
      %292 = vector.load %arg9[%c0_101, %c0_102] : memref<2x128xf32, #tpu.memory_space<vmem>>, vector<2x128xf32>
      tpu.vector_store %arg9[%c0_101, %c0_102], %291 {strides = array<i32>} : memref<2x128xf32, #tpu.memory_space<vmem>>, vector<2x128xf32>,
      %cst_103 = arith.constant 0.000000e+00 : f32
      %293 = vector.broadcast %cst_103 : f32 to vector<2x128xf32>
      %c0_104 = arith.constant 0 : index
      %c0_105 = arith.constant 0 : index
      %294 = vector.load %arg10[%c0_104, %c0_105] : memref<2x128xf32, #tpu.memory_space<vmem>>, vector<2x128xf32>
      tpu.vector_store %arg10[%c0_104, %c0_105], %293 {strides = array<i32>} : memref<2x128xf32, #tpu.memory_space<vmem>>, vector<2x128xf32>,
    } else {
    }
    %c0 = arith.constant 0 : index
    %c0_1 = arith.constant 0 : index
    %3 = vector.load %arg5[%c0, %c0_1] : memref<1x512xf32, #tpu.memory_space<vmem>>, vector<1x512xf32>
    %c0_2 = arith.constant 0 : index
    %c0_3 = arith.constant 0 : index
    %4 = vector.load %arg9[%c0_2, %c0_3] : memref<2x128xf32, #tpu.memory_space<vmem>>, vector<2x128xf32>
    %c0_4 = arith.constant 0 : index
    %c0_5 = arith.constant 0 : index
    %5 = vector.load %arg10[%c0_4, %c0_5] : memref<2x128xf32, #tpu.memory_space<vmem>>, vector<2x128xf32>
    %c0_6 = arith.constant 0 : index
    %c0_7 = arith.constant 0 : index
    %c0_8 = arith.constant 0 : index
    %6 = vector.load %arg2[%c0_6, %c0_7, %c0_8] : memref<2x8x128xbf16, #tpu.memory_space<vmem>>, vector<2x1x128xbf16>
    %7 = vector.shape_cast %6 : vector<2x1x128xbf16> to vector<2x128xbf16>
    %c0_9 = arith.constant 0 : index
    %c0_10 = arith.constant 0 : index
    %8 = vector.load %arg3[%c0_9, %c0_10] : memref<128x512xbf16, #tpu.memory_space<vmem>>, vector<128x512xbf16>
    %cst = arith.constant dense<0.000000e+00> : vector<2x512xf32>
    %9 = tpu.matmul %7, %8, %cst {dimension_numbers = #tpu.dot_dimension_numbers<[1], [0], [0], [1], [0, 0, 1, 1], [], []>} : vector<2x128xbf16>, vector<128x512xbf16>, vector<2x512xf32> -> vector<2x512xf32>
    %10 = arith.truncf %4 : vector<2x128xf32> to vector<2x128xbf16>
    %c0_11 = arith.constant 0 : index
    %c0_12 = arith.constant 0 : index
    %11 = vector.load %arg4[%c0_11, %c0_12] : memref<128x512xbf16, #tpu.memory_space<vmem>>, vector<128x512xbf16>
    %cst_13 = arith.constant dense<0.000000e+00> : vector<2x512xf32>
    %12 = tpu.matmul %10, %11, %cst_13 {dimension_numbers = #tpu.dot_dimension_numbers<[1], [0], [0], [1], [0, 0, 1, 1], [], []>} : vector<2x128xbf16>, vector<128x512xbf16>, vector<2x512xf32> -> vector<2x512xf32>
    %13 = arith.addf %9, %12 : vector<2x512xf32>
    %14 = vector.broadcast %3 : vector<1x512xf32> to vector<2x512xf32>
    %15 = arith.addf %13, %14 : vector<2x512xf32>
    %16 = vector.extract_strided_slice %15 {offsets = [0, 0], sizes = [2, 128], strides = [1, 1]} : vector<2x512xf32> to vector<2x128xf32>
    %17 = arith.negf %16 : vector<2x128xf32>
    %18 = math.exp %17 : vector<2x128xf32>
    %cst_14 = arith.constant 1.000000e+00 : f32
    %19 = vector.broadcast %cst_14 : f32 to vector<2x128xf32>
    %20 = arith.addf %19, %18 : vector<2x128xf32>
    %21 = arith.divf %19, %20 : vector<2x128xf32>
    %22 = vector.extract_strided_slice %15 {offsets = [0, 128], sizes = [2, 128], strides = [1, 1]} : vector<2x512xf32> to vector<2x128xf32>
    %23 = arith.negf %22 : vector<2x128xf32>
    %24 = math.exp %23 : vector<2x128xf32>
    %cst_15 = arith.constant 1.000000e+00 : f32
    %25 = vector.broadcast %cst_15 : f32 to vector<2x128xf32>
    %26 = arith.addf %25, %24 : vector<2x128xf32>
    %27 = arith.divf %25, %26 : vector<2x128xf32>
    %28 = vector.extract_strided_slice %15 {offsets = [0, 256], sizes = [2, 128], strides = [1, 1]} : vector<2x512xf32> to vector<2x128xf32>
    %29 = math.tanh %28 : vector<2x128xf32>
    %30 = vector.extract_strided_slice %15 {offsets = [0, 384], sizes = [2, 128], strides = [1, 1]} : vector<2x512xf32> to vector<2x128xf32>
    %31 = arith.negf %30 : vector<2x128xf32>
    %32 = math.exp %31 : vector<2x128xf32>
    %cst_16 = arith.constant 1.000000e+00 : f32
    %33 = vector.broadcast %cst_16 : f32 to vector<2x128xf32>
    %34 = arith.addf %33, %32 : vector<2x128xf32>
    %35 = arith.divf %33, %34 : vector<2x128xf32>
    %36 = arith.mulf %27, %5 : vector<2x128xf32>
    %37 = arith.mulf %21, %29 : vector<2x128xf32>
    %38 = arith.addf %36, %37 : vector<2x128xf32>
    %39 = math.tanh %38 : vector<2x128xf32>
    %40 = arith.mulf %35, %39 : vector<2x128xf32>
    %c0_17 = arith.constant 0 : index
    %c1 = arith.constant 1 : index
    %c0_18 = arith.constant 0 : index
    %41 = vector.load %arg2[%c0_17, %c1, %c0_18] : memref<2x8x128xbf16, #tpu.memory_space<vmem>>, vector<2x1x128xbf16>
    %42 = vector.shape_cast %41 : vector<2x1x128xbf16> to vector<2x128xbf16>
    %c0_19 = arith.constant 0 : index
    %c0_20 = arith.constant 0 : index
    %43 = vector.load %arg3[%c0_19, %c0_20] : memref<128x512xbf16, #tpu.memory_space<vmem>>, vector<128x512xbf16>
    %cst_21 = arith.constant dense<0.000000e+00> : vector<2x512xf32>
    %44 = tpu.matmul %42, %43, %cst_21 {dimension_numbers = #tpu.dot_dimension_numbers<[1], [0], [0], [1], [0, 0, 1, 1], [], []>} : vector<2x128xbf16>, vector<128x512xbf16>, vector<2x512xf32> -> vector<2x512xf32>
    %45 = arith.truncf %40 : vector<2x128xf32> to vector<2x128xbf16>
    %c0_22 = arith.constant 0 : index
    %c0_23 = arith.constant 0 : index
    %46 = vector.load %arg4[%c0_22, %c0_23] : memref<128x512xbf16, #tpu.memory_space<vmem>>, vector<128x512xbf16>
    %cst_24 = arith.constant dense<0.000000e+00> : vector<2x512xf32>
    %47 = tpu.matmul %45, %46, %cst_24 {dimension_numbers = #tpu.dot_dimension_numbers<[1], [0], [0], [1], [0, 0, 1, 1], [], []>} : vector<2x128xbf16>, vector<128x512xbf16>, vector<2x512xf32> -> vector<2x512xf32>
    %48 = arith.addf %44, %47 : vector<2x512xf32>
    %49 = vector.broadcast %3 : vector<1x512xf32> to vector<2x512xf32>
    %50 = arith.addf %48, %49 : vector<2x512xf32>
    %51 = vector.extract_strided_slice %50 {offsets = [0, 0], sizes = [2, 128], strides = [1, 1]} : vector<2x512xf32> to vector<2x128xf32>
    %52 = arith.negf %51 : vector<2x128xf32>
    %53 = math.exp %52 : vector<2x128xf32>
    %cst_25 = arith.constant 1.000000e+00 : f32
    %54 = vector.broadcast %cst_25 : f32 to vector<2x128xf32>
    %55 = arith.addf %54, %53 : vector<2x128xf32>
    %56 = arith.divf %54, %55 : vector<2x128xf32>
    %57 = vector.extract_strided_slice %50 {offsets = [0, 128], sizes = [2, 128], strides = [1, 1]} : vector<2x512xf32> to vector<2x128xf32>
    %58 = arith.negf %57 : vector<2x128xf32>
    %59 = math.exp %58 : vector<2x128xf32>
    %cst_26 = arith.constant 1.000000e+00 : f32
    %60 = vector.broadcast %cst_26 : f32 to vector<2x128xf32>
    %61 = arith.addf %60, %59 : vector<2x128xf32>
    %62 = arith.divf %60, %61 : vector<2x128xf32>
    %63 = vector.extract_strided_slice %50 {offsets = [0, 256], sizes = [2, 128], strides = [1, 1]} : vector<2x512xf32> to vector<2x128xf32>
    %64 = math.tanh %63 : vector<2x128xf32>
    %65 = vector.extract_strided_slice %50 {offsets = [0, 384], sizes = [2, 128], strides = [1, 1]} : vector<2x512xf32> to vector<2x128xf32>
    %66 = arith.negf %65 : vector<2x128xf32>
    %67 = math.exp %66 : vector<2x128xf32>
    %cst_27 = arith.constant 1.000000e+00 : f32
    %68 = vector.broadcast %cst_27 : f32 to vector<2x128xf32>
    %69 = arith.addf %68, %67 : vector<2x128xf32>
    %70 = arith.divf %68, %69 : vector<2x128xf32>
    %71 = arith.mulf %62, %38 : vector<2x128xf32>
    %72 = arith.mulf %56, %64 : vector<2x128xf32>
    %73 = arith.addf %71, %72 : vector<2x128xf32>
    %74 = math.tanh %73 : vector<2x128xf32>
    %75 = arith.mulf %70, %74 : vector<2x128xf32>
    %c0_28 = arith.constant 0 : index
    %c2 = arith.constant 2 : index
    %c0_29 = arith.constant 0 : index
    %76 = vector.load %arg2[%c0_28, %c2, %c0_29] : memref<2x8x128xbf16, #tpu.memory_space<vmem>>, vector<2x1x128xbf16>
    %77 = vector.shape_cast %76 : vector<2x1x128xbf16> to vector<2x128xbf16>
    %c0_30 = arith.constant 0 : index
    %c0_31 = arith.constant 0 : index
    %78 = vector.load %arg3[%c0_30, %c0_31] : memref<128x512xbf16, #tpu.memory_space<vmem>>, vector<128x512xbf16>
    %cst_32 = arith.constant dense<0.000000e+00> : vector<2x512xf32>
    %79 = tpu.matmul %77, %78, %cst_32 {dimension_numbers = #tpu.dot_dimension_numbers<[1], [0], [0], [1], [0, 0, 1, 1], [], []>} : vector<2x128xbf16>, vector<128x512xbf16>, vector<2x512xf32> -> vector<2x512xf32>
    %80 = arith.truncf %75 : vector<2x128xf32> to vector<2x128xbf16>
    %c0_33 = arith.constant 0 : index
    %c0_34 = arith.constant 0 : index
    %81 = vector.load %arg4[%c0_33, %c0_34] : memref<128x512xbf16, #tpu.memory_space<vmem>>, vector<128x512xbf16>
    %cst_35 = arith.constant dense<0.000000e+00> : vector<2x512xf32>
    %82 = tpu.matmul %80, %81, %cst_35 {dimension_numbers = #tpu.dot_dimension_numbers<[1], [0], [0], [1], [0, 0, 1, 1], [], []>} : vector<2x128xbf16>, vector<128x512xbf16>, vector<2x512xf32> -> vector<2x512xf32>
    %83 = arith.addf %79, %82 : vector<2x512xf32>
    %84 = vector.broadcast %3 : vector<1x512xf32> to vector<2x512xf32>
    %85 = arith.addf %83, %84 : vector<2x512xf32>
    %86 = vector.extract_strided_slice %85 {offsets = [0, 0], sizes = [2, 128], strides = [1, 1]} : vector<2x512xf32> to vector<2x128xf32>
    %87 = arith.negf %86 : vector<2x128xf32>
    %88 = math.exp %87 : vector<2x128xf32>
    %cst_36 = arith.constant 1.000000e+00 : f32
    %89 = vector.broadcast %cst_36 : f32 to vector<2x128xf32>
    %90 = arith.addf %89, %88 : vector<2x128xf32>
    %91 = arith.divf %89, %90 : vector<2x128xf32>
    %92 = vector.extract_strided_slice %85 {offsets = [0, 128], sizes = [2, 128], strides = [1, 1]} : vector<2x512xf32> to vector<2x128xf32>
    %93 = arith.negf %92 : vector<2x128xf32>
    %94 = math.exp %93 : vector<2x128xf32>
    %cst_37 = arith.constant 1.000000e+00 : f32
    %95 = vector.broadcast %cst_37 : f32 to vector<2x128xf32>
    %96 = arith.addf %95, %94 : vector<2x128xf32>
    %97 = arith.divf %95, %96 : vector<2x128xf32>
    %98 = vector.extract_strided_slice %85 {offsets = [0, 256], sizes = [2, 128], strides = [1, 1]} : vector<2x512xf32> to vector<2x128xf32>
    %99 = math.tanh %98 : vector<2x128xf32>
    %100 = vector.extract_strided_slice %85 {offsets = [0, 384], sizes = [2, 128], strides = [1, 1]} : vector<2x512xf32> to vector<2x128xf32>
    %101 = arith.negf %100 : vector<2x128xf32>
    %102 = math.exp %101 : vector<2x128xf32>
    %cst_38 = arith.constant 1.000000e+00 : f32
    %103 = vector.broadcast %cst_38 : f32 to vector<2x128xf32>
    %104 = arith.addf %103, %102 : vector<2x128xf32>
    %105 = arith.divf %103, %104 : vector<2x128xf32>
    %106 = arith.mulf %97, %73 : vector<2x128xf32>
    %107 = arith.mulf %91, %99 : vector<2x128xf32>
    %108 = arith.addf %106, %107 : vector<2x128xf32>
    %109 = math.tanh %108 : vector<2x128xf32>
    %110 = arith.mulf %105, %109 : vector<2x128xf32>
    %c0_39 = arith.constant 0 : index
    %c3 = arith.constant 3 : index
    %c0_40 = arith.constant 0 : index
    %111 = vector.load %arg2[%c0_39, %c3, %c0_40] : memref<2x8x128xbf16, #tpu.memory_space<vmem>>, vector<2x1x128xbf16>
    %112 = vector.shape_cast %111 : vector<2x1x128xbf16> to vector<2x128xbf16>
    %c0_41 = arith.constant 0 : index
    %c0_42 = arith.constant 0 : index
    %113 = vector.load %arg3[%c0_41, %c0_42] : memref<128x512xbf16, #tpu.memory_space<vmem>>, vector<128x512xbf16>
    %cst_43 = arith.constant dense<0.000000e+00> : vector<2x512xf32>
    %114 = tpu.matmul %112, %113, %cst_43 {dimension_numbers = #tpu.dot_dimension_numbers<[1], [0], [0], [1], [0, 0, 1, 1], [], []>} : vector<2x128xbf16>, vector<128x512xbf16>, vector<2x512xf32> -> vector<2x512xf32>
    %115 = arith.truncf %110 : vector<2x128xf32> to vector<2x128xbf16>
    %c0_44 = arith.constant 0 : index
    %c0_45 = arith.constant 0 : index
    %116 = vector.load %arg4[%c0_44, %c0_45] : memref<128x512xbf16, #tpu.memory_space<vmem>>, vector<128x512xbf16>
    %cst_46 = arith.constant dense<0.000000e+00> : vector<2x512xf32>
    %117 = tpu.matmul %115, %116, %cst_46 {dimension_numbers = #tpu.dot_dimension_numbers<[1], [0], [0], [1], [0, 0, 1, 1], [], []>} : vector<2x128xbf16>, vector<128x512xbf16>, vector<2x512xf32> -> vector<2x512xf32>
    %118 = arith.addf %114, %117 : vector<2x512xf32>
    %119 = vector.broadcast %3 : vector<1x512xf32> to vector<2x512xf32>
    %120 = arith.addf %118, %119 : vector<2x512xf32>
    %121 = vector.extract_strided_slice %120 {offsets = [0, 0], sizes = [2, 128], strides = [1, 1]} : vector<2x512xf32> to vector<2x128xf32>
    %122 = arith.negf %121 : vector<2x128xf32>
    %123 = math.exp %122 : vector<2x128xf32>
    %cst_47 = arith.constant 1.000000e+00 : f32
    %124 = vector.broadcast %cst_47 : f32 to vector<2x128xf32>
    %125 = arith.addf %124, %123 : vector<2x128xf32>
    %126 = arith.divf %124, %125 : vector<2x128xf32>
    %127 = vector.extract_strided_slice %120 {offsets = [0, 128], sizes = [2, 128], strides = [1, 1]} : vector<2x512xf32> to vector<2x128xf32>
    %128 = arith.negf %127 : vector<2x128xf32>
    %129 = math.exp %128 : vector<2x128xf32>
    %cst_48 = arith.constant 1.000000e+00 : f32
    %130 = vector.broadcast %cst_48 : f32 to vector<2x128xf32>
    %131 = arith.addf %130, %129 : vector<2x128xf32>
    %132 = arith.divf %130, %131 : vector<2x128xf32>
    %133 = vector.extract_strided_slice %120 {offsets = [0, 256], sizes = [2, 128], strides = [1, 1]} : vector<2x512xf32> to vector<2x128xf32>
    %134 = math.tanh %133 : vector<2x128xf32>
    %135 = vector.extract_strided_slice %120 {offsets = [0, 384], sizes = [2, 128], strides = [1, 1]} : vector<2x512xf32> to vector<2x128xf32>
    %136 = arith.negf %135 : vector<2x128xf32>
    %137 = math.exp %136 : vector<2x128xf32>
    %cst_49 = arith.constant 1.000000e+00 : f32
    %138 = vector.broadcast %cst_49 : f32 to vector<2x128xf32>
    %139 = arith.addf %138, %137 : vector<2x128xf32>
    %140 = arith.divf %138, %139 : vector<2x128xf32>
    %141 = arith.mulf %132, %108 : vector<2x128xf32>
    %142 = arith.mulf %126, %134 : vector<2x128xf32>
    %143 = arith.addf %141, %142 : vector<2x128xf32>
    %144 = math.tanh %143 : vector<2x128xf32>
    %145 = arith.mulf %140, %144 : vector<2x128xf32>
    %c0_50 = arith.constant 0 : index
    %c4 = arith.constant 4 : index
    %c0_51 = arith.constant 0 : index
    %146 = vector.load %arg2[%c0_50, %c4, %c0_51] : memref<2x8x128xbf16, #tpu.memory_space<vmem>>, vector<2x1x128xbf16>
    %147 = vector.shape_cast %146 : vector<2x1x128xbf16> to vector<2x128xbf16>
    %c0_52 = arith.constant 0 : index
    %c0_53 = arith.constant 0 : index
    %148 = vector.load %arg3[%c0_52, %c0_53] : memref<128x512xbf16, #tpu.memory_space<vmem>>, vector<128x512xbf16>
    %cst_54 = arith.constant dense<0.000000e+00> : vector<2x512xf32>
    %149 = tpu.matmul %147, %148, %cst_54 {dimension_numbers = #tpu.dot_dimension_numbers<[1], [0], [0], [1], [0, 0, 1, 1], [], []>} : vector<2x128xbf16>, vector<128x512xbf16>, vector<2x512xf32> -> vector<2x512xf32>
    %150 = arith.truncf %145 : vector<2x128xf32> to vector<2x128xbf16>
    %c0_55 = arith.constant 0 : index
    %c0_56 = arith.constant 0 : index
    %151 = vector.load %arg4[%c0_55, %c0_56] : memref<128x512xbf16, #tpu.memory_space<vmem>>, vector<128x512xbf16>
    %cst_57 = arith.constant dense<0.000000e+00> : vector<2x512xf32>
    %152 = tpu.matmul %150, %151, %cst_57 {dimension_numbers = #tpu.dot_dimension_numbers<[1], [0], [0], [1], [0, 0, 1, 1], [], []>} : vector<2x128xbf16>, vector<128x512xbf16>, vector<2x512xf32> -> vector<2x512xf32>
    %153 = arith.addf %149, %152 : vector<2x512xf32>
    %154 = vector.broadcast %3 : vector<1x512xf32> to vector<2x512xf32>
    %155 = arith.addf %153, %154 : vector<2x512xf32>
    %156 = vector.extract_strided_slice %155 {offsets = [0, 0], sizes = [2, 128], strides = [1, 1]} : vector<2x512xf32> to vector<2x128xf32>
    %157 = arith.negf %156 : vector<2x128xf32>
    %158 = math.exp %157 : vector<2x128xf32>
    %cst_58 = arith.constant 1.000000e+00 : f32
    %159 = vector.broadcast %cst_58 : f32 to vector<2x128xf32>
    %160 = arith.addf %159, %158 : vector<2x128xf32>
    %161 = arith.divf %159, %160 : vector<2x128xf32>
    %162 = vector.extract_strided_slice %155 {offsets = [0, 128], sizes = [2, 128], strides = [1, 1]} : vector<2x512xf32> to vector<2x128xf32>
    %163 = arith.negf %162 : vector<2x128xf32>
    %164 = math.exp %163 : vector<2x128xf32>
    %cst_59 = arith.constant 1.000000e+00 : f32
    %165 = vector.broadcast %cst_59 : f32 to vector<2x128xf32>
    %166 = arith.addf %165, %164 : vector<2x128xf32>
    %167 = arith.divf %165, %166 : vector<2x128xf32>
    %168 = vector.extract_strided_slice %155 {offsets = [0, 256], sizes = [2, 128], strides = [1, 1]} : vector<2x512xf32> to vector<2x128xf32>
    %169 = math.tanh %168 : vector<2x128xf32>
    %170 = vector.extract_strided_slice %155 {offsets = [0, 384], sizes = [2, 128], strides = [1, 1]} : vector<2x512xf32> to vector<2x128xf32>
    %171 = arith.negf %170 : vector<2x128xf32>
    %172 = math.exp %171 : vector<2x128xf32>
    %cst_60 = arith.constant 1.000000e+00 : f32
    %173 = vector.broadcast %cst_60 : f32 to vector<2x128xf32>
    %174 = arith.addf %173, %172 : vector<2x128xf32>
    %175 = arith.divf %173, %174 : vector<2x128xf32>
    %176 = arith.mulf %167, %143 : vector<2x128xf32>
    %177 = arith.mulf %161, %169 : vector<2x128xf32>
    %178 = arith.addf %176, %177 : vector<2x128xf32>
    %179 = math.tanh %178 : vector<2x128xf32>
    %180 = arith.mulf %175, %179 : vector<2x128xf32>
    %c0_61 = arith.constant 0 : index
    %c5 = arith.constant 5 : index
    %c0_62 = arith.constant 0 : index
    %181 = vector.load %arg2[%c0_61, %c5, %c0_62] : memref<2x8x128xbf16, #tpu.memory_space<vmem>>, vector<2x1x128xbf16>
    %182 = vector.shape_cast %181 : vector<2x1x128xbf16> to vector<2x128xbf16>
    %c0_63 = arith.constant 0 : index
    %c0_64 = arith.constant 0 : index
    %183 = vector.load %arg3[%c0_63, %c0_64] : memref<128x512xbf16, #tpu.memory_space<vmem>>, vector<128x512xbf16>
    %cst_65 = arith.constant dense<0.000000e+00> : vector<2x512xf32>
    %184 = tpu.matmul %182, %183, %cst_65 {dimension_numbers = #tpu.dot_dimension_numbers<[1], [0], [0], [1], [0, 0, 1, 1], [], []>} : vector<2x128xbf16>, vector<128x512xbf16>, vector<2x512xf32> -> vector<2x512xf32>
    %185 = arith.truncf %180 : vector<2x128xf32> to vector<2x128xbf16>
    %c0_66 = arith.constant 0 : index
    %c0_67 = arith.constant 0 : index
    %186 = vector.load %arg4[%c0_66, %c0_67] : memref<128x512xbf16, #tpu.memory_space<vmem>>, vector<128x512xbf16>
    %cst_68 = arith.constant dense<0.000000e+00> : vector<2x512xf32>
    %187 = tpu.matmul %185, %186, %cst_68 {dimension_numbers = #tpu.dot_dimension_numbers<[1], [0], [0], [1], [0, 0, 1, 1], [], []>} : vector<2x128xbf16>, vector<128x512xbf16>, vector<2x512xf32> -> vector<2x512xf32>
    %188 = arith.addf %184, %187 : vector<2x512xf32>
    %189 = vector.broadcast %3 : vector<1x512xf32> to vector<2x512xf32>
    %190 = arith.addf %188, %189 : vector<2x512xf32>
    %191 = vector.extract_strided_slice %190 {offsets = [0, 0], sizes = [2, 128], strides = [1, 1]} : vector<2x512xf32> to vector<2x128xf32>
    %192 = arith.negf %191 : vector<2x128xf32>
    %193 = math.exp %192 : vector<2x128xf32>
    %cst_69 = arith.constant 1.000000e+00 : f32
    %194 = vector.broadcast %cst_69 : f32 to vector<2x128xf32>
    %195 = arith.addf %194, %193 : vector<2x128xf32>
    %196 = arith.divf %194, %195 : vector<2x128xf32>
    %197 = vector.extract_strided_slice %190 {offsets = [0, 128], sizes = [2, 128], strides = [1, 1]} : vector<2x512xf32> to vector<2x128xf32>
    %198 = arith.negf %197 : vector<2x128xf32>
    %199 = math.exp %198 : vector<2x128xf32>
    %cst_70 = arith.constant 1.000000e+00 : f32
    %200 = vector.broadcast %cst_70 : f32 to vector<2x128xf32>
    %201 = arith.addf %200, %199 : vector<2x128xf32>
    %202 = arith.divf %200, %201 : vector<2x128xf32>
    %203 = vector.extract_strided_slice %190 {offsets = [0, 256], sizes = [2, 128], strides = [1, 1]} : vector<2x512xf32> to vector<2x128xf32>
    %204 = math.tanh %203 : vector<2x128xf32>
    %205 = vector.extract_strided_slice %190 {offsets = [0, 384], sizes = [2, 128], strides = [1, 1]} : vector<2x512xf32> to vector<2x128xf32>
    %206 = arith.negf %205 : vector<2x128xf32>
    %207 = math.exp %206 : vector<2x128xf32>
    %cst_71 = arith.constant 1.000000e+00 : f32
    %208 = vector.broadcast %cst_71 : f32 to vector<2x128xf32>
    %209 = arith.addf %208, %207 : vector<2x128xf32>
    %210 = arith.divf %208, %209 : vector<2x128xf32>
    %211 = arith.mulf %202, %178 : vector<2x128xf32>
    %212 = arith.mulf %196, %204 : vector<2x128xf32>
    %213 = arith.addf %211, %212 : vector<2x128xf32>
    %214 = math.tanh %213 : vector<2x128xf32>
    %215 = arith.mulf %210, %214 : vector<2x128xf32>
    %c0_72 = arith.constant 0 : index
    %c6 = arith.constant 6 : index
    %c0_73 = arith.constant 0 : index
    %216 = vector.load %arg2[%c0_72, %c6, %c0_73] : memref<2x8x128xbf16, #tpu.memory_space<vmem>>, vector<2x1x128xbf16>
    %217 = vector.shape_cast %216 : vector<2x1x128xbf16> to vector<2x128xbf16>
    %c0_74 = arith.constant 0 : index
    %c0_75 = arith.constant 0 : index
    %218 = vector.load %arg3[%c0_74, %c0_75] : memref<128x512xbf16, #tpu.memory_space<vmem>>, vector<128x512xbf16>
    %cst_76 = arith.constant dense<0.000000e+00> : vector<2x512xf32>
    %219 = tpu.matmul %217, %218, %cst_76 {dimension_numbers = #tpu.dot_dimension_numbers<[1], [0], [0], [1], [0, 0, 1, 1], [], []>} : vector<2x128xbf16>, vector<128x512xbf16>, vector<2x512xf32> -> vector<2x512xf32>
    %220 = arith.truncf %215 : vector<2x128xf32> to vector<2x128xbf16>
    %c0_77 = arith.constant 0 : index
    %c0_78 = arith.constant 0 : index
    %221 = vector.load %arg4[%c0_77, %c0_78] : memref<128x512xbf16, #tpu.memory_space<vmem>>, vector<128x512xbf16>
    %cst_79 = arith.constant dense<0.000000e+00> : vector<2x512xf32>
    %222 = tpu.matmul %220, %221, %cst_79 {dimension_numbers = #tpu.dot_dimension_numbers<[1], [0], [0], [1], [0, 0, 1, 1], [], []>} : vector<2x128xbf16>, vector<128x512xbf16>, vector<2x512xf32> -> vector<2x512xf32>
    %223 = arith.addf %219, %222 : vector<2x512xf32>
    %224 = vector.broadcast %3 : vector<1x512xf32> to vector<2x512xf32>
    %225 = arith.addf %223, %224 : vector<2x512xf32>
    %226 = vector.extract_strided_slice %225 {offsets = [0, 0], sizes = [2, 128], strides = [1, 1]} : vector<2x512xf32> to vector<2x128xf32>
    %227 = arith.negf %226 : vector<2x128xf32>
    %228 = math.exp %227 : vector<2x128xf32>
    %cst_80 = arith.constant 1.000000e+00 : f32
    %229 = vector.broadcast %cst_80 : f32 to vector<2x128xf32>
    %230 = arith.addf %229, %228 : vector<2x128xf32>
    %231 = arith.divf %229, %230 : vector<2x128xf32>
    %232 = vector.extract_strided_slice %225 {offsets = [0, 128], sizes = [2, 128], strides = [1, 1]} : vector<2x512xf32> to vector<2x128xf32>
    %233 = arith.negf %232 : vector<2x128xf32>
    %234 = math.exp %233 : vector<2x128xf32>
    %cst_81 = arith.constant 1.000000e+00 : f32
    %235 = vector.broadcast %cst_81 : f32 to vector<2x128xf32>
    %236 = arith.addf %235, %234 : vector<2x128xf32>
    %237 = arith.divf %235, %236 : vector<2x128xf32>
    %238 = vector.extract_strided_slice %225 {offsets = [0, 256], sizes = [2, 128], strides = [1, 1]} : vector<2x512xf32> to vector<2x128xf32>
    %239 = math.tanh %238 : vector<2x128xf32>
    %240 = vector.extract_strided_slice %225 {offsets = [0, 384], sizes = [2, 128], strides = [1, 1]} : vector<2x512xf32> to vector<2x128xf32>
    %241 = arith.negf %240 : vector<2x128xf32>
    %242 = math.exp %241 : vector<2x128xf32>
    %cst_82 = arith.constant 1.000000e+00 : f32
    %243 = vector.broadcast %cst_82 : f32 to vector<2x128xf32>
    %244 = arith.addf %243, %242 : vector<2x128xf32>
    %245 = arith.divf %243, %244 : vector<2x128xf32>
    %246 = arith.mulf %237, %213 : vector<2x128xf32>
    %247 = arith.mulf %231, %239 : vector<2x128xf32>
    %248 = arith.addf %246, %247 : vector<2x128xf32>
    %249 = math.tanh %248 : vector<2x128xf32>
    %250 = arith.mulf %245, %249 : vector<2x128xf32>
    %c0_83 = arith.constant 0 : index
    %c7 = arith.constant 7 : index
    %c0_84 = arith.constant 0 : index
    %251 = vector.load %arg2[%c0_83, %c7, %c0_84] : memref<2x8x128xbf16, #tpu.memory_space<vmem>>, vector<2x1x128xbf16>
    %252 = vector.shape_cast %251 : vector<2x1x128xbf16> to vector<2x128xbf16>
    %c0_85 = arith.constant 0 : index
    %c0_86 = arith.constant 0 : index
    %253 = vector.load %arg3[%c0_85, %c0_86] : memref<128x512xbf16, #tpu.memory_space<vmem>>, vector<128x512xbf16>
    %cst_87 = arith.constant dense<0.000000e+00> : vector<2x512xf32>
    %254 = tpu.matmul %252, %253, %cst_87 {dimension_numbers = #tpu.dot_dimension_numbers<[1], [0], [0], [1], [0, 0, 1, 1], [], []>} : vector<2x128xbf16>, vector<128x512xbf16>, vector<2x512xf32> -> vector<2x512xf32>
    %255 = arith.truncf %250 : vector<2x128xf32> to vector<2x128xbf16>
    %c0_88 = arith.constant 0 : index
    %c0_89 = arith.constant 0 : index
    %256 = vector.load %arg4[%c0_88, %c0_89] : memref<128x512xbf16, #tpu.memory_space<vmem>>, vector<128x512xbf16>
    %cst_90 = arith.constant dense<0.000000e+00> : vector<2x512xf32>
    %257 = tpu.matmul %255, %256, %cst_90 {dimension_numbers = #tpu.dot_dimension_numbers<[1], [0], [0], [1], [0, 0, 1, 1], [], []>} : vector<2x128xbf16>, vector<128x512xbf16>, vector<2x512xf32> -> vector<2x512xf32>
    %258 = arith.addf %254, %257 : vector<2x512xf32>
    %259 = vector.broadcast %3 : vector<1x512xf32> to vector<2x512xf32>
    %260 = arith.addf %258, %259 : vector<2x512xf32>
    %261 = vector.extract_strided_slice %260 {offsets = [0, 0], sizes = [2, 128], strides = [1, 1]} : vector<2x512xf32> to vector<2x128xf32>
    %262 = arith.negf %261 : vector<2x128xf32>
    %263 = math.exp %262 : vector<2x128xf32>
    %cst_91 = arith.constant 1.000000e+00 : f32
    %264 = vector.broadcast %cst_91 : f32 to vector<2x128xf32>
    %265 = arith.addf %264, %263 : vector<2x128xf32>
    %266 = arith.divf %264, %265 : vector<2x128xf32>
    %267 = vector.extract_strided_slice %260 {offsets = [0, 128], sizes = [2, 128], strides = [1, 1]} : vector<2x512xf32> to vector<2x128xf32>
    %268 = arith.negf %267 : vector<2x128xf32>
    %269 = math.exp %268 : vector<2x128xf32>
    %cst_92 = arith.constant 1.000000e+00 : f32
    %270 = vector.broadcast %cst_92 : f32 to vector<2x128xf32>
    %271 = arith.addf %270, %269 : vector<2x128xf32>
    %272 = arith.divf %270, %271 : vector<2x128xf32>
    %273 = vector.extract_strided_slice %260 {offsets = [0, 256], sizes = [2, 128], strides = [1, 1]} : vector<2x512xf32> to vector<2x128xf32>
    %274 = math.tanh %273 : vector<2x128xf32>
    %275 = vector.extract_strided_slice %260 {offsets = [0, 384], sizes = [2, 128], strides = [1, 1]} : vector<2x512xf32> to vector<2x128xf32>
    %276 = arith.negf %275 : vector<2x128xf32>
    %277 = math.exp %276 : vector<2x128xf32>
    %cst_93 = arith.constant 1.000000e+00 : f32
    %278 = vector.broadcast %cst_93 : f32 to vector<2x128xf32>
    %279 = arith.addf %278, %277 : vector<2x128xf32>
    %280 = arith.divf %278, %279 : vector<2x128xf32>
    %281 = arith.mulf %272, %248 : vector<2x128xf32>
    %282 = arith.mulf %266, %274 : vector<2x128xf32>
    %283 = arith.addf %281, %282 : vector<2x128xf32>
    %284 = math.tanh %283 : vector<2x128xf32>
    %285 = arith.mulf %280, %284 : vector<2x128xf32>
    %c0_94 = arith.constant 0 : index
    %c0_95 = arith.constant 0 : index
    %286 = vector.load %arg9[%c0_94, %c0_95] : memref<2x128xf32, #tpu.memory_space<vmem>>, vector<2x128xf32>
    tpu.vector_store %arg9[%c0_94, %c0_95], %285 {strides = array<i32>} : memref<2x128xf32, #tpu.memory_space<vmem>>, vector<2x128xf32>,
    %c0_96 = arith.constant 0 : index
    %c0_97 = arith.constant 0 : index
    %287 = vector.load %arg10[%c0_96, %c0_97] : memref<2x128xf32, #tpu.memory_space<vmem>>, vector<2x128xf32>
    tpu.vector_store %arg10[%c0_96, %c0_97], %283 {strides = array<i32>} : memref<2x128xf32, #tpu.memory_space<vmem>>, vector<2x128xf32>,
    %c0_i32_98 = arith.constant 0 : i32
    %288 = arith.cmpi eq, %arg1, %c0_i32_98 : i32
    %289 = arith.extui %288 : i1 to i32
    %c0_i32_99 = arith.constant 0 : i32
    %290 = arith.cmpi ne, %289, %c0_i32_99 : i32
    scf.if %290 {
      %291 = arith.truncf %285 : vector<2x128xf32> to vector<2x128xbf16>
      %c0_100 = arith.constant 0 : index
      %c0_101 = arith.constant 0 : index
      %292 = vector.load %arg6[%c0_100, %c0_101] : memref<128x5xbf16, #tpu.memory_space<vmem>>, vector<128x5xbf16>
      %cst_102 = arith.constant dense<0.000000e+00> : vector<2x5xf32>
      %293 = tpu.matmul %291, %292, %cst_102 {dimension_numbers = #tpu.dot_dimension_numbers<[1], [0], [0], [1], [0, 0, 1, 1], [], []>} : vector<2x128xbf16>, vector<128x5xbf16>, vector<2x5xf32> -> vector<2x5xf32>
      %c0_103 = arith.constant 0 : index
      %c0_104 = arith.constant 0 : index
      %294 = vector.load %arg7[%c0_103, %c0_104] : memref<1x5xf32, #tpu.memory_space<vmem>>, vector<1x5xf32>
      %295 = vector.broadcast %294 : vector<1x5xf32> to vector<2x5xf32>
      %296 = arith.addf %293, %295 : vector<2x5xf32>
      %c0_105 = arith.constant 0 : index
      %c0_106 = arith.constant 0 : index
      %297 = vector.load %arg8[%c0_105, %c0_106] : memref<2x5xf32, #tpu.memory_space<vmem>>, vector<2x5xf32>
      tpu.vector_store %arg8[%c0_105, %c0_106], %296 {strides = array<i32>} : memref<2x5xf32, #tpu.memory_space<vmem>>, vector<2x5xf32>,
    } else {
    }
    return
  }
  func.func @transform_0(%arg0: i32, %arg1: i32) -> (i32, i32, i32) {
    %c0_i32 = arith.constant 0 : i32
    %c0_i32_0 = arith.constant 0 : i32
    return %arg0, %arg1, %c0_i32 : i32, i32, i32
  }
  func.func @transform_1(%arg0: i32, %arg1: i32) -> (i32, i32) {
    %c0_i32 = arith.constant 0 : i32
    %c0_i32_0 = arith.constant 0 : i32
    %c0_i32_1 = arith.constant 0 : i32
    return %c0_i32, %c0_i32_0 : i32, i32
  }
  func.func @transform_2(%arg0: i32, %arg1: i32) -> (i32, i32) {
    %c0_i32 = arith.constant 0 : i32
    %c0_i32_0 = arith.constant 0 : i32
    %c0_i32_1 = arith.constant 0 : i32
    return %c0_i32, %c0_i32_0 : i32, i32
  }
  func.func @transform_3(%arg0: i32, %arg1: i32) -> (i32, i32) {
    %c0_i32 = arith.constant 0 : i32
    %c0_i32_0 = arith.constant 0 : i32
    %c0_i32_1 = arith.constant 0 : i32
    return %c0_i32, %c0_i32_0 : i32, i32
  }
  func.func @transform_4(%arg0: i32, %arg1: i32) -> (i32, i32) {
    %c0_i32 = arith.constant 0 : i32
    %c0_i32_0 = arith.constant 0 : i32
    %c0_i32_1 = arith.constant 0 : i32
    return %c0_i32, %c0_i32_0 : i32, i32
  }
  func.func @transform_5(%arg0: i32, %arg1: i32) -> (i32, i32) {
    %c0_i32 = arith.constant 0 : i32
    %c0_i32_0 = arith.constant 0 : i32
    %c0_i32_1 = arith.constant 0 : i32
    return %c0_i32, %c0_i32_0 : i32, i32
  }
  func.func @transform_6(%arg0: i32, %arg1: i32) -> (i32, i32) {
    %c0_i32 = arith.constant 0 : i32
    %c0_i32_0 = arith.constant 0 : i32
    return %arg0, %c0_i32 : i32, i32
  }
}

module attributes {stable_mosaic.version = 11 : i64} {
  func.func @lstm_seq_kernel(%arg0: i32, %arg1: i32, %arg2: memref<2x8x16xbf16, #tpu.memory_space<vmem>>, %arg3: memref<16x512xbf16, #tpu.memory_space<vmem>>, %arg4: memref<128x512xbf16, #tpu.memory_space<vmem>>, %arg5: memref<1x512xf32, #tpu.memory_space<vmem>>, %arg6: memref<2x8x128xbf16, #tpu.memory_space<vmem>>, %arg7: memref<2x128xf32, #tpu.memory_space<vmem>>, %arg8: memref<2x128xf32, #tpu.memory_space<vmem>>) attributes {dimension_semantics = [#tpu.dimension_semantics<parallel>, #tpu.dimension_semantics<arbitrary>], iteration_bounds = array<i64: 1, 1>, scalar_prefetch = 0 : i64, scratch_operands = 2 : i64, tpu.core_type = #tpu.core_type<tc>, window_params = [{transform_indices = @transform_0, window_bounds = array<i64: 2, 8, 16>}, {pipeline_mode = #tpu.pipeline_mode<synchronous>, transform_indices = @transform_1, window_bounds = array<i64: 16, 512>}, {pipeline_mode = #tpu.pipeline_mode<synchronous>, transform_indices = @transform_2, window_bounds = array<i64: 128, 512>}, {pipeline_mode = #tpu.pipeline_mode<synchronous>, transform_indices = @transform_3, window_bounds = array<i64: 1, 512>}, {transform_indices = @transform_4, window_bounds = array<i64: 2, 8, 128>}]} {
    %c0_i32 = arith.constant 0 : i32
    %0 = arith.cmpi eq, %arg1, %c0_i32 : i32
    %1 = arith.extui %0 : i1 to i32
    %c0_i32_0 = arith.constant 0 : i32
    %2 = arith.cmpi ne, %1, %c0_i32_0 : i32
    scf.if %2 {
      %cst_122 = arith.constant 0.000000e+00 : f32
      %320 = vector.broadcast %cst_122 : f32 to vector<2x128xf32>
      %c0_123 = arith.constant 0 : index
      %c0_124 = arith.constant 0 : index
      %321 = vector.load %arg7[%c0_123, %c0_124] : memref<2x128xf32, #tpu.memory_space<vmem>>, vector<2x128xf32>
      tpu.vector_store %arg7[%c0_123, %c0_124], %320 {strides = array<i32>} : memref<2x128xf32, #tpu.memory_space<vmem>>, vector<2x128xf32>,
      %cst_125 = arith.constant 0.000000e+00 : f32
      %322 = vector.broadcast %cst_125 : f32 to vector<2x128xf32>
      %c0_126 = arith.constant 0 : index
      %c0_127 = arith.constant 0 : index
      %323 = vector.load %arg8[%c0_126, %c0_127] : memref<2x128xf32, #tpu.memory_space<vmem>>, vector<2x128xf32>
      tpu.vector_store %arg8[%c0_126, %c0_127], %322 {strides = array<i32>} : memref<2x128xf32, #tpu.memory_space<vmem>>, vector<2x128xf32>,
    } else {
    }
    %c0 = arith.constant 0 : index
    %c0_1 = arith.constant 0 : index
    %3 = vector.load %arg5[%c0, %c0_1] : memref<1x512xf32, #tpu.memory_space<vmem>>, vector<1x512xf32>
    %c0_2 = arith.constant 0 : index
    %c0_3 = arith.constant 0 : index
    %4 = vector.load %arg7[%c0_2, %c0_3] : memref<2x128xf32, #tpu.memory_space<vmem>>, vector<2x128xf32>
    %c0_4 = arith.constant 0 : index
    %c0_5 = arith.constant 0 : index
    %5 = vector.load %arg8[%c0_4, %c0_5] : memref<2x128xf32, #tpu.memory_space<vmem>>, vector<2x128xf32>
    %c0_6 = arith.constant 0 : index
    %c0_7 = arith.constant 0 : index
    %c0_8 = arith.constant 0 : index
    %6 = vector.load %arg2[%c0_6, %c0_7, %c0_8] : memref<2x8x16xbf16, #tpu.memory_space<vmem>>, vector<2x1x16xbf16>
    %7 = vector.shape_cast %6 : vector<2x1x16xbf16> to vector<2x16xbf16>
    %c0_9 = arith.constant 0 : index
    %c0_10 = arith.constant 0 : index
    %8 = vector.load %arg3[%c0_9, %c0_10] : memref<16x512xbf16, #tpu.memory_space<vmem>>, vector<16x512xbf16>
    %cst = arith.constant dense<0.000000e+00> : vector<2x512xf32>
    %9 = tpu.matmul %7, %8, %cst {dimension_numbers = #tpu.dot_dimension_numbers<[1], [0], [0], [1], [0, 0, 1, 1], [], []>} : vector<2x16xbf16>, vector<16x512xbf16>, vector<2x512xf32> -> vector<2x512xf32>
    %10 = arith.truncf %4 : vector<2x128xf32> to vector<2x128xbf16>
    %c0_11 = arith.constant 0 : index
    %c0_12 = arith.constant 0 : index
    %11 = vector.load %arg4[%c0_11, %c0_12] : memref<128x512xbf16, #tpu.memory_space<vmem>>, vector<128x512xbf16>
    %cst_13 = arith.constant dense<0.000000e+00> : vector<2x512xf32>
    %12 = tpu.matmul %10, %11, %cst_13 {dimension_numbers = #tpu.dot_dimension_numbers<[1], [0], [0], [1], [0, 0, 1, 1], [], []>} : vector<2x128xbf16>, vector<128x512xbf16>, vector<2x512xf32> -> vector<2x512xf32>
    %13 = arith.addf %9, %12 : vector<2x512xf32>
    %14 = vector.broadcast %3 : vector<1x512xf32> to vector<2x512xf32>
    %15 = arith.addf %13, %14 : vector<2x512xf32>
    %16 = vector.extract_strided_slice %15 {offsets = [0, 0], sizes = [2, 128], strides = [1, 1]} : vector<2x512xf32> to vector<2x128xf32>
    %17 = arith.negf %16 : vector<2x128xf32>
    %18 = math.exp %17 : vector<2x128xf32>
    %cst_14 = arith.constant 1.000000e+00 : f32
    %19 = vector.broadcast %cst_14 : f32 to vector<2x128xf32>
    %20 = arith.addf %19, %18 : vector<2x128xf32>
    %21 = arith.divf %19, %20 : vector<2x128xf32>
    %22 = vector.extract_strided_slice %15 {offsets = [0, 128], sizes = [2, 128], strides = [1, 1]} : vector<2x512xf32> to vector<2x128xf32>
    %23 = arith.negf %22 : vector<2x128xf32>
    %24 = math.exp %23 : vector<2x128xf32>
    %cst_15 = arith.constant 1.000000e+00 : f32
    %25 = vector.broadcast %cst_15 : f32 to vector<2x128xf32>
    %26 = arith.addf %25, %24 : vector<2x128xf32>
    %27 = arith.divf %25, %26 : vector<2x128xf32>
    %28 = vector.extract_strided_slice %15 {offsets = [0, 256], sizes = [2, 128], strides = [1, 1]} : vector<2x512xf32> to vector<2x128xf32>
    %29 = math.tanh %28 : vector<2x128xf32>
    %30 = vector.extract_strided_slice %15 {offsets = [0, 384], sizes = [2, 128], strides = [1, 1]} : vector<2x512xf32> to vector<2x128xf32>
    %31 = arith.negf %30 : vector<2x128xf32>
    %32 = math.exp %31 : vector<2x128xf32>
    %cst_16 = arith.constant 1.000000e+00 : f32
    %33 = vector.broadcast %cst_16 : f32 to vector<2x128xf32>
    %34 = arith.addf %33, %32 : vector<2x128xf32>
    %35 = arith.divf %33, %34 : vector<2x128xf32>
    %36 = arith.mulf %27, %5 : vector<2x128xf32>
    %37 = arith.mulf %21, %29 : vector<2x128xf32>
    %38 = arith.addf %36, %37 : vector<2x128xf32>
    %39 = math.tanh %38 : vector<2x128xf32>
    %40 = arith.mulf %35, %39 : vector<2x128xf32>
    %41 = arith.truncf %40 : vector<2x128xf32> to vector<2x128xbf16>
    %c0_17 = arith.constant 0 : index
    %c0_18 = arith.constant 0 : index
    %c0_19 = arith.constant 0 : index
    %42 = vector.load %arg6[%c0_17, %c0_18, %c0_19] : memref<2x8x128xbf16, #tpu.memory_space<vmem>>, vector<2x1x128xbf16>
    %43 = vector.shape_cast %42 : vector<2x1x128xbf16> to vector<2x128xbf16>
    %44 = vector.shape_cast %41 : vector<2x128xbf16> to vector<2x1x128xbf16>
    tpu.vector_store %arg6[%c0_17, %c0_18, %c0_19], %44 {strides = array<i32>} : memref<2x8x128xbf16, #tpu.memory_space<vmem>>, vector<2x1x128xbf16>,
    %c0_20 = arith.constant 0 : index
    %c1 = arith.constant 1 : index
    %c0_21 = arith.constant 0 : index
    %45 = vector.load %arg2[%c0_20, %c1, %c0_21] : memref<2x8x16xbf16, #tpu.memory_space<vmem>>, vector<2x1x16xbf16>
    %46 = vector.shape_cast %45 : vector<2x1x16xbf16> to vector<2x16xbf16>
    %c0_22 = arith.constant 0 : index
    %c0_23 = arith.constant 0 : index
    %47 = vector.load %arg3[%c0_22, %c0_23] : memref<16x512xbf16, #tpu.memory_space<vmem>>, vector<16x512xbf16>
    %cst_24 = arith.constant dense<0.000000e+00> : vector<2x512xf32>
    %48 = tpu.matmul %46, %47, %cst_24 {dimension_numbers = #tpu.dot_dimension_numbers<[1], [0], [0], [1], [0, 0, 1, 1], [], []>} : vector<2x16xbf16>, vector<16x512xbf16>, vector<2x512xf32> -> vector<2x512xf32>
    %49 = arith.truncf %40 : vector<2x128xf32> to vector<2x128xbf16>
    %c0_25 = arith.constant 0 : index
    %c0_26 = arith.constant 0 : index
    %50 = vector.load %arg4[%c0_25, %c0_26] : memref<128x512xbf16, #tpu.memory_space<vmem>>, vector<128x512xbf16>
    %cst_27 = arith.constant dense<0.000000e+00> : vector<2x512xf32>
    %51 = tpu.matmul %49, %50, %cst_27 {dimension_numbers = #tpu.dot_dimension_numbers<[1], [0], [0], [1], [0, 0, 1, 1], [], []>} : vector<2x128xbf16>, vector<128x512xbf16>, vector<2x512xf32> -> vector<2x512xf32>
    %52 = arith.addf %48, %51 : vector<2x512xf32>
    %53 = vector.broadcast %3 : vector<1x512xf32> to vector<2x512xf32>
    %54 = arith.addf %52, %53 : vector<2x512xf32>
    %55 = vector.extract_strided_slice %54 {offsets = [0, 0], sizes = [2, 128], strides = [1, 1]} : vector<2x512xf32> to vector<2x128xf32>
    %56 = arith.negf %55 : vector<2x128xf32>
    %57 = math.exp %56 : vector<2x128xf32>
    %cst_28 = arith.constant 1.000000e+00 : f32
    %58 = vector.broadcast %cst_28 : f32 to vector<2x128xf32>
    %59 = arith.addf %58, %57 : vector<2x128xf32>
    %60 = arith.divf %58, %59 : vector<2x128xf32>
    %61 = vector.extract_strided_slice %54 {offsets = [0, 128], sizes = [2, 128], strides = [1, 1]} : vector<2x512xf32> to vector<2x128xf32>
    %62 = arith.negf %61 : vector<2x128xf32>
    %63 = math.exp %62 : vector<2x128xf32>
    %cst_29 = arith.constant 1.000000e+00 : f32
    %64 = vector.broadcast %cst_29 : f32 to vector<2x128xf32>
    %65 = arith.addf %64, %63 : vector<2x128xf32>
    %66 = arith.divf %64, %65 : vector<2x128xf32>
    %67 = vector.extract_strided_slice %54 {offsets = [0, 256], sizes = [2, 128], strides = [1, 1]} : vector<2x512xf32> to vector<2x128xf32>
    %68 = math.tanh %67 : vector<2x128xf32>
    %69 = vector.extract_strided_slice %54 {offsets = [0, 384], sizes = [2, 128], strides = [1, 1]} : vector<2x512xf32> to vector<2x128xf32>
    %70 = arith.negf %69 : vector<2x128xf32>
    %71 = math.exp %70 : vector<2x128xf32>
    %cst_30 = arith.constant 1.000000e+00 : f32
    %72 = vector.broadcast %cst_30 : f32 to vector<2x128xf32>
    %73 = arith.addf %72, %71 : vector<2x128xf32>
    %74 = arith.divf %72, %73 : vector<2x128xf32>
    %75 = arith.mulf %66, %38 : vector<2x128xf32>
    %76 = arith.mulf %60, %68 : vector<2x128xf32>
    %77 = arith.addf %75, %76 : vector<2x128xf32>
    %78 = math.tanh %77 : vector<2x128xf32>
    %79 = arith.mulf %74, %78 : vector<2x128xf32>
    %80 = arith.truncf %79 : vector<2x128xf32> to vector<2x128xbf16>
    %c0_31 = arith.constant 0 : index
    %c1_32 = arith.constant 1 : index
    %c0_33 = arith.constant 0 : index
    %81 = vector.load %arg6[%c0_31, %c1_32, %c0_33] : memref<2x8x128xbf16, #tpu.memory_space<vmem>>, vector<2x1x128xbf16>
    %82 = vector.shape_cast %81 : vector<2x1x128xbf16> to vector<2x128xbf16>
    %83 = vector.shape_cast %80 : vector<2x128xbf16> to vector<2x1x128xbf16>
    tpu.vector_store %arg6[%c0_31, %c1_32, %c0_33], %83 {strides = array<i32>} : memref<2x8x128xbf16, #tpu.memory_space<vmem>>, vector<2x1x128xbf16>,
    %c0_34 = arith.constant 0 : index
    %c2 = arith.constant 2 : index
    %c0_35 = arith.constant 0 : index
    %84 = vector.load %arg2[%c0_34, %c2, %c0_35] : memref<2x8x16xbf16, #tpu.memory_space<vmem>>, vector<2x1x16xbf16>
    %85 = vector.shape_cast %84 : vector<2x1x16xbf16> to vector<2x16xbf16>
    %c0_36 = arith.constant 0 : index
    %c0_37 = arith.constant 0 : index
    %86 = vector.load %arg3[%c0_36, %c0_37] : memref<16x512xbf16, #tpu.memory_space<vmem>>, vector<16x512xbf16>
    %cst_38 = arith.constant dense<0.000000e+00> : vector<2x512xf32>
    %87 = tpu.matmul %85, %86, %cst_38 {dimension_numbers = #tpu.dot_dimension_numbers<[1], [0], [0], [1], [0, 0, 1, 1], [], []>} : vector<2x16xbf16>, vector<16x512xbf16>, vector<2x512xf32> -> vector<2x512xf32>
    %88 = arith.truncf %79 : vector<2x128xf32> to vector<2x128xbf16>
    %c0_39 = arith.constant 0 : index
    %c0_40 = arith.constant 0 : index
    %89 = vector.load %arg4[%c0_39, %c0_40] : memref<128x512xbf16, #tpu.memory_space<vmem>>, vector<128x512xbf16>
    %cst_41 = arith.constant dense<0.000000e+00> : vector<2x512xf32>
    %90 = tpu.matmul %88, %89, %cst_41 {dimension_numbers = #tpu.dot_dimension_numbers<[1], [0], [0], [1], [0, 0, 1, 1], [], []>} : vector<2x128xbf16>, vector<128x512xbf16>, vector<2x512xf32> -> vector<2x512xf32>
    %91 = arith.addf %87, %90 : vector<2x512xf32>
    %92 = vector.broadcast %3 : vector<1x512xf32> to vector<2x512xf32>
    %93 = arith.addf %91, %92 : vector<2x512xf32>
    %94 = vector.extract_strided_slice %93 {offsets = [0, 0], sizes = [2, 128], strides = [1, 1]} : vector<2x512xf32> to vector<2x128xf32>
    %95 = arith.negf %94 : vector<2x128xf32>
    %96 = math.exp %95 : vector<2x128xf32>
    %cst_42 = arith.constant 1.000000e+00 : f32
    %97 = vector.broadcast %cst_42 : f32 to vector<2x128xf32>
    %98 = arith.addf %97, %96 : vector<2x128xf32>
    %99 = arith.divf %97, %98 : vector<2x128xf32>
    %100 = vector.extract_strided_slice %93 {offsets = [0, 128], sizes = [2, 128], strides = [1, 1]} : vector<2x512xf32> to vector<2x128xf32>
    %101 = arith.negf %100 : vector<2x128xf32>
    %102 = math.exp %101 : vector<2x128xf32>
    %cst_43 = arith.constant 1.000000e+00 : f32
    %103 = vector.broadcast %cst_43 : f32 to vector<2x128xf32>
    %104 = arith.addf %103, %102 : vector<2x128xf32>
    %105 = arith.divf %103, %104 : vector<2x128xf32>
    %106 = vector.extract_strided_slice %93 {offsets = [0, 256], sizes = [2, 128], strides = [1, 1]} : vector<2x512xf32> to vector<2x128xf32>
    %107 = math.tanh %106 : vector<2x128xf32>
    %108 = vector.extract_strided_slice %93 {offsets = [0, 384], sizes = [2, 128], strides = [1, 1]} : vector<2x512xf32> to vector<2x128xf32>
    %109 = arith.negf %108 : vector<2x128xf32>
    %110 = math.exp %109 : vector<2x128xf32>
    %cst_44 = arith.constant 1.000000e+00 : f32
    %111 = vector.broadcast %cst_44 : f32 to vector<2x128xf32>
    %112 = arith.addf %111, %110 : vector<2x128xf32>
    %113 = arith.divf %111, %112 : vector<2x128xf32>
    %114 = arith.mulf %105, %77 : vector<2x128xf32>
    %115 = arith.mulf %99, %107 : vector<2x128xf32>
    %116 = arith.addf %114, %115 : vector<2x128xf32>
    %117 = math.tanh %116 : vector<2x128xf32>
    %118 = arith.mulf %113, %117 : vector<2x128xf32>
    %119 = arith.truncf %118 : vector<2x128xf32> to vector<2x128xbf16>
    %c0_45 = arith.constant 0 : index
    %c2_46 = arith.constant 2 : index
    %c0_47 = arith.constant 0 : index
    %120 = vector.load %arg6[%c0_45, %c2_46, %c0_47] : memref<2x8x128xbf16, #tpu.memory_space<vmem>>, vector<2x1x128xbf16>
    %121 = vector.shape_cast %120 : vector<2x1x128xbf16> to vector<2x128xbf16>
    %122 = vector.shape_cast %119 : vector<2x128xbf16> to vector<2x1x128xbf16>
    tpu.vector_store %arg6[%c0_45, %c2_46, %c0_47], %122 {strides = array<i32>} : memref<2x8x128xbf16, #tpu.memory_space<vmem>>, vector<2x1x128xbf16>,
    %c0_48 = arith.constant 0 : index
    %c3 = arith.constant 3 : index
    %c0_49 = arith.constant 0 : index
    %123 = vector.load %arg2[%c0_48, %c3, %c0_49] : memref<2x8x16xbf16, #tpu.memory_space<vmem>>, vector<2x1x16xbf16>
    %124 = vector.shape_cast %123 : vector<2x1x16xbf16> to vector<2x16xbf16>
    %c0_50 = arith.constant 0 : index
    %c0_51 = arith.constant 0 : index
    %125 = vector.load %arg3[%c0_50, %c0_51] : memref<16x512xbf16, #tpu.memory_space<vmem>>, vector<16x512xbf16>
    %cst_52 = arith.constant dense<0.000000e+00> : vector<2x512xf32>
    %126 = tpu.matmul %124, %125, %cst_52 {dimension_numbers = #tpu.dot_dimension_numbers<[1], [0], [0], [1], [0, 0, 1, 1], [], []>} : vector<2x16xbf16>, vector<16x512xbf16>, vector<2x512xf32> -> vector<2x512xf32>
    %127 = arith.truncf %118 : vector<2x128xf32> to vector<2x128xbf16>
    %c0_53 = arith.constant 0 : index
    %c0_54 = arith.constant 0 : index
    %128 = vector.load %arg4[%c0_53, %c0_54] : memref<128x512xbf16, #tpu.memory_space<vmem>>, vector<128x512xbf16>
    %cst_55 = arith.constant dense<0.000000e+00> : vector<2x512xf32>
    %129 = tpu.matmul %127, %128, %cst_55 {dimension_numbers = #tpu.dot_dimension_numbers<[1], [0], [0], [1], [0, 0, 1, 1], [], []>} : vector<2x128xbf16>, vector<128x512xbf16>, vector<2x512xf32> -> vector<2x512xf32>
    %130 = arith.addf %126, %129 : vector<2x512xf32>
    %131 = vector.broadcast %3 : vector<1x512xf32> to vector<2x512xf32>
    %132 = arith.addf %130, %131 : vector<2x512xf32>
    %133 = vector.extract_strided_slice %132 {offsets = [0, 0], sizes = [2, 128], strides = [1, 1]} : vector<2x512xf32> to vector<2x128xf32>
    %134 = arith.negf %133 : vector<2x128xf32>
    %135 = math.exp %134 : vector<2x128xf32>
    %cst_56 = arith.constant 1.000000e+00 : f32
    %136 = vector.broadcast %cst_56 : f32 to vector<2x128xf32>
    %137 = arith.addf %136, %135 : vector<2x128xf32>
    %138 = arith.divf %136, %137 : vector<2x128xf32>
    %139 = vector.extract_strided_slice %132 {offsets = [0, 128], sizes = [2, 128], strides = [1, 1]} : vector<2x512xf32> to vector<2x128xf32>
    %140 = arith.negf %139 : vector<2x128xf32>
    %141 = math.exp %140 : vector<2x128xf32>
    %cst_57 = arith.constant 1.000000e+00 : f32
    %142 = vector.broadcast %cst_57 : f32 to vector<2x128xf32>
    %143 = arith.addf %142, %141 : vector<2x128xf32>
    %144 = arith.divf %142, %143 : vector<2x128xf32>
    %145 = vector.extract_strided_slice %132 {offsets = [0, 256], sizes = [2, 128], strides = [1, 1]} : vector<2x512xf32> to vector<2x128xf32>
    %146 = math.tanh %145 : vector<2x128xf32>
    %147 = vector.extract_strided_slice %132 {offsets = [0, 384], sizes = [2, 128], strides = [1, 1]} : vector<2x512xf32> to vector<2x128xf32>
    %148 = arith.negf %147 : vector<2x128xf32>
    %149 = math.exp %148 : vector<2x128xf32>
    %cst_58 = arith.constant 1.000000e+00 : f32
    %150 = vector.broadcast %cst_58 : f32 to vector<2x128xf32>
    %151 = arith.addf %150, %149 : vector<2x128xf32>
    %152 = arith.divf %150, %151 : vector<2x128xf32>
    %153 = arith.mulf %144, %116 : vector<2x128xf32>
    %154 = arith.mulf %138, %146 : vector<2x128xf32>
    %155 = arith.addf %153, %154 : vector<2x128xf32>
    %156 = math.tanh %155 : vector<2x128xf32>
    %157 = arith.mulf %152, %156 : vector<2x128xf32>
    %158 = arith.truncf %157 : vector<2x128xf32> to vector<2x128xbf16>
    %c0_59 = arith.constant 0 : index
    %c3_60 = arith.constant 3 : index
    %c0_61 = arith.constant 0 : index
    %159 = vector.load %arg6[%c0_59, %c3_60, %c0_61] : memref<2x8x128xbf16, #tpu.memory_space<vmem>>, vector<2x1x128xbf16>
    %160 = vector.shape_cast %159 : vector<2x1x128xbf16> to vector<2x128xbf16>
    %161 = vector.shape_cast %158 : vector<2x128xbf16> to vector<2x1x128xbf16>
    tpu.vector_store %arg6[%c0_59, %c3_60, %c0_61], %161 {strides = array<i32>} : memref<2x8x128xbf16, #tpu.memory_space<vmem>>, vector<2x1x128xbf16>,
    %c0_62 = arith.constant 0 : index
    %c4 = arith.constant 4 : index
    %c0_63 = arith.constant 0 : index
    %162 = vector.load %arg2[%c0_62, %c4, %c0_63] : memref<2x8x16xbf16, #tpu.memory_space<vmem>>, vector<2x1x16xbf16>
    %163 = vector.shape_cast %162 : vector<2x1x16xbf16> to vector<2x16xbf16>
    %c0_64 = arith.constant 0 : index
    %c0_65 = arith.constant 0 : index
    %164 = vector.load %arg3[%c0_64, %c0_65] : memref<16x512xbf16, #tpu.memory_space<vmem>>, vector<16x512xbf16>
    %cst_66 = arith.constant dense<0.000000e+00> : vector<2x512xf32>
    %165 = tpu.matmul %163, %164, %cst_66 {dimension_numbers = #tpu.dot_dimension_numbers<[1], [0], [0], [1], [0, 0, 1, 1], [], []>} : vector<2x16xbf16>, vector<16x512xbf16>, vector<2x512xf32> -> vector<2x512xf32>
    %166 = arith.truncf %157 : vector<2x128xf32> to vector<2x128xbf16>
    %c0_67 = arith.constant 0 : index
    %c0_68 = arith.constant 0 : index
    %167 = vector.load %arg4[%c0_67, %c0_68] : memref<128x512xbf16, #tpu.memory_space<vmem>>, vector<128x512xbf16>
    %cst_69 = arith.constant dense<0.000000e+00> : vector<2x512xf32>
    %168 = tpu.matmul %166, %167, %cst_69 {dimension_numbers = #tpu.dot_dimension_numbers<[1], [0], [0], [1], [0, 0, 1, 1], [], []>} : vector<2x128xbf16>, vector<128x512xbf16>, vector<2x512xf32> -> vector<2x512xf32>
    %169 = arith.addf %165, %168 : vector<2x512xf32>
    %170 = vector.broadcast %3 : vector<1x512xf32> to vector<2x512xf32>
    %171 = arith.addf %169, %170 : vector<2x512xf32>
    %172 = vector.extract_strided_slice %171 {offsets = [0, 0], sizes = [2, 128], strides = [1, 1]} : vector<2x512xf32> to vector<2x128xf32>
    %173 = arith.negf %172 : vector<2x128xf32>
    %174 = math.exp %173 : vector<2x128xf32>
    %cst_70 = arith.constant 1.000000e+00 : f32
    %175 = vector.broadcast %cst_70 : f32 to vector<2x128xf32>
    %176 = arith.addf %175, %174 : vector<2x128xf32>
    %177 = arith.divf %175, %176 : vector<2x128xf32>
    %178 = vector.extract_strided_slice %171 {offsets = [0, 128], sizes = [2, 128], strides = [1, 1]} : vector<2x512xf32> to vector<2x128xf32>
    %179 = arith.negf %178 : vector<2x128xf32>
    %180 = math.exp %179 : vector<2x128xf32>
    %cst_71 = arith.constant 1.000000e+00 : f32
    %181 = vector.broadcast %cst_71 : f32 to vector<2x128xf32>
    %182 = arith.addf %181, %180 : vector<2x128xf32>
    %183 = arith.divf %181, %182 : vector<2x128xf32>
    %184 = vector.extract_strided_slice %171 {offsets = [0, 256], sizes = [2, 128], strides = [1, 1]} : vector<2x512xf32> to vector<2x128xf32>
    %185 = math.tanh %184 : vector<2x128xf32>
    %186 = vector.extract_strided_slice %171 {offsets = [0, 384], sizes = [2, 128], strides = [1, 1]} : vector<2x512xf32> to vector<2x128xf32>
    %187 = arith.negf %186 : vector<2x128xf32>
    %188 = math.exp %187 : vector<2x128xf32>
    %cst_72 = arith.constant 1.000000e+00 : f32
    %189 = vector.broadcast %cst_72 : f32 to vector<2x128xf32>
    %190 = arith.addf %189, %188 : vector<2x128xf32>
    %191 = arith.divf %189, %190 : vector<2x128xf32>
    %192 = arith.mulf %183, %155 : vector<2x128xf32>
    %193 = arith.mulf %177, %185 : vector<2x128xf32>
    %194 = arith.addf %192, %193 : vector<2x128xf32>
    %195 = math.tanh %194 : vector<2x128xf32>
    %196 = arith.mulf %191, %195 : vector<2x128xf32>
    %197 = arith.truncf %196 : vector<2x128xf32> to vector<2x128xbf16>
    %c0_73 = arith.constant 0 : index
    %c4_74 = arith.constant 4 : index
    %c0_75 = arith.constant 0 : index
    %198 = vector.load %arg6[%c0_73, %c4_74, %c0_75] : memref<2x8x128xbf16, #tpu.memory_space<vmem>>, vector<2x1x128xbf16>
    %199 = vector.shape_cast %198 : vector<2x1x128xbf16> to vector<2x128xbf16>
    %200 = vector.shape_cast %197 : vector<2x128xbf16> to vector<2x1x128xbf16>
    tpu.vector_store %arg6[%c0_73, %c4_74, %c0_75], %200 {strides = array<i32>} : memref<2x8x128xbf16, #tpu.memory_space<vmem>>, vector<2x1x128xbf16>,
    %c0_76 = arith.constant 0 : index
    %c5 = arith.constant 5 : index
    %c0_77 = arith.constant 0 : index
    %201 = vector.load %arg2[%c0_76, %c5, %c0_77] : memref<2x8x16xbf16, #tpu.memory_space<vmem>>, vector<2x1x16xbf16>
    %202 = vector.shape_cast %201 : vector<2x1x16xbf16> to vector<2x16xbf16>
    %c0_78 = arith.constant 0 : index
    %c0_79 = arith.constant 0 : index
    %203 = vector.load %arg3[%c0_78, %c0_79] : memref<16x512xbf16, #tpu.memory_space<vmem>>, vector<16x512xbf16>
    %cst_80 = arith.constant dense<0.000000e+00> : vector<2x512xf32>
    %204 = tpu.matmul %202, %203, %cst_80 {dimension_numbers = #tpu.dot_dimension_numbers<[1], [0], [0], [1], [0, 0, 1, 1], [], []>} : vector<2x16xbf16>, vector<16x512xbf16>, vector<2x512xf32> -> vector<2x512xf32>
    %205 = arith.truncf %196 : vector<2x128xf32> to vector<2x128xbf16>
    %c0_81 = arith.constant 0 : index
    %c0_82 = arith.constant 0 : index
    %206 = vector.load %arg4[%c0_81, %c0_82] : memref<128x512xbf16, #tpu.memory_space<vmem>>, vector<128x512xbf16>
    %cst_83 = arith.constant dense<0.000000e+00> : vector<2x512xf32>
    %207 = tpu.matmul %205, %206, %cst_83 {dimension_numbers = #tpu.dot_dimension_numbers<[1], [0], [0], [1], [0, 0, 1, 1], [], []>} : vector<2x128xbf16>, vector<128x512xbf16>, vector<2x512xf32> -> vector<2x512xf32>
    %208 = arith.addf %204, %207 : vector<2x512xf32>
    %209 = vector.broadcast %3 : vector<1x512xf32> to vector<2x512xf32>
    %210 = arith.addf %208, %209 : vector<2x512xf32>
    %211 = vector.extract_strided_slice %210 {offsets = [0, 0], sizes = [2, 128], strides = [1, 1]} : vector<2x512xf32> to vector<2x128xf32>
    %212 = arith.negf %211 : vector<2x128xf32>
    %213 = math.exp %212 : vector<2x128xf32>
    %cst_84 = arith.constant 1.000000e+00 : f32
    %214 = vector.broadcast %cst_84 : f32 to vector<2x128xf32>
    %215 = arith.addf %214, %213 : vector<2x128xf32>
    %216 = arith.divf %214, %215 : vector<2x128xf32>
    %217 = vector.extract_strided_slice %210 {offsets = [0, 128], sizes = [2, 128], strides = [1, 1]} : vector<2x512xf32> to vector<2x128xf32>
    %218 = arith.negf %217 : vector<2x128xf32>
    %219 = math.exp %218 : vector<2x128xf32>
    %cst_85 = arith.constant 1.000000e+00 : f32
    %220 = vector.broadcast %cst_85 : f32 to vector<2x128xf32>
    %221 = arith.addf %220, %219 : vector<2x128xf32>
    %222 = arith.divf %220, %221 : vector<2x128xf32>
    %223 = vector.extract_strided_slice %210 {offsets = [0, 256], sizes = [2, 128], strides = [1, 1]} : vector<2x512xf32> to vector<2x128xf32>
    %224 = math.tanh %223 : vector<2x128xf32>
    %225 = vector.extract_strided_slice %210 {offsets = [0, 384], sizes = [2, 128], strides = [1, 1]} : vector<2x512xf32> to vector<2x128xf32>
    %226 = arith.negf %225 : vector<2x128xf32>
    %227 = math.exp %226 : vector<2x128xf32>
    %cst_86 = arith.constant 1.000000e+00 : f32
    %228 = vector.broadcast %cst_86 : f32 to vector<2x128xf32>
    %229 = arith.addf %228, %227 : vector<2x128xf32>
    %230 = arith.divf %228, %229 : vector<2x128xf32>
    %231 = arith.mulf %222, %194 : vector<2x128xf32>
    %232 = arith.mulf %216, %224 : vector<2x128xf32>
    %233 = arith.addf %231, %232 : vector<2x128xf32>
    %234 = math.tanh %233 : vector<2x128xf32>
    %235 = arith.mulf %230, %234 : vector<2x128xf32>
    %236 = arith.truncf %235 : vector<2x128xf32> to vector<2x128xbf16>
    %c0_87 = arith.constant 0 : index
    %c5_88 = arith.constant 5 : index
    %c0_89 = arith.constant 0 : index
    %237 = vector.load %arg6[%c0_87, %c5_88, %c0_89] : memref<2x8x128xbf16, #tpu.memory_space<vmem>>, vector<2x1x128xbf16>
    %238 = vector.shape_cast %237 : vector<2x1x128xbf16> to vector<2x128xbf16>
    %239 = vector.shape_cast %236 : vector<2x128xbf16> to vector<2x1x128xbf16>
    tpu.vector_store %arg6[%c0_87, %c5_88, %c0_89], %239 {strides = array<i32>} : memref<2x8x128xbf16, #tpu.memory_space<vmem>>, vector<2x1x128xbf16>,
    %c0_90 = arith.constant 0 : index
    %c6 = arith.constant 6 : index
    %c0_91 = arith.constant 0 : index
    %240 = vector.load %arg2[%c0_90, %c6, %c0_91] : memref<2x8x16xbf16, #tpu.memory_space<vmem>>, vector<2x1x16xbf16>
    %241 = vector.shape_cast %240 : vector<2x1x16xbf16> to vector<2x16xbf16>
    %c0_92 = arith.constant 0 : index
    %c0_93 = arith.constant 0 : index
    %242 = vector.load %arg3[%c0_92, %c0_93] : memref<16x512xbf16, #tpu.memory_space<vmem>>, vector<16x512xbf16>
    %cst_94 = arith.constant dense<0.000000e+00> : vector<2x512xf32>
    %243 = tpu.matmul %241, %242, %cst_94 {dimension_numbers = #tpu.dot_dimension_numbers<[1], [0], [0], [1], [0, 0, 1, 1], [], []>} : vector<2x16xbf16>, vector<16x512xbf16>, vector<2x512xf32> -> vector<2x512xf32>
    %244 = arith.truncf %235 : vector<2x128xf32> to vector<2x128xbf16>
    %c0_95 = arith.constant 0 : index
    %c0_96 = arith.constant 0 : index
    %245 = vector.load %arg4[%c0_95, %c0_96] : memref<128x512xbf16, #tpu.memory_space<vmem>>, vector<128x512xbf16>
    %cst_97 = arith.constant dense<0.000000e+00> : vector<2x512xf32>
    %246 = tpu.matmul %244, %245, %cst_97 {dimension_numbers = #tpu.dot_dimension_numbers<[1], [0], [0], [1], [0, 0, 1, 1], [], []>} : vector<2x128xbf16>, vector<128x512xbf16>, vector<2x512xf32> -> vector<2x512xf32>
    %247 = arith.addf %243, %246 : vector<2x512xf32>
    %248 = vector.broadcast %3 : vector<1x512xf32> to vector<2x512xf32>
    %249 = arith.addf %247, %248 : vector<2x512xf32>
    %250 = vector.extract_strided_slice %249 {offsets = [0, 0], sizes = [2, 128], strides = [1, 1]} : vector<2x512xf32> to vector<2x128xf32>
    %251 = arith.negf %250 : vector<2x128xf32>
    %252 = math.exp %251 : vector<2x128xf32>
    %cst_98 = arith.constant 1.000000e+00 : f32
    %253 = vector.broadcast %cst_98 : f32 to vector<2x128xf32>
    %254 = arith.addf %253, %252 : vector<2x128xf32>
    %255 = arith.divf %253, %254 : vector<2x128xf32>
    %256 = vector.extract_strided_slice %249 {offsets = [0, 128], sizes = [2, 128], strides = [1, 1]} : vector<2x512xf32> to vector<2x128xf32>
    %257 = arith.negf %256 : vector<2x128xf32>
    %258 = math.exp %257 : vector<2x128xf32>
    %cst_99 = arith.constant 1.000000e+00 : f32
    %259 = vector.broadcast %cst_99 : f32 to vector<2x128xf32>
    %260 = arith.addf %259, %258 : vector<2x128xf32>
    %261 = arith.divf %259, %260 : vector<2x128xf32>
    %262 = vector.extract_strided_slice %249 {offsets = [0, 256], sizes = [2, 128], strides = [1, 1]} : vector<2x512xf32> to vector<2x128xf32>
    %263 = math.tanh %262 : vector<2x128xf32>
    %264 = vector.extract_strided_slice %249 {offsets = [0, 384], sizes = [2, 128], strides = [1, 1]} : vector<2x512xf32> to vector<2x128xf32>
    %265 = arith.negf %264 : vector<2x128xf32>
    %266 = math.exp %265 : vector<2x128xf32>
    %cst_100 = arith.constant 1.000000e+00 : f32
    %267 = vector.broadcast %cst_100 : f32 to vector<2x128xf32>
    %268 = arith.addf %267, %266 : vector<2x128xf32>
    %269 = arith.divf %267, %268 : vector<2x128xf32>
    %270 = arith.mulf %261, %233 : vector<2x128xf32>
    %271 = arith.mulf %255, %263 : vector<2x128xf32>
    %272 = arith.addf %270, %271 : vector<2x128xf32>
    %273 = math.tanh %272 : vector<2x128xf32>
    %274 = arith.mulf %269, %273 : vector<2x128xf32>
    %275 = arith.truncf %274 : vector<2x128xf32> to vector<2x128xbf16>
    %c0_101 = arith.constant 0 : index
    %c6_102 = arith.constant 6 : index
    %c0_103 = arith.constant 0 : index
    %276 = vector.load %arg6[%c0_101, %c6_102, %c0_103] : memref<2x8x128xbf16, #tpu.memory_space<vmem>>, vector<2x1x128xbf16>
    %277 = vector.shape_cast %276 : vector<2x1x128xbf16> to vector<2x128xbf16>
    %278 = vector.shape_cast %275 : vector<2x128xbf16> to vector<2x1x128xbf16>
    tpu.vector_store %arg6[%c0_101, %c6_102, %c0_103], %278 {strides = array<i32>} : memref<2x8x128xbf16, #tpu.memory_space<vmem>>, vector<2x1x128xbf16>,
    %c0_104 = arith.constant 0 : index
    %c7 = arith.constant 7 : index
    %c0_105 = arith.constant 0 : index
    %279 = vector.load %arg2[%c0_104, %c7, %c0_105] : memref<2x8x16xbf16, #tpu.memory_space<vmem>>, vector<2x1x16xbf16>
    %280 = vector.shape_cast %279 : vector<2x1x16xbf16> to vector<2x16xbf16>
    %c0_106 = arith.constant 0 : index
    %c0_107 = arith.constant 0 : index
    %281 = vector.load %arg3[%c0_106, %c0_107] : memref<16x512xbf16, #tpu.memory_space<vmem>>, vector<16x512xbf16>
    %cst_108 = arith.constant dense<0.000000e+00> : vector<2x512xf32>
    %282 = tpu.matmul %280, %281, %cst_108 {dimension_numbers = #tpu.dot_dimension_numbers<[1], [0], [0], [1], [0, 0, 1, 1], [], []>} : vector<2x16xbf16>, vector<16x512xbf16>, vector<2x512xf32> -> vector<2x512xf32>
    %283 = arith.truncf %274 : vector<2x128xf32> to vector<2x128xbf16>
    %c0_109 = arith.constant 0 : index
    %c0_110 = arith.constant 0 : index
    %284 = vector.load %arg4[%c0_109, %c0_110] : memref<128x512xbf16, #tpu.memory_space<vmem>>, vector<128x512xbf16>
    %cst_111 = arith.constant dense<0.000000e+00> : vector<2x512xf32>
    %285 = tpu.matmul %283, %284, %cst_111 {dimension_numbers = #tpu.dot_dimension_numbers<[1], [0], [0], [1], [0, 0, 1, 1], [], []>} : vector<2x128xbf16>, vector<128x512xbf16>, vector<2x512xf32> -> vector<2x512xf32>
    %286 = arith.addf %282, %285 : vector<2x512xf32>
    %287 = vector.broadcast %3 : vector<1x512xf32> to vector<2x512xf32>
    %288 = arith.addf %286, %287 : vector<2x512xf32>
    %289 = vector.extract_strided_slice %288 {offsets = [0, 0], sizes = [2, 128], strides = [1, 1]} : vector<2x512xf32> to vector<2x128xf32>
    %290 = arith.negf %289 : vector<2x128xf32>
    %291 = math.exp %290 : vector<2x128xf32>
    %cst_112 = arith.constant 1.000000e+00 : f32
    %292 = vector.broadcast %cst_112 : f32 to vector<2x128xf32>
    %293 = arith.addf %292, %291 : vector<2x128xf32>
    %294 = arith.divf %292, %293 : vector<2x128xf32>
    %295 = vector.extract_strided_slice %288 {offsets = [0, 128], sizes = [2, 128], strides = [1, 1]} : vector<2x512xf32> to vector<2x128xf32>
    %296 = arith.negf %295 : vector<2x128xf32>
    %297 = math.exp %296 : vector<2x128xf32>
    %cst_113 = arith.constant 1.000000e+00 : f32
    %298 = vector.broadcast %cst_113 : f32 to vector<2x128xf32>
    %299 = arith.addf %298, %297 : vector<2x128xf32>
    %300 = arith.divf %298, %299 : vector<2x128xf32>
    %301 = vector.extract_strided_slice %288 {offsets = [0, 256], sizes = [2, 128], strides = [1, 1]} : vector<2x512xf32> to vector<2x128xf32>
    %302 = math.tanh %301 : vector<2x128xf32>
    %303 = vector.extract_strided_slice %288 {offsets = [0, 384], sizes = [2, 128], strides = [1, 1]} : vector<2x512xf32> to vector<2x128xf32>
    %304 = arith.negf %303 : vector<2x128xf32>
    %305 = math.exp %304 : vector<2x128xf32>
    %cst_114 = arith.constant 1.000000e+00 : f32
    %306 = vector.broadcast %cst_114 : f32 to vector<2x128xf32>
    %307 = arith.addf %306, %305 : vector<2x128xf32>
    %308 = arith.divf %306, %307 : vector<2x128xf32>
    %309 = arith.mulf %300, %272 : vector<2x128xf32>
    %310 = arith.mulf %294, %302 : vector<2x128xf32>
    %311 = arith.addf %309, %310 : vector<2x128xf32>
    %312 = math.tanh %311 : vector<2x128xf32>
    %313 = arith.mulf %308, %312 : vector<2x128xf32>
    %314 = arith.truncf %313 : vector<2x128xf32> to vector<2x128xbf16>
    %c0_115 = arith.constant 0 : index
    %c7_116 = arith.constant 7 : index
    %c0_117 = arith.constant 0 : index
    %315 = vector.load %arg6[%c0_115, %c7_116, %c0_117] : memref<2x8x128xbf16, #tpu.memory_space<vmem>>, vector<2x1x128xbf16>
    %316 = vector.shape_cast %315 : vector<2x1x128xbf16> to vector<2x128xbf16>
    %317 = vector.shape_cast %314 : vector<2x128xbf16> to vector<2x1x128xbf16>
    tpu.vector_store %arg6[%c0_115, %c7_116, %c0_117], %317 {strides = array<i32>} : memref<2x8x128xbf16, #tpu.memory_space<vmem>>, vector<2x1x128xbf16>,
    %c0_118 = arith.constant 0 : index
    %c0_119 = arith.constant 0 : index
    %318 = vector.load %arg7[%c0_118, %c0_119] : memref<2x128xf32, #tpu.memory_space<vmem>>, vector<2x128xf32>
    tpu.vector_store %arg7[%c0_118, %c0_119], %313 {strides = array<i32>} : memref<2x128xf32, #tpu.memory_space<vmem>>, vector<2x128xf32>,
    %c0_120 = arith.constant 0 : index
    %c0_121 = arith.constant 0 : index
    %319 = vector.load %arg8[%c0_120, %c0_121] : memref<2x128xf32, #tpu.memory_space<vmem>>, vector<2x128xf32>
    tpu.vector_store %arg8[%c0_120, %c0_121], %311 {strides = array<i32>} : memref<2x128xf32, #tpu.memory_space<vmem>>, vector<2x128xf32>,
    return
  }
  func.func @transform_0(%arg0: i32, %arg1: i32) -> (i32, i32, i32) {
    %c0_i32 = arith.constant 0 : i32
    %c0_i32_0 = arith.constant 0 : i32
    return %arg0, %arg1, %c0_i32 : i32, i32, i32
  }
  func.func @transform_1(%arg0: i32, %arg1: i32) -> (i32, i32) {
    %c0_i32 = arith.constant 0 : i32
    %c0_i32_0 = arith.constant 0 : i32
    %c0_i32_1 = arith.constant 0 : i32
    return %c0_i32, %c0_i32_0 : i32, i32
  }
  func.func @transform_2(%arg0: i32, %arg1: i32) -> (i32, i32) {
    %c0_i32 = arith.constant 0 : i32
    %c0_i32_0 = arith.constant 0 : i32
    %c0_i32_1 = arith.constant 0 : i32
    return %c0_i32, %c0_i32_0 : i32, i32
  }
  func.func @transform_3(%arg0: i32, %arg1: i32) -> (i32, i32) {
    %c0_i32 = arith.constant 0 : i32
    %c0_i32_0 = arith.constant 0 : i32
    %c0_i32_1 = arith.constant 0 : i32
    return %c0_i32, %c0_i32_0 : i32, i32
  }
  func.func @transform_4(%arg0: i32, %arg1: i32) -> (i32, i32, i32) {
    %c0_i32 = arith.constant 0 : i32
    %c0_i32_0 = arith.constant 0 : i32
    return %arg0, %arg1, %c0_i32 : i32, i32, i32
  }
}

</mosaic_0001>

<bundles_post_ra>
// kernel: lstm_forward.3
= control target key start
LH: loop header
LB: loop body
LE: loop exit
PB: predicated region body
PF: predicated region fallthrough
CT: control target
= control target key end

     0   :  { %11 = vsyncpa [#allocation5], 0  ;;  %s3936_s0 = inlined_call_operand.vmem [shape: bf16[2,8,128], index: 0, kind: input, shape index: {}]   ;;  %s3937_s1 = inlined_call_operand.vmem [shape: bf16[128,512], index: 1, kind: input, shape index: {}]   ;;  %s3938_s2 = inlined_call_operand.hbm [shape: bf16[128,512], index: 2, kind: input, shape index: {}]   ;;  %s3939_s3 = inlined_call_operand.vmem [shape: f32[1,512], index: 3, kind: input, shape index: {}]   ;;  %s3940_s4 = inlined_call_operand.vmem [shape: bf16[128,5], index: 4, kind: input, shape index: {}]   ;;  %s3941_s5 = inlined_call_operand.vmem [shape: f32[1,5], index: 5, kind: input, shape index: {}]   ;;  %s3942_s6 = inlined_call_operand.hbm [shape: f32[2,5], index: 6, kind: output, shape index: {}]  }
   0x1   :  { %12 = vsyncpa [#allocation6], 0  ;;  %s2699_s21 = smov [#allocation4]  }
   0x2   :  { %s22_s22 = sshll.u32 %s2699_s21, 4  ;;  %s23_s22 = int_to_ptr.vmem [resolvable:$true] %s22_s22 }
   0x3   :  { %s2663_s23 = scalar_lea.vmem %s23_s22, 4096  ;;  %p2668_p1 = scmp.lt.s32.totalorder %s23_s22, %s23_s22 }
   0x4   :  { %p2664_p0 = scmp.ne.s32.totalorder %s23_s22, %s2663_s23  ;;  %p2669_p2 = scmp.lt.s32.totalorder %s2663_s23, %s2663_s23 }
   0x6   :  { %p2670_p3 = por %p2669_p2, %p2668_p1 }
   0x8   :  { %p2671_p4 = pnand %p2670_p3, %p2664_p0 }
   0xa   :  { %2674 = shalt.err (!%p2671_p4)
}
   0xb   :  { %s2700_s24 = smov 256   ;;  %s2701_s25 = smov 16  }
   0xc   :  { %28 = dma.hbm_to_vmem [thread:$0]  %s3938_s2, 4096, %s23_s22, [#allocation5], %s2700_s24, %s2700_s24, %s2701_s25  }
   0xd   :  { %2695 = dma.done.wait [#allocation5], 4096  }
   0xe   :  { %2696 = vsyncadd [#allocation5], 4294963200  ;;  %v3945_v0 = vmov 0   ;;  %v3943_v1 = vmov 0.0   ;;  %v2748_v2 = vld [vmem:[#allocation4 + $0xe4] ss:$16 sps:$4 sm:$0xff]  }
   0xf   :  { %307 = vmatprep.mubr.bf16.mxu0 %v3945_v0  ;;  %43 = vst [vmem:[#allocation2] sm:$0x3] %v3943_v1  ;;  %44 = vst [vmem:[#allocation3] sm:$0x3] %v3943_v1  ;;  %348 = vmatprep.mubr.bf16.mxu1 %v3945_v0  ;;  %v2750_v3 = vld [vmem:[#allocation4 + $0xec] ss:$16 sps:$4 sm:$0xff]  }
  0x10   :  { %275 = vmatprep.subr.bf16.mxu0 %v2748_v2  ;;  %v2753_v4 = vld [vmem:[#allocation4 + $0xe0] ss:$16 sps:$4 sm:$0xff]   ;;  %v2755_v5 = vld [vmem:[#allocation4 + $0xe8] ss:$16 sps:$4 sm:$0xff]   ;;  %316 = vmatprep.subr.bf16.mxu1 %v2750_v3  ;;  %v2758_v6 = vld [vmem:[#allocation4 + $0xc4] ss:$16 sps:$4 sm:$0xff]  }
  0x11   :  { %276 = vmatpush1.bf16.msra.mxu0 %v2753_v4  ;;  %317 = vmatpush1.bf16.msra.mxu1 %v2755_v5  ;;  %v2762_v7 = vld [vmem:[#allocation4 + $0xcc] ss:$16 sps:$4 sm:$0xff]   ;;  %v2764_v8 = vld [vmem:[#allocation4 + $0xc0] ss:$16 sps:$4 sm:$0xff]   ;;  %v2767_v9 = vld [vmem:[#allocation4 + $0xc8] ss:$16 sps:$4 sm:$0xff]  }
  0x12   :  { %4078 = vst [vmem:[#allocation10_spill] sm:$0xff] %v2764_v8  ;;  %277 = vmatprep.subr.bf16.mxu0 %v2758_v6  ;;  %4079 = vst [vmem:[#allocation11_spill] sm:$0xff] %v2767_v9  ;;  %318 = vmatprep.subr.bf16.mxu1 %v2762_v7  ;;  %v2770_v10 = vld [vmem:[#allocation4 + $0xa4] ss:$16 sps:$4 sm:$0xff]   ;;  %v2772_v11 = vld [vmem:[#allocation4 + $0xac] ss:$16 sps:$4 sm:$0xff]  }
  0x13   :  { %4080 = vst [vmem:[#allocation12_spill] sm:$0xff] %v2770_v10  ;;  %4081 = vst [vmem:[#allocation13_spill] sm:$0xff] %v2772_v11  ;;  %v2774_v12 = vld [vmem:[#allocation4 + $0xa0] ss:$16 sps:$4 sm:$0xff]   ;;  %v2776_v13 = vld [vmem:[#allocation4 + $0xa8] ss:$16 sps:$4 sm:$0xff]  }
  0x14   :  { %4082 = vst [vmem:[#allocation14_spill] sm:$0xff] %v2774_v12  ;;  %4083 = vst [vmem:[#allocation15_spill] sm:$0xff] %v2776_v13  ;;  %v2780_v14 = vld [vmem:[#allocation4 + $0x84] ss:$16 sps:$4 sm:$0xff]   ;;  %v2784_v15 = vld [vmem:[#allocation4 + $0x8c] ss:$16 sps:$4 sm:$0xff]  }
  0x15   :  { %278 = vmatpush1.bf16.msra.mxu0 %v2764_v8  ;;  %319 = vmatpush1.bf16.msra.mxu1 %v2767_v9  ;;  %4084 = vst [vmem:[#allocation16_spill] sm:$0xff] %v2780_v14  ;;  %4085 = vst [vmem:[#allocation17_spill] sm:$0xff] %v2784_v15  ;;  %v2786_v16 = vld [vmem:[#allocation4 + $0x80] ss:$16 sps:$4 sm:$0xff]   ;;  %v2790_v17 = vld [vmem:[#allocation4 + $0x88] ss:$16 sps:$4 sm:$0xff]  }
  0x16   :  { %279 = vmatprep.subr.bf16.mxu0 %v2770_v10  ;;  %320 = vmatprep.subr.bf16.mxu1 %v2772_v11  ;;  %4086 = vst [vmem:[#allocation18_spill] sm:$0xff] %v2786_v16  ;;  %4087 = vst [vmem:[#allocation19_spill] sm:$0xff] %v2790_v17  ;;  %v2792_v18 = vld [vmem:[#allocation4 + $0x64] ss:$16 sps:$4 sm:$0xff]   ;;  %v2796_v19 = vld [vmem:[#allocation4 + $0x6c] ss:$16 sps:$4 sm:$0xff]  }
  0x17   :  { %4088 = vst [vmem:[#allocation20_spill] sm:$0xff] %v2792_v18  ;;  %4089 = vst [vmem:[#allocation21_spill] sm:$0xff] %v2796_v19  ;;  %v2798_v20 = vld [vmem:[#allocation4 + $0x60] ss:$16 sps:$4 sm:$0xff]   ;;  %v2800_v21 = vld [vmem:[#allocation4 + $0x68] ss:$16 sps:$4 sm:$0xff]  }
  0x18   :  { %4090 = vst [vmem:[#allocation22_spill] sm:$0xff] %v2798_v20  ;;  %4091 = vst [vmem:[#allocation23_spill] sm:$0xff] %v2800_v21  ;;  %v2804_v22 = vld [vmem:[#allocation4 + $0x44] ss:$16 sps:$4 sm:$0xff]   ;;  %v2808_v23 = vld [vmem:[#allocation4 + $0x4c] ss:$16 sps:$4 sm:$0xff]  }
  0x19   :  { %280 = vmatpush1.bf16.msra.mxu0 %v2774_v12  ;;  %321 = vmatpush1.bf16.msra.mxu1 %v2776_v13  ;;  %4092 = vst [vmem:[#allocation24_spill] sm:$0xff] %v2804_v22  ;;  %4093 = vst [vmem:[#allocation25_spill] sm:$0xff] %v2808_v23  ;;  %v2812_v24 = vld [vmem:[#allocation4 + $0x40] ss:$16 sps:$4 sm:$0xff]   ;;  %v2814_v25 = vld [vmem:[#allocation4 + $0x48] ss:$16 sps:$4 sm:$0xff]  }
  0x1a   :  { %281 = vmatprep.subr.bf16.mxu0 %v2780_v14  ;;  %322 = vmatprep.subr.bf16.mxu1 %v2784_v15  ;;  %4094 = vst [vmem:[#allocation26_spill] sm:$0xff] %v2812_v24  ;;  %4095 = vst [vmem:[#allocation27_spill] sm:$0xff] %v2814_v25  ;;  %v2818_v26 = vld [vmem:[#allocation4 + $0x24] ss:$16 sps:$4 sm:$0xff]   ;;  %v2820_v27 = vld [vmem:[#allocation4 + $0x2c] ss:$16 sps:$4 sm:$0xff]  }
  0x1b   :  { %4096 = vst [vmem:[#allocation28_spill] sm:$0xff] %v2818_v26  ;;  %4097 = vst [vmem:[#allocation29_spill] sm:$0xff] %v2820_v27  ;;  %v2822_v28 = vld [vmem:[#allocation4 + $0x20] ss:$16 sps:$4 sm:$0xff]   ;;  %v2824_v29 = vld [vmem:[#allocation4 + $0x28] ss:$16 sps:$4 sm:$0xff]  }
  0x1c   :  { %4098 = vst [vmem:[#allocation30_spill] sm:$0xff] %v2822_v28  ;;  %4099 = vst [vmem:[#allocation31_spill] sm:$0xff] %v2824_v29  ;;  %v2828_v30 = vld [vmem:[#allocation4 + $0x4] ss:$16 sps:$4 sm:$0xff]   ;;  %v2832_v31 = vld [vmem:[#allocation4 + $0xc] ss:$16 sps:$4 sm:$0xff]  }
  0x1d   :  { %282 = vmatpush1.bf16.msra.mxu0 %v2786_v16  ;;  %323 = vmatpush1.bf16.msra.mxu1 %v2790_v17  ;;  %4100 = vst [vmem:[#allocation32_spill] sm:$0xff] %v2828_v30  ;;  %4101 = vst [vmem:[#allocation33_spill] sm:$0xff] %v2832_v31  ;;  %v2834_v32 = vld [vmem:[#allocation4] ss:$16 sps:$4 sm:$0xff]   ;;  %v2836_v33 = vld [vmem:[#allocation4 + $0x8] ss:$16 sps:$4 sm:$0xff]  }
  0x1e   :  { %283 = vmatprep.subr.bf16.mxu0 %v2792_v18  ;;  %324 = vmatprep.subr.bf16.mxu1 %v2796_v19  ;;  %4102 = vst [vmem:[#allocation34_spill] sm:$0xff] %v2834_v32  ;;  %4103 = vst [vmem:[#allocation35_spill] sm:$0xff] %v2836_v33  ;;  %v46_v34 = vld [vmem:[#allocation2] sm:$0x3]  ;;  %v2845_v35 = vld [vmem:[%s3937_s1 + $0xe4] ss:$16 sps:$4 sm:$0xff]  }
  0x1f   :  { %4104 = vst [vmem:[#allocation36_spill] sm:$0xff] %v2845_v35  ;;  %v2850_v36 = vld [vmem:[%s3937_s1 + $0xec] ss:$16 sps:$4 sm:$0xff]   ;;  %v82_v37 = vpack.c.bf16 %v46_v34, %v46_v34  ;;  %v2855_v38 = vld [vmem:[%s3937_s1 + $0xe0] ss:$16 sps:$4 sm:$0xff]   ;;  %vm366_vm0 = vcmask 1041409  }
  0x20   :  { %4105 = vst [vmem:[#allocation37_spill] sm:$0xff] %v2850_v36  ;;  %v2860_v39 = vld [vmem:[%s3937_s1 + $0xe8] ss:$16 sps:$4 sm:$0xff]   ;;  %v2867_v40 = vld [vmem:[%s3937_s1 + $0xc4] ss:$16 sps:$4 sm:$0xff]   ;;  %vm2704_vm1 = vmmov 0  }
  0x21   :  { %284 = vmatpush1.bf16.msra.mxu0 %v2798_v20  ;;  %325 = vmatpush1.bf16.msra.mxu1 %v2800_v21  ;;  %v2874_v41 = vld [vmem:[%s3937_s1 + $0xcc] ss:$16 sps:$4 sm:$0xff]   ;;  %v2879_v42 = vld [vmem:[%s3937_s1 + $0xc0] ss:$16 sps:$4 sm:$0xff]   ;;  %v2886_v43 = vld [vmem:[%s3937_s1 + $0xc8] ss:$16 sps:$4 sm:$0xff]  }
  0x22   :  { %285 = vmatprep.subr.bf16.mxu0 %v2804_v22  ;;  %326 = vmatprep.subr.bf16.mxu1 %v2808_v23  ;;  %v2893_v44 = vld [vmem:[%s3937_s1 + $0xa4] ss:$16 sps:$4 sm:$0xff]   ;;  %v2898_v45 = vld [vmem:[%s3937_s1 + $0xac] ss:$16 sps:$4 sm:$0xff]   ;;  %v2905_v46 = vld [vmem:[%s3937_s1 + $0xa0] ss:$16 sps:$4 sm:$0xff]  }
  0x23   :  { %v2910_v47 = vld [vmem:[%s3937_s1 + $0xa8] ss:$16 sps:$4 sm:$0xff]   ;;  %v2917_v48 = vld [vmem:[%s3937_s1 + $0x84] ss:$16 sps:$4 sm:$0xff]   ;;  %v2924_v49 = vld [vmem:[%s3937_s1 + $0x8c] ss:$16 sps:$4 sm:$0xff]  }
  0x24   :  { %v2929_v50 = vld [vmem:[%s3937_s1 + $0x80] ss:$16 sps:$4 sm:$0xff]   ;;  %v2936_v51 = vld [vmem:[%s3937_s1 + $0x88] ss:$16 sps:$4 sm:$0xff]   ;;  %v2941_v52 = vld [vmem:[%s3937_s1 + $0x64] ss:$16 sps:$4 sm:$0xff]  }
  0x25   :  { %286 = vmatpush1.bf16.msra.mxu0 %v2812_v24  ;;  %327 = vmatpush1.bf16.msra.mxu1 %v2814_v25  ;;  %v2946_v53 = vld [vmem:[%s3937_s1 + $0x6c] ss:$16 sps:$4 sm:$0xff]   ;;  %v2953_v54 = vld [vmem:[%s3937_s1 + $0x60] ss:$16 sps:$4 sm:$0xff]   ;;  %v2958_v55 = vld [vmem:[%s3937_s1 + $0x68] ss:$16 sps:$4 sm:$0xff]  }
  0x26   :  { %287 = vmatprep.subr.bf16.mxu0 %v2818_v26  ;;  %328 = vmatprep.subr.bf16.mxu1 %v2820_v27  ;;  %v2963_v56 = vld [vmem:[%s3936_s0 + $0x4] ss:$0 sps:$4 sm:$0x11]   ;;  %v2975_v58 = vld [vmem:[%s3937_s1 + $0x4c] ss:$16 sps:$4 sm:$0xff]   ;;  %s2705_s10 = smov [#allocation7]  }
  0x27   :  { %4106 = vst [vmem:[#allocation38_spill] sm:$0xff] %v2963_v56  ;;  %v2968_v57 = vld [vmem:[%s3937_s1 + $0x44] ss:$16 sps:$4 sm:$0xff]   ;;  %4107 = vst [vmem:[#allocation39_spill] sm:$0xff] %v2975_v58  ;;  %v2982_v59 = vld [vmem:[%s3937_s1 + $0x40] ss:$16 sps:$4 sm:$0xff]   ;;  %v3953_v62 = vunpack.c.l.b16 %v2963_v56 }
  0x28   :  { %4108 = vst [vmem:[#allocation40_spill] sm:$0xff] %v2982_v59  ;;  %v2987_v60 = vld [vmem:[%s3937_s1 + $0x48] ss:$16 sps:$4 sm:$0xff]   ;;  %v2994_v61 = vld [vmem:[%s3936_s0] ss:$0 sps:$4 sm:$0x11]  }
  0x29   :  { %288 = vmatpush1.bf16.msra.mxu0 %v2822_v28  ;;  %329 = vmatpush1.bf16.msra.mxu1 %v2824_v29  ;;  %4109 = vst [vmem:[#allocation41_spill] sm:$0xff] %v2987_v60  ;;  %v3002_v63 = vld [vmem:[%s3937_s1 + $0x24] ss:$16 sps:$4 sm:$0xff]   ;;  %v3007_v34 = vld [vmem:[%s3937_s1 + $0x2c] ss:$16 sps:$4 sm:$0xff]   ;;  %v4112_v56 = vunpack.c.l.b16 %v2994_v61  ;;  %s2201_s11 = sshll.u32 %s2705_s10, 4  ;;  %s2202_s11 = int_to_ptr.vmem [resolvable:$true] %s2201_s11 }
  0x2a   :  { %289 = vmatprep.subr.bf16.mxu0 %v2828_v30  ;;  %330 = vmatprep.subr.bf16.mxu1 %v2832_v31  ;;  %4110 = vst [vmem:[#allocation42_spill] sm:$0xff] %v3007_v34  ;;  %v3019_v1 = vld [vmem:[%s3937_s1 + $0x28] ss:$16 sps:$4 sm:$0xff]   ;;  %vm2193_vm2 = vcmask 33792   ;;  %s2675_s12 = scalar_lea.vmem %s2202_s11, 32  ;;  %p2680_p6 = scmp.lt.s32.totalorder %s2202_s11, %s2202_s11 }
  0x2b   :  { %p2676_p5 = scmp.ne.s32.totalorder %s2202_s11, %s2675_s12  ;;  %p2681_p7 = scmp.lt.s32.totalorder %s2675_s12, %s2675_s12 }
  0x2d   :  { %290 = vmatpush1.bf16.msra.mxu0 %v2834_v32  ;;  %331 = vmatpush1.bf16.msra.mxu1 %v2836_v33  ;;  %p2682_p8 = por %p2681_p7, %p2680_p6 }
  0x2e   :  { %530 = vmatprep.subr.bf16.mxu0 %v2845_v35  ;;  %571 = vmatprep.subr.bf16.mxu1 %v2850_v36 }
  0x2f   :  { %p2683_p9 = pnand %p2682_p8, %p2676_p5 }
  0x30   :  { %308 = vmatmul.mubr.bf16.vlgmr.msra.gmra.mxu0 %v82_v37  ;;  %349 = vmatmul.mubr.bf16.vlgmr.msra.gmra.mxu1 %v82_v37  ;;  %v3014_v37 = vld [vmem:[%s3937_s1 + $0x20] ss:$16 sps:$4 sm:$0xff]  }
  0x31   :  { %531 = vmatpush1.bf16.msra.mxu0 %v2855_v38  ;;  %572 = vmatpush1.bf16.msra.mxu1 %v2860_v39  ;;  %4111 = vst [vmem:[#allocation43_spill] sm:$0xff] %v3014_v37 }
  0x32   :  { %532 = vmatprep.subr.bf16.mxu0 %v2867_v40  ;;  %573 = vmatprep.subr.bf16.mxu1 %v2874_v41 }
  0x33   :  { %562 = vmatprep.mubr.bf16.mxu0 %v3945_v0  ;;  %603 = vmatprep.mubr.bf16.mxu1 %v3945_v0  ;;  %v3046_v0 = vld [vmem:[%s3937_s1 + $0x8] ss:$16 sps:$4 sm:$0xff]  }
  0x35   :  { %533 = vmatpush1.bf16.msra.mxu0 %v2879_v42  ;;  %574 = vmatpush1.bf16.msra.mxu1 %v2886_v43 }
  0x36   :  { %534 = vmatprep.subr.bf16.mxu0 %v2893_v44  ;;  %575 = vmatprep.subr.bf16.mxu1 %v2898_v45 }
  0x39   :  { %535 = vmatpush1.bf16.msra.mxu0 %v2905_v46  ;;  %576 = vmatpush1.bf16.msra.mxu1 %v2910_v47 }
  0x3a   :  { %536 = vmatprep.subr.bf16.mxu0 %v2917_v48  ;;  %577 = vmatprep.subr.bf16.mxu1 %v2924_v49 }
  0x3d   :  { %537 = vmatpush1.bf16.msra.mxu0 %v2929_v50  ;;  %578 = vmatpush1.bf16.msra.mxu1 %v2936_v51 }
  0x3e   :  { %538 = vmatprep.subr.bf16.mxu0 %v2941_v52  ;;  %579 = vmatprep.subr.bf16.mxu1 %v2946_v53 }
  0x41   :  { %539 = vmatpush1.bf16.msra.mxu0 %v2953_v54  ;;  %580 = vmatpush1.bf16.msra.mxu1 %v2958_v55 }
  0x42   :  { %540 = vmatprep.subr.bf16.mxu0 %v2968_v57  ;;  %581 = vmatprep.subr.bf16.mxu1 %v2975_v58  ;;  %v365_v58 = vrot.slane %v3953_v62, 7  ;;  %v3041_v62 = vld [vmem:[%s3937_s1] ss:$16 sps:$4 sm:$0xff]  }
  0x45   :  { %541 = vmatpush1.bf16.msra.mxu0 %v2982_v59  ;;  %582 = vmatpush1.bf16.msra.mxu1 %v2987_v60  ;;  %v3029_v60 = vld [vmem:[%s3937_s1 + $0x4] ss:$16 sps:$4 sm:$0xff]   ;;  %v3034_v59 = vld [vmem:[%s3937_s1 + $0xc] ss:$16 sps:$4 sm:$0xff]  }
  0x46   :  { %542 = vmatprep.subr.bf16.mxu0 %v3002_v63  ;;  %583 = vmatprep.subr.bf16.mxu1 %v3007_v34  ;;  %v367_v34 = vsel %vm366_vm0, %v365_v58, %v4112_v56  ;;  %v4113_v56 = vmov 0  }
  0x49   :  { %543 = vmatpush1.bf16.msra.mxu0 %v3014_v37  ;;  %584 = vmatpush1.bf16.msra.mxu1 %v3019_v1  ;;  %v368_v37 = vpack.c.b16 %v367_v34, %v367_v34 }
  0x4a   :  { %544 = vmatprep.subr.bf16.mxu0 %v3029_v60  ;;  %585 = vmatprep.subr.bf16.mxu1 %v3034_v59 }
  0x4d   :  { %545 = vmatpush1.bf16.msra.mxu0 %v3041_v62  ;;  %586 = vmatpush1.bf16.msra.mxu1 %v3046_v0 }
  0x4e   :  { %662 = vmatprep.subr.bf16.mxu0 %v2748_v2  ;;  %703 = vmatprep.subr.bf16.mxu1 %v2750_v3 }
  0x50   :  { %563 = vmatmul.mubr.bf16.vlgmr.msra.gmra.mxu0 %v368_v37  ;;  %604 = vmatmul.mubr.bf16.vlgmr.msra.gmra.mxu1 %v368_v37 }
  0x51   :  { %663 = vmatpush1.bf16.msra.mxu0 %v2753_v4  ;;  %704 = vmatpush1.bf16.msra.mxu1 %v2755_v5 }
  0x52   :  { %664 = vmatprep.subr.bf16.mxu0 %v2758_v6  ;;  %705 = vmatprep.subr.bf16.mxu1 %v2762_v7 }
  0x53   :  { %694 = vmatprep.mubr.bf16.mxu0 %v4113_v56  ;;  %735 = vmatprep.mubr.bf16.mxu1 %v4113_v56 }
  0x55   :  { %665 = vmatpush1.bf16.msra.mxu0 %v2764_v8  ;;  %706 = vmatpush1.bf16.msra.mxu1 %v2767_v9 }
  0x56   :  { %666 = vmatprep.subr.bf16.mxu0 %v2770_v10  ;;  %707 = vmatprep.subr.bf16.mxu1 %v2772_v11 }
  0x59   :  { %667 = vmatpush1.bf16.msra.mxu0 %v2774_v12  ;;  %708 = vmatpush1.bf16.msra.mxu1 %v2776_v13 }
  0x5a   :  { %668 = vmatprep.subr.bf16.mxu0 %v2780_v14  ;;  %709 = vmatprep.subr.bf16.mxu1 %v2784_v15 }
  0x5d   :  { %669 = vmatpush1.bf16.msra.mxu0 %v2786_v16  ;;  %710 = vmatpush1.bf16.msra.mxu1 %v2790_v17 }
  0x5e   :  { %670 = vmatprep.subr.bf16.mxu0 %v2792_v18  ;;  %711 = vmatprep.subr.bf16.mxu1 %v2796_v19 }
  0x61   :  { %671 = vmatpush1.bf16.msra.mxu0 %v2798_v20  ;;  %712 = vmatpush1.bf16.msra.mxu1 %v2800_v21 }
  0x62   :  { %672 = vmatprep.subr.bf16.mxu0 %v2804_v22  ;;  %713 = vmatprep.subr.bf16.mxu1 %v2808_v23 }
  0x65   :  { %673 = vmatpush1.bf16.msra.mxu0 %v2812_v24  ;;  %714 = vmatpush1.bf16.msra.mxu1 %v2814_v25  ;;  %v613_v24 = vlaneseq }
  0x66   :  { %674 = vmatprep.subr.bf16.mxu0 %v2818_v26  ;;  %715 = vmatprep.subr.bf16.mxu1 %v2820_v27 }
  0x69   :  { %675 = vmatpush1.bf16.msra.mxu0 %v2822_v28  ;;  %716 = vmatpush1.bf16.msra.mxu1 %v2824_v29 }
  0x6a   :  { %676 = vmatprep.subr.bf16.mxu0 %v2828_v30  ;;  %717 = vmatprep.subr.bf16.mxu1 %v2832_v31  ;;  %v614_v30 = vshrl.u32 %v613_v24, 7 }
  0x6c   :  { %v615_v23 = vsub.s32 0, %v614_v30  ;;  %v627_v17 = vsub.s32 3, %v614_v30 }
  0x6d   :  { %677 = vmatpush1.bf16.msra.mxu0 %v2834_v32  ;;  %718 = vmatpush1.bf16.msra.mxu1 %v2836_v33  ;;  %v45_v32 = vld [vmem:[%s3939_s3] sm:$0xf]  ;;  %v619_v33 = vsub.s32 1, %v614_v30 }
  0x6e   :  { %748 = vmatprep.subr.bf16.mxu0 %v2845_v35  ;;  %789 = vmatprep.subr.bf16.mxu1 %v2850_v36  ;;  %v3094_v31 = vrot.slane %v45_v32, %v615_v23 }
  0x6f   :  { %v3096_v21 = vrot.slane %v45_v32, %v619_v33  ;;  %v623_v33 = vsub.s32 2, %v614_v30 }
  0xf0   :  { %v309_v58 = vpop.f32.mrf.mxu0  ;;  %v350_v34 = vpop.f32.mrf.mxu1 }
  0xf2   :  { %v311_v37 = vpop.f32.mrf.mxu0  ;;  %v352_v27 = vpop.f32.mrf.mxu1 }
  0xf4   :  { %v313_v26 = vpop.f32.mrf.mxu0  ;;  %v354_v28 = vpop.f32.mrf.mxu1 }
  0xf6   :  { %v314_v25 = vpop.f32.mrf.mxu0  ;;  %v355_v29 = vpop.f32.mrf.mxu1 }
 0x110   :  { %v564_v35 = vpop.f32.mrf.mxu0  ;;  %v605_v36 = vpop.f32.mrf.mxu1 }
 0x111   :  { %v565_v22 = vadd.f32 %v564_v35, %v309_v58  ;;  %v3100_v35 = vrot.slane %v45_v32, %v627_v17  ;;  %v606_v13 = vadd.f32 %v605_v36, %v350_v34 }
 0x112   :  { %v566_v20 = vpop.f32.mrf.mxu0  ;;  %v607_v26 = vpop.f32.mrf.mxu1 }
 0x113   :  { %v633_v25 = vadd.f32 %v3094_v31, %v565_v22  ;;  %v567_v28 = vadd.f32 %v566_v20, %v311_v37  ;;  %v608_v14 = vadd.f32 %v607_v26, %v352_v27  ;;  %v3103_v22 = vrot.slane %v45_v32, %v623_v33  ;;  %v4115_v33 = vld [vmem:[#allocation40_spill] sm:$0xff] }
 0x114   :  { %v568_v29 = vpop.f32.mrf.mxu0  ;;  %v609_v24 = vpop.f32.mrf.mxu1 }
 0x115   :  { %v2276_v19 = vmul.f32 -1.442695, %v633_v25  ;;  %v634_v18 = vadd.f32 %v3096_v21, %v567_v28  ;;  %v636_v58 = vadd.f32 %v3100_v35, %v608_v14  ;;  %v635_v25 = vadd.f32 %v3103_v22, %v606_v13 }
 0x116   :  { %v569_v16 = vpop.f32.mrf.mxu0  ;;  %v610_v15 = vpop.f32.mrf.mxu1 }
 0x117   :  { %2463 = vpow2.f32 %v2276_v19  ;;  %v2277_v23 = vmul.f32 -1.442695, %v634_v18  ;;  %v2278_v20 = vmul.f32 -1.442695, %v636_v58  ;;  %v47_v18 = vld [vmem:[#allocation3] sm:$0x3] }
 0x118   :  { %v4116_v58 = vld [vmem:[#allocation41_spill] sm:$0xff] }
 0x119   :  { %2465 = vpow2.f32 %v2277_v23  ;;  %v4114_v23 = vld [vmem:[#allocation39_spill] sm:$0xff] }
 0x11a   :  { %2467 = vpow2.f32 %v2278_v20  ;;  %v4117_v20 = vunpack.c.l.b16 %v2994_v61  ;;  %v4122_v61 = vld [vmem:[#allocation15_spill] sm:$0xff] }
 0x124   :  { %v2464_v37 = vpop.eup %2463 }
 0x125   :  { %v640_v28 = vadd.f32 1.0, %v2464_v37  ;;  %v744_v37 = vrot.slane %v4117_v20, 1  ;;  %v4133_v20 = vld [vmem:[#allocation26_spill] sm:$0xff] }
 0x126   :  { %v2466_v29 = vpop.eup %2465 }
 0x127   :  { %2469 = vrcp.f32 %v640_v28  ;;  %v646_v15 = vadd.f32 1.0, %v2466_v29  ;;  %v2468_v16 = vpop.eup %2467  ;;  %v4119_v28 = vld [vmem:[#allocation43_spill] sm:$0xff]  ;;  %v4120_v29 = vld [vmem:[#allocation38_spill] sm:$0xff] }
 0x128   :  { %2471 = vtanh.f32 %v635_v25  ;;  %v653_v14 = vadd.f32 1.0, %v2468_v16  ;;  %v4118_v25 = vld [vmem:[#allocation42_spill] sm:$0xff] }
 0x129   :  { %2473 = vrcp.f32 %v646_v15  ;;  %v4121_v15 = vunpack.c.l.b16 %v4120_v29  ;;  %v4135_v29 = vld [vmem:[#allocation28_spill] sm:$0xff] }
 0x12a   :  { %2475 = vrcp.f32 %v653_v14  ;;  %v4126_v14 = vld [vmem:[#allocation19_spill] sm:$0xff] }
 0x12b   :  { %v745_v16 = vsel %vm366_vm0, %v4121_v15, %v744_v37  ;;  %v4134_v37 = vld [vmem:[#allocation27_spill] sm:$0xff]  ;;  %v4136_v15 = vld [vmem:[#allocation29_spill] sm:$0xff] }
 0x134   :  { %v2470_v17 = vpop.eup %2469 }
 0x135   :  { %v2472_v19 = vpop.eup %2471 }
 0x136   :  { %v2474_v27 = vpop.eup %2473  ;;  %v657_v30 = vmul.f32 %v2472_v19, %v2470_v17  ;;  %v746_v17 = vpack.c.b16 %v745_v16, %v745_v16  ;;  %v4124_v19 = vld [vmem:[#allocation17_spill] sm:$0xff]  ;;  %v4137_v16 = vld [vmem:[#allocation30_spill] sm:$0xff] }
 0x137   :  { %v656_v32 = vmul.f32 %v2474_v27, %v47_v18  ;;  %v2476_v13 = vpop.eup %2475  ;;  %v4123_v18 = vld [vmem:[#allocation16_spill] sm:$0xff]  ;;  %v4125_v27 = vld [vmem:[#allocation18_spill] sm:$0xff] }
 0x139   :  { %v3106_v36 = vadd.f32 %v657_v30, %v656_v32  ;;  %v4127_v30 = vld [vmem:[#allocation20_spill] sm:$0xff]  ;;  %v4128_v32 = vld [vmem:[#allocation21_spill] sm:$0xff] }
 0x13b   :  { %2477 = vtanh.f32 %v3106_v36 }
 0x148   :  { %v2478_v34 = vpop.eup %2477 }
 0x149   :  { %v660_v26 = vmul.f32 %v2478_v34, %v2476_v13  ;;  %v4129_v13 = vld [vmem:[#allocation22_spill] sm:$0xff]  ;;  %v4130_v34 = vld [vmem:[#allocation23_spill] sm:$0xff] }
 0x14b   :  { %v661_v24 = vpack.c.bf16 %v660_v26, %v660_v26  ;;  %v4131_v26 = vld [vmem:[#allocation24_spill] sm:$0xff] }
 0x14d   :  { %695 = vmatmul.mubr.bf16.vlgmr.msra.gmra.mxu0 %v661_v24  ;;  %736 = vmatmul.mubr.bf16.vlgmr.msra.gmra.mxu1 %v661_v24  ;;  %v4132_v24 = vld [vmem:[#allocation25_spill] sm:$0xff] }
 0x14e   :  { %749 = vmatpush1.bf16.msra.mxu0 %v2855_v38  ;;  %790 = vmatpush1.bf16.msra.mxu1 %v2860_v39 }
 0x14f   :  { %750 = vmatprep.subr.bf16.mxu0 %v2867_v40  ;;  %791 = vmatprep.subr.bf16.mxu1 %v2874_v41 }
 0x150   :  { %780 = vmatprep.mubr.bf16.mxu0 %v4113_v56  ;;  %821 = vmatprep.mubr.bf16.mxu1 %v4113_v56 }
 0x152   :  { %751 = vmatpush1.bf16.msra.mxu0 %v2879_v42  ;;  %792 = vmatpush1.bf16.msra.mxu1 %v2886_v43 }
 0x153   :  { %752 = vmatprep.subr.bf16.mxu0 %v2893_v44  ;;  %793 = vmatprep.subr.bf16.mxu1 %v2898_v45 }
 0x156   :  { %753 = vmatpush1.bf16.msra.mxu0 %v2905_v46  ;;  %794 = vmatpush1.bf16.msra.mxu1 %v2910_v47 }
 0x157   :  { %754 = vmatprep.subr.bf16.mxu0 %v2917_v48  ;;  %795 = vmatprep.subr.bf16.mxu1 %v2924_v49 }
 0x15a   :  { %755 = vmatpush1.bf16.msra.mxu0 %v2929_v50  ;;  %796 = vmatpush1.bf16.msra.mxu1 %v2936_v51 }
 0x15b   :  { %756 = vmatprep.subr.bf16.mxu0 %v2941_v52  ;;  %797 = vmatprep.subr.bf16.mxu1 %v2946_v53 }
 0x15e   :  { %757 = vmatpush1.bf16.msra.mxu0 %v2953_v54  ;;  %798 = vmatpush1.bf16.msra.mxu1 %v2958_v55 }
 0x15f   :  { %758 = vmatprep.subr.bf16.mxu0 %v2968_v57  ;;  %799 = vmatprep.subr.bf16.mxu1 %v4114_v23 }
 0x162   :  { %759 = vmatpush1.bf16.msra.mxu0 %v4115_v33  ;;  %800 = vmatpush1.bf16.msra.mxu1 %v4116_v58 }
 0x163   :  { %760 = vmatprep.subr.bf16.mxu0 %v3002_v63  ;;  %801 = vmatprep.subr.bf16.mxu1 %v4118_v25 }
 0x166   :  { %761 = vmatpush1.bf16.msra.mxu0 %v4119_v28  ;;  %802 = vmatpush1.bf16.msra.mxu1 %v3019_v1 }
 0x167   :  { %762 = vmatprep.subr.bf16.mxu0 %v3029_v60  ;;  %803 = vmatprep.subr.bf16.mxu1 %v3034_v59 }
 0x16a   :  { %763 = vmatpush1.bf16.msra.mxu0 %v3041_v62  ;;  %804 = vmatpush1.bf16.msra.mxu1 %v3046_v0 }
 0x16b   :  { %861 = vmatprep.subr.bf16.mxu0 %v2748_v2  ;;  %902 = vmatprep.subr.bf16.mxu1 %v2750_v3 }
 0x16d   :  { %781 = vmatmul.mubr.bf16.vlgmr.msra.gmra.mxu0 %v746_v17  ;;  %822 = vmatmul.mubr.bf16.vlgmr.msra.gmra.mxu1 %v746_v17  ;;  %v4138_v17 = vld [vmem:[#allocation31_spill] sm:$0xff] }
 0x16e   :  { %862 = vmatpush1.bf16.msra.mxu0 %v2753_v4  ;;  %903 = vmatpush1.bf16.msra.mxu1 %v2755_v5 }
 0x16f   :  { %863 = vmatprep.subr.bf16.mxu0 %v2758_v6  ;;  %904 = vmatprep.subr.bf16.mxu1 %v2762_v7 }
 0x170   :  { %893 = vmatprep.mubr.bf16.mxu0 %v4113_v56  ;;  %934 = vmatprep.mubr.bf16.mxu1 %v4113_v56 }
 0x172   :  { %864 = vmatpush1.bf16.msra.mxu0 %v2764_v8  ;;  %905 = vmatpush1.bf16.msra.mxu1 %v2767_v9 }
 0x173   :  { %865 = vmatprep.subr.bf16.mxu0 %v2770_v10  ;;  %906 = vmatprep.subr.bf16.mxu1 %v2772_v11 }
 0x176   :  { %866 = vmatpush1.bf16.msra.mxu0 %v2774_v12  ;;  %907 = vmatpush1.bf16.msra.mxu1 %v4122_v61 }
 0x177   :  { %867 = vmatprep.subr.bf16.mxu0 %v4123_v18  ;;  %908 = vmatprep.subr.bf16.mxu1 %v4124_v19 }
 0x17a   :  { %868 = vmatpush1.bf16.msra.mxu0 %v4125_v27  ;;  %909 = vmatpush1.bf16.msra.mxu1 %v4126_v14 }
 0x17b   :  { %869 = vmatprep.subr.bf16.mxu0 %v4127_v30  ;;  %910 = vmatprep.subr.bf16.mxu1 %v4128_v32  ;;  %v4139_v32 = vld [vmem:[#allocation32_spill] sm:$0xff] }
 0x17e   :  { %870 = vmatpush1.bf16.msra.mxu0 %v4129_v13  ;;  %911 = vmatpush1.bf16.msra.mxu1 %v4130_v34  ;;  %v4140_v13 = vld [vmem:[#allocation33_spill] sm:$0xff]  ;;  %v4141_v34 = vld [vmem:[#allocation34_spill] sm:$0xff] }
 0x17f   :  { %871 = vmatprep.subr.bf16.mxu0 %v4131_v26  ;;  %912 = vmatprep.subr.bf16.mxu1 %v4132_v24  ;;  %v4142_v26 = vld [vmem:[#allocation35_spill] sm:$0xff]  ;;  %v4143_v24 = vld [vmem:[#allocation36_spill] sm:$0xff] }
 0x182   :  { %872 = vmatpush1.bf16.msra.mxu0 %v4133_v20  ;;  %913 = vmatpush1.bf16.msra.mxu1 %v4134_v37  ;;  %v4144_v20 = vld [vmem:[#allocation37_spill] sm:$0xff] }
 0x183   :  { %873 = vmatprep.subr.bf16.mxu0 %v4135_v29  ;;  %914 = vmatprep.subr.bf16.mxu1 %v4136_v15 }
 0x186   :  { %874 = vmatpush1.bf16.msra.mxu0 %v4137_v16  ;;  %915 = vmatpush1.bf16.msra.mxu1 %v4138_v17 }
 0x187   :  { %875 = vmatprep.subr.bf16.mxu0 %v4139_v32  ;;  %916 = vmatprep.subr.bf16.mxu1 %v4140_v13 }
 0x18a   :  { %876 = vmatpush1.bf16.msra.mxu0 %v4141_v34  ;;  %917 = vmatpush1.bf16.msra.mxu1 %v4142_v26 }
 0x18b   :  { %956 = vmatprep.subr.bf16.mxu0 %v4143_v24  ;;  %997 = vmatprep.subr.bf16.mxu1 %v4144_v20 }
 0x20d   :  { %v696_v37 = vpop.f32.mrf.mxu0  ;;  %v737_v29 = vpop.f32.mrf.mxu1 }
 0x20f   :  { %v698_v30 = vpop.f32.mrf.mxu0  ;;  %v739_v15 = vpop.f32.mrf.mxu1 }
 0x211   :  { %v700_v14 = vpop.f32.mrf.mxu0  ;;  %v741_v16 = vpop.f32.mrf.mxu1 }
 0x213   :  { %v701_v27 = vpop.f32.mrf.mxu0  ;;  %v742_v17 = vpop.f32.mrf.mxu1 }
 0x22d   :  { %v782_v19 = vpop.f32.mrf.mxu0  ;;  %v823_v32 = vpop.f32.mrf.mxu1 }
 0x22e   :  { %v783_v18 = vadd.f32 %v782_v19, %v696_v37  ;;  %v824_v17 = vadd.f32 %v823_v32, %v737_v29 }
 0x22f   :  { %v784_v13 = vpop.f32.mrf.mxu0  ;;  %v825_v61 = vpop.f32.mrf.mxu1 }
 0x230   :  { %v830_v34 = vadd.f32 %v783_v18, %v3094_v31  ;;  %v785_v26 = vadd.f32 %v784_v13, %v698_v30  ;;  %v826_v27 = vadd.f32 %v825_v61, %v739_v15  ;;  %v832_v8 = vadd.f32 %v824_v17, %v3103_v22 }
 0x231   :  { %v786_v12 = vpop.f32.mrf.mxu0  ;;  %v827_v24 = vpop.f32.mrf.mxu1 }
 0x232   :  { %v2279_v11 = vmul.f32 -1.442695, %v830_v34  ;;  %v831_v20 = vadd.f32 %v785_v26, %v3096_v21  ;;  %v833_v16 = vadd.f32 %v826_v27, %v3100_v35 }
 0x233   :  { %v787_v10 = vpop.f32.mrf.mxu0  ;;  %v828_v9 = vpop.f32.mrf.mxu1 }
 0x234   :  { %2479 = vpow2.f32 %v2279_v11  ;;  %v2280_v14 = vmul.f32 -1.442695, %v831_v20  ;;  %v2281_v19 = vmul.f32 -1.442695, %v833_v16 }
 0x236   :  { %2481 = vpow2.f32 %v2280_v14 }
 0x237   :  { %2483 = vpow2.f32 %v2281_v19 }
 0x241   :  { %v2480_v37 = vpop.eup %2479 }
 0x242   :  { %v837_v18 = vadd.f32 1.0, %v2480_v37 }
 0x243   :  { %v2482_v30 = vpop.eup %2481 }
 0x244   :  { %2485 = vrcp.f32 %v837_v18  ;;  %v843_v12 = vadd.f32 1.0, %v2482_v30  ;;  %v2484_v10 = vpop.eup %2483  ;;  %v4145_v18 = vld [vmem:[#allocation10_spill] sm:$0xff]  ;;  %v4146_v30 = vld [vmem:[#allocation11_spill] sm:$0xff] }
 0x245   :  { %2487 = vtanh.f32 %v832_v8  ;;  %v850_v34 = vadd.f32 1.0, %v2484_v10  ;;  %v3209_v8 = vld [vmem:[%s3936_s0] ss:$0 sps:$4 sm:$0x22]   ;;  %v4154_v10 = vld [vmem:[#allocation19_spill] sm:$0xff] }
 0x246   :  { %2489 = vrcp.f32 %v843_v12  ;;  %v949_v14 = vunpack.c.l.b16 %v3209_v8  ;;  %v4149_v12 = vld [vmem:[#allocation14_spill] sm:$0xff] }
 0x247   :  { %2491 = vrcp.f32 %v850_v34  ;;  %v4158_v34 = vld [vmem:[#allocation23_spill] sm:$0xff] }
 0x248   :  { %v951_v16 = vrot.slane %v949_v14, 2  ;;  %v3403_v8 = vld [vmem:[#allocation4 + $0x28] ss:$16 sps:$4 sm:$0xff]  }
 0x251   :  { %v2486_v9 = vpop.eup %2485 }
 0x252   :  { %v2488_v11 = vpop.eup %2487 }
 0x253   :  { %v2490_v13 = vpop.eup %2489  ;;  %v854_v61 = vmul.f32 %v2488_v11, %v2486_v9  ;;  %v4155_v9 = vld [vmem:[#allocation20_spill] sm:$0xff]  ;;  %v4156_v11 = vld [vmem:[#allocation21_spill] sm:$0xff] }
 0x254   :  { %v853_v26 = vmul.f32 %v2490_v13, %v3106_v36  ;;  %v2492_v24 = vpop.eup %2491  ;;  %v3214_v36 = vld [vmem:[%s3936_s0 + $0x4] ss:$0 sps:$4 sm:$0x22]   ;;  %v4157_v13 = vld [vmem:[#allocation22_spill] sm:$0xff] }
 0x255   :  { %v950_v27 = vunpack.c.l.b16 %v3214_v36  ;;  %v3406_v36 = vld [vmem:[#allocation4 + $0x4] ss:$16 sps:$4 sm:$0xff]  }
 0x256   :  { %v3187_v32 = vadd.f32 %v854_v61, %v853_v26  ;;  %v4159_v61 = vld [vmem:[#allocation24_spill] sm:$0xff]  ;;  %v4160_v26 = vld [vmem:[#allocation25_spill] sm:$0xff] }
 0x257   :  { %v952_v17 = vrot.slane %v950_v27, 1  ;;  %4194 = vst [vmem:[#allocation25_spill] sm:$0xff] %v3403_v8 }
 0x258   :  { %2493 = vtanh.f32 %v3187_v32 }
 0x259   :  { %v953_v19 = vsel %vm366_vm0, %v952_v17, %v951_v16  ;;  %v4165_v16 = vld [vmem:[#allocation30_spill] sm:$0xff]  ;;  %v4166_v17 = vld [vmem:[#allocation31_spill] sm:$0xff] }
 0x25a   :  { %v954_v37 = vpack.c.b16 %v953_v19, %v953_v19  ;;  %v4167_v19 = vld [vmem:[#allocation32_spill] sm:$0xff] }
 0x265   :  { %v2494_v20 = vpop.eup %2493 }
 0x266   :  { %v857_v29 = vmul.f32 %v2494_v20, %v2492_v24  ;;  %v4161_v24 = vld [vmem:[#allocation26_spill] sm:$0xff]  ;;  %v4162_v20 = vld [vmem:[#allocation27_spill] sm:$0xff] }
 0x267   :  { %4195 = vst [vmem:[#allocation26_spill] sm:$0xff] %v3406_v36 }
 0x268   :  { %v860_v15 = vpack.c.bf16 %v857_v29, %v857_v29  ;;  %v4163_v29 = vld [vmem:[#allocation28_spill] sm:$0xff] }
 0x26a   :  { %894 = vmatmul.mubr.bf16.vlgmr.msra.gmra.mxu0 %v860_v15  ;;  %935 = vmatmul.mubr.bf16.vlgmr.msra.gmra.mxu1 %v860_v15  ;;  %v4164_v15 = vld [vmem:[#allocation29_spill] sm:$0xff] }
 0x26b   :  { %957 = vmatpush1.bf16.msra.mxu0 %v2855_v38  ;;  %998 = vmatpush1.bf16.msra.mxu1 %v2860_v39 }
 0x26c   :  { %958 = vmatprep.subr.bf16.mxu0 %v2867_v40  ;;  %999 = vmatprep.subr.bf16.mxu1 %v2874_v41 }
 0x26d   :  { %988 = vmatprep.mubr.bf16.mxu0 %v4113_v56  ;;  %1029 = vmatprep.mubr.bf16.mxu1 %v4113_v56 }
 0x26f   :  { %959 = vmatpush1.bf16.msra.mxu0 %v2879_v42  ;;  %1000 = vmatpush1.bf16.msra.mxu1 %v2886_v43 }
 0x270   :  { %960 = vmatprep.subr.bf16.mxu0 %v2893_v44  ;;  %1001 = vmatprep.subr.bf16.mxu1 %v2898_v45 }
 0x273   :  { %961 = vmatpush1.bf16.msra.mxu0 %v2905_v46  ;;  %1002 = vmatpush1.bf16.msra.mxu1 %v2910_v47 }
 0x274   :  { %962 = vmatprep.subr.bf16.mxu0 %v2917_v48  ;;  %1003 = vmatprep.subr.bf16.mxu1 %v2924_v49 }
 0x277   :  { %963 = vmatpush1.bf16.msra.mxu0 %v2929_v50  ;;  %1004 = vmatpush1.bf16.msra.mxu1 %v2936_v51 }
 0x278   :  { %964 = vmatprep.subr.bf16.mxu0 %v2941_v52  ;;  %1005 = vmatprep.subr.bf16.mxu1 %v2946_v53 }
 0x27b   :  { %965 = vmatpush1.bf16.msra.mxu0 %v2953_v54  ;;  %1006 = vmatpush1.bf16.msra.mxu1 %v2958_v55 }
 0x27c   :  { %966 = vmatprep.subr.bf16.mxu0 %v2968_v57  ;;  %1007 = vmatprep.subr.bf16.mxu1 %v4114_v23 }
 0x27f   :  { %967 = vmatpush1.bf16.msra.mxu0 %v4115_v33  ;;  %1008 = vmatpush1.bf16.msra.mxu1 %v4116_v58 }
 0x280   :  { %968 = vmatprep.subr.bf16.mxu0 %v3002_v63  ;;  %1009 = vmatprep.subr.bf16.mxu1 %v4118_v25 }
 0x283   :  { %969 = vmatpush1.bf16.msra.mxu0 %v4119_v28  ;;  %1010 = vmatpush1.bf16.msra.mxu1 %v3019_v1 }
 0x284   :  { %970 = vmatprep.subr.bf16.mxu0 %v3029_v60  ;;  %1011 = vmatprep.subr.bf16.mxu1 %v3034_v59 }
 0x287   :  { %971 = vmatpush1.bf16.msra.mxu0 %v3041_v62  ;;  %1012 = vmatpush1.bf16.msra.mxu1 %v3046_v0 }
 0x288   :  { %1067 = vmatprep.subr.bf16.mxu0 %v2748_v2  ;;  %1108 = vmatprep.subr.bf16.mxu1 %v2750_v3  ;;  %v4147_v2 = vld [vmem:[#allocation12_spill] sm:$0xff]  ;;  %v4148_v3 = vld [vmem:[#allocation13_spill] sm:$0xff] }
 0x28a   :  { %989 = vmatmul.mubr.bf16.vlgmr.msra.gmra.mxu0 %v954_v37  ;;  %1030 = vmatmul.mubr.bf16.vlgmr.msra.gmra.mxu1 %v954_v37  ;;  %v4168_v37 = vld [vmem:[#allocation33_spill] sm:$0xff] }
 0x28b   :  { %1068 = vmatpush1.bf16.msra.mxu0 %v2753_v4  ;;  %1109 = vmatpush1.bf16.msra.mxu1 %v2755_v5  ;;  %v4150_v4 = vld [vmem:[#allocation15_spill] sm:$0xff]  ;;  %v4151_v5 = vld [vmem:[#allocation16_spill] sm:$0xff] }
 0x28c   :  { %1069 = vmatprep.subr.bf16.mxu0 %v2758_v6  ;;  %1110 = vmatprep.subr.bf16.mxu1 %v2762_v7  ;;  %v4152_v6 = vld [vmem:[#allocation17_spill] sm:$0xff]  ;;  %v4153_v7 = vld [vmem:[#allocation18_spill] sm:$0xff] }
 0x28d   :  { %1099 = vmatprep.mubr.bf16.mxu0 %v4113_v56  ;;  %1140 = vmatprep.mubr.bf16.mxu1 %v4113_v56 }
 0x28f   :  { %1070 = vmatpush1.bf16.msra.mxu0 %v4145_v18  ;;  %1111 = vmatpush1.bf16.msra.mxu1 %v4146_v30  ;;  %v4169_v18 = vld [vmem:[#allocation34_spill] sm:$0xff]  ;;  %v4170_v30 = vld [vmem:[#allocation35_spill] sm:$0xff] }
 0x290   :  { %1071 = vmatprep.subr.bf16.mxu0 %v4147_v2  ;;  %1112 = vmatprep.subr.bf16.mxu1 %v4148_v3  ;;  %v4171_v2 = vld [vmem:[#allocation36_spill] sm:$0xff]  ;;  %v4172_v3 = vld [vmem:[#allocation37_spill] sm:$0xff] }
 0x293   :  { %1072 = vmatpush1.bf16.msra.mxu0 %v4149_v12  ;;  %1113 = vmatpush1.bf16.msra.mxu1 %v4150_v4 }
 0x294   :  { %1073 = vmatprep.subr.bf16.mxu0 %v4151_v5  ;;  %1114 = vmatprep.subr.bf16.mxu1 %v4152_v6 }
 0x297   :  { %1074 = vmatpush1.bf16.msra.mxu0 %v4153_v7  ;;  %1115 = vmatpush1.bf16.msra.mxu1 %v4154_v10 }
 0x298   :  { %1075 = vmatprep.subr.bf16.mxu0 %v4155_v9  ;;  %1116 = vmatprep.subr.bf16.mxu1 %v4156_v11 }
 0x29b   :  { %1076 = vmatpush1.bf16.msra.mxu0 %v4157_v13  ;;  %1117 = vmatpush1.bf16.msra.mxu1 %v4158_v34 }
 0x29c   :  { %1077 = vmatprep.subr.bf16.mxu0 %v4159_v61  ;;  %1118 = vmatprep.subr.bf16.mxu1 %v4160_v26 }
 0x29f   :  { %1078 = vmatpush1.bf16.msra.mxu0 %v4161_v24  ;;  %1119 = vmatpush1.bf16.msra.mxu1 %v4162_v20 }
 0x2a0   :  { %1079 = vmatprep.subr.bf16.mxu0 %v4163_v29  ;;  %1120 = vmatprep.subr.bf16.mxu1 %v4164_v15 }
 0x2a3   :  { %1080 = vmatpush1.bf16.msra.mxu0 %v4165_v16  ;;  %1121 = vmatpush1.bf16.msra.mxu1 %v4166_v17 }
 0x2a4   :  { %1081 = vmatprep.subr.bf16.mxu0 %v4167_v19  ;;  %1122 = vmatprep.subr.bf16.mxu1 %v4168_v37 }
 0x2a7   :  { %1082 = vmatpush1.bf16.msra.mxu0 %v4169_v18  ;;  %1123 = vmatpush1.bf16.msra.mxu1 %v4170_v30 }
 0x2a8   :  { %1154 = vmatprep.subr.bf16.mxu0 %v4171_v2  ;;  %1195 = vmatprep.subr.bf16.mxu1 %v4172_v3 }
 0x32a   :  { %v895_v12 = vpop.f32.mrf.mxu0  ;;  %v936_v4 = vpop.f32.mrf.mxu1 }
 0x32c   :  { %v897_v5 = vpop.f32.mrf.mxu0  ;;  %v938_v6 = vpop.f32.mrf.mxu1 }
 0x32e   :  { %v899_v7 = vpop.f32.mrf.mxu0  ;;  %v940_v10 = vpop.f32.mrf.mxu1 }
 0x330   :  { %v900_v9 = vpop.f32.mrf.mxu0  ;;  %v941_v11 = vpop.f32.mrf.mxu1 }
 0x34a   :  { %v990_v13 = vpop.f32.mrf.mxu0  ;;  %v1031_v34 = vpop.f32.mrf.mxu1 }
 0x34b   :  { %v991_v61 = vadd.f32 %v990_v13, %v895_v12  ;;  %v1032_v7 = vadd.f32 %v1031_v34, %v936_v4 }
 0x34c   :  { %v992_v26 = vpop.f32.mrf.mxu0  ;;  %v1033_v24 = vpop.f32.mrf.mxu1 }
 0x34d   :  { %v1038_v20 = vadd.f32 %v991_v61, %v3094_v31  ;;  %v993_v29 = vadd.f32 %v992_v26, %v897_v5  ;;  %v1034_v2 = vadd.f32 %v1033_v24, %v938_v6  ;;  %v1040_v9 = vadd.f32 %v1032_v7, %v3103_v22 }
 0x34e   :  { %v994_v15 = vpop.f32.mrf.mxu0  ;;  %v1035_v16 = vpop.f32.mrf.mxu1 }
 0x34f   :  { %v2284_v17 = vmul.f32 -1.442695, %v1038_v20  ;;  %v1039_v19 = vadd.f32 %v993_v29, %v3096_v21  ;;  %v1041_v3 = vadd.f32 %v1034_v2, %v3100_v35 }
 0x350   :  { %v995_v37 = vpop.f32.mrf.mxu0  ;;  %v1036_v18 = vpop.f32.mrf.mxu1 }
 0x351   :  { %2495 = vpow2.f32 %v2284_v17  ;;  %v2285_v30 = vmul.f32 -1.442695, %v1039_v19  ;;  %v2286_v12 = vmul.f32 -1.442695, %v1041_v3  ;;  %v3415_v37 = vld [vmem:[#allocation4 + $0x8] ss:$16 sps:$4 sm:$0xff]  }
 0x352   :  { %4198 = vst [vmem:[#allocation29_spill] sm:$0xff] %v3415_v37  ;;  %v3421_v18 = vld [vmem:[%s3937_s1 + $0xe4] ss:$16 sps:$4 sm:$0xff]  }
 0x353   :  { %2497 = vpow2.f32 %v2285_v30  ;;  %4199 = vst [vmem:[#allocation30_spill] sm:$0xff] %v3421_v18  ;;  %v3427_v30 = vld [vmem:[%s3937_s1 + $0xec] ss:$16 sps:$4 sm:$0xff]  }
 0x354   :  { %2499 = vpow2.f32 %v2286_v12  ;;  %4200 = vst [vmem:[#allocation31_spill] sm:$0xff] %v3427_v30 }
 0x35e   :  { %v2496_v10 = vpop.eup %2495 }
 0x35f   :  { %v1045_v11 = vadd.f32 1.0, %v2496_v10 }
 0x360   :  { %v2498_v5 = vpop.eup %2497 }
 0x361   :  { %2501 = vrcp.f32 %v1045_v11  ;;  %v1051_v13 = vadd.f32 1.0, %v2498_v5  ;;  %v2500_v61 = vpop.eup %2499 }
 0x362   :  { %2503 = vtanh.f32 %v1040_v9  ;;  %v1058_v15 = vadd.f32 1.0, %v2500_v61 }
 0x363   :  { %2505 = vrcp.f32 %v1051_v13 }
 0x364   :  { %2507 = vrcp.f32 %v1058_v15 }
 0x36e   :  { %v2502_v26 = vpop.eup %2501 }
 0x36f   :  { %v2504_v20 = vpop.eup %2503 }
 0x370   :  { %v2506_v29 = vpop.eup %2505  ;;  %v1062_v6 = vmul.f32 %v2504_v20, %v2502_v26 }
 0x371   :  { %v1061_v24 = vmul.f32 %v2506_v29, %v3187_v32  ;;  %v2508_v34 = vpop.eup %2507  ;;  %v3400_v32 = vld [vmem:[#allocation4 + $0x20] ss:$16 sps:$4 sm:$0xff]  }
 0x372   :  { %4193 = vst [vmem:[#allocation24_spill] sm:$0xff] %v3400_v32 }
 0x373   :  { %v3280_v4 = vadd.f32 %v1062_v6, %v1061_v24 }
 0x375   :  { %2509 = vtanh.f32 %v3280_v4 }
 0x382   :  { %v2510_v16 = vpop.eup %2509 }
 0x383   :  { %v1065_v17 = vmul.f32 %v2510_v16, %v2508_v34 }
 0x385   :  { %v1066_v19 = vpack.c.bf16 %v1065_v17, %v1065_v17 }
 0x387   :  { %1100 = vmatmul.mubr.bf16.vlgmr.msra.gmra.mxu0 %v1066_v19  ;;  %1141 = vmatmul.mubr.bf16.vlgmr.msra.gmra.mxu1 %v1066_v19 }
 0x388   :  { %1155 = vmatpush1.bf16.msra.mxu0 %v2855_v38  ;;  %1196 = vmatpush1.bf16.msra.mxu1 %v2860_v39  ;;  %v1149_v38 = vrot.slane %v949_v14, 3  ;;  %v1150_v39 = vrot.slane %v950_v27, 2  ;;  %v3409_v14 = vld [vmem:[#allocation4 + $0xc] ss:$16 sps:$4 sm:$0xff]   ;;  %v3412_v27 = vld [vmem:[#allocation4] ss:$16 sps:$4 sm:$0xff]  }
 0x389   :  { %1156 = vmatprep.subr.bf16.mxu0 %v2867_v40  ;;  %1197 = vmatprep.subr.bf16.mxu1 %v2874_v41  ;;  %4196 = vst [vmem:[#allocation27_spill] sm:$0xff] %v3409_v14  ;;  %4197 = vst [vmem:[#allocation28_spill] sm:$0xff] %v3412_v27 }
 0x38a   :  { %1186 = vmatprep.mubr.bf16.mxu0 %v4113_v56  ;;  %1227 = vmatprep.mubr.bf16.mxu1 %v4113_v56  ;;  %v1151_v40 = vsel %vm366_vm0, %v1150_v39, %v1149_v38 }
 0x38b   :  { %v1152_v41 = vpack.c.b16 %v1151_v40, %v1151_v40 }
 0x38c   :  { %1157 = vmatpush1.bf16.msra.mxu0 %v2879_v42  ;;  %1198 = vmatpush1.bf16.msra.mxu1 %v2886_v43  ;;  %v3320_v42 = vld [vmem:[#allocation4 + $0xe4] ss:$16 sps:$4 sm:$0xff]   ;;  %v3323_v43 = vld [vmem:[#allocation4 + $0xec] ss:$16 sps:$4 sm:$0xff]  }
 0x38d   :  { %1158 = vmatprep.subr.bf16.mxu0 %v2893_v44  ;;  %1199 = vmatprep.subr.bf16.mxu1 %v2898_v45  ;;  %v3329_v44 = vld [vmem:[#allocation4 + $0xe8] ss:$16 sps:$4 sm:$0xff]   ;;  %v3332_v45 = vld [vmem:[#allocation4 + $0xc4] ss:$16 sps:$4 sm:$0xff]  }
 0x390   :  { %1159 = vmatpush1.bf16.msra.mxu0 %v2905_v46  ;;  %1200 = vmatpush1.bf16.msra.mxu1 %v2910_v47  ;;  %v3340_v46 = vld [vmem:[#allocation4 + $0xc0] ss:$16 sps:$4 sm:$0xff]   ;;  %v3343_v47 = vld [vmem:[#allocation4 + $0xc8] ss:$16 sps:$4 sm:$0xff]  }
 0x391   :  { %1160 = vmatprep.subr.bf16.mxu0 %v2917_v48  ;;  %1201 = vmatprep.subr.bf16.mxu1 %v2924_v49  ;;  %4173 = vst [vmem:[#allocation39_spill] sm:$0xff] %v3340_v46  ;;  %4174 = vst [vmem:[#allocation40_spill] sm:$0xff] %v3343_v47  ;;  %v3346_v48 = vld [vmem:[#allocation4 + $0xa4] ss:$16 sps:$4 sm:$0xff]   ;;  %v3349_v49 = vld [vmem:[#allocation4 + $0xac] ss:$16 sps:$4 sm:$0xff]  }
 0x392   :  { %4175 = vst [vmem:[#allocation41_spill] sm:$0xff] %v3346_v48  ;;  %4176 = vst [vmem:[#allocation42_spill] sm:$0xff] %v3349_v49 }
 0x394   :  { %1161 = vmatpush1.bf16.msra.mxu0 %v2929_v50  ;;  %1202 = vmatpush1.bf16.msra.mxu1 %v2936_v51  ;;  %v3352_v50 = vld [vmem:[#allocation4 + $0xa0] ss:$16 sps:$4 sm:$0xff]   ;;  %v3355_v51 = vld [vmem:[#allocation4 + $0xa8] ss:$16 sps:$4 sm:$0xff]  }
 0x395   :  { %1162 = vmatprep.subr.bf16.mxu0 %v2941_v52  ;;  %1203 = vmatprep.subr.bf16.mxu1 %v2946_v53  ;;  %4177 = vst [vmem:[#allocation43_spill] sm:$0xff] %v3352_v50  ;;  %4178 = vst [vmem:[#allocation38_spill] sm:$0xff] %v3355_v51  ;;  %v3358_v52 = vld [vmem:[#allocation4 + $0x84] ss:$16 sps:$4 sm:$0xff]   ;;  %v3361_v53 = vld [vmem:[#allocation4 + $0x8c] ss:$16 sps:$4 sm:$0xff]  }
 0x396   :  { %4179 = vst [vmem:[#allocation10_spill] sm:$0xff] %v3358_v52  ;;  %4180 = vst [vmem:[#allocation11_spill] sm:$0xff] %v3361_v53 }
 0x398   :  { %1163 = vmatpush1.bf16.msra.mxu0 %v2953_v54  ;;  %1204 = vmatpush1.bf16.msra.mxu1 %v2958_v55  ;;  %v3364_v54 = vld [vmem:[#allocation4 + $0x80] ss:$16 sps:$4 sm:$0xff]   ;;  %v3367_v55 = vld [vmem:[#allocation4 + $0x88] ss:$16 sps:$4 sm:$0xff]  }
 0x399   :  { %1164 = vmatprep.subr.bf16.mxu0 %v2968_v57  ;;  %1205 = vmatprep.subr.bf16.mxu1 %v4114_v23  ;;  %4181 = vst [vmem:[#allocation12_spill] sm:$0xff] %v3364_v54  ;;  %4182 = vst [vmem:[#allocation13_spill] sm:$0xff] %v3367_v55  ;;  %v3370_v57 = vld [vmem:[#allocation4 + $0x64] ss:$16 sps:$4 sm:$0xff]   ;;  %v3385_v23 = vld [vmem:[#allocation4 + $0x4c] ss:$16 sps:$4 sm:$0xff]  }
 0x39a   :  { %4183 = vst [vmem:[#allocation14_spill] sm:$0xff] %v3370_v57  ;;  %4188 = vst [vmem:[#allocation19_spill] sm:$0xff] %v3385_v23 }
 0x39c   :  { %1165 = vmatpush1.bf16.msra.mxu0 %v4115_v33  ;;  %1206 = vmatpush1.bf16.msra.mxu1 %v4116_v58  ;;  %v3388_v33 = vld [vmem:[#allocation4 + $0x40] ss:$16 sps:$4 sm:$0xff]   ;;  %v3391_v58 = vld [vmem:[#allocation4 + $0x48] ss:$16 sps:$4 sm:$0xff]  }
 0x39d   :  { %1166 = vmatprep.subr.bf16.mxu0 %v3002_v63  ;;  %1207 = vmatprep.subr.bf16.mxu1 %v4118_v25  ;;  %v3382_v63 = vld [vmem:[#allocation4 + $0x44] ss:$16 sps:$4 sm:$0xff]   ;;  %4189 = vst [vmem:[#allocation20_spill] sm:$0xff] %v3388_v33  ;;  %4190 = vst [vmem:[#allocation21_spill] sm:$0xff] %v3391_v58 }
 0x39e   :  { %4187 = vst [vmem:[#allocation18_spill] sm:$0xff] %v3382_v63  ;;  %v3394_v25 = vld [vmem:[#allocation4 + $0x24] ss:$16 sps:$4 sm:$0xff]  }
 0x39f   :  { %4191 = vst [vmem:[#allocation22_spill] sm:$0xff] %v3394_v25 }
 0x3a0   :  { %1167 = vmatpush1.bf16.msra.mxu0 %v4119_v28  ;;  %1208 = vmatpush1.bf16.msra.mxu1 %v3019_v1  ;;  %v3326_v1 = vld [vmem:[#allocation4 + $0xe0] ss:$16 sps:$4 sm:$0xff]   ;;  %v3397_v28 = vld [vmem:[#allocation4 + $0x2c] ss:$16 sps:$4 sm:$0xff]  }
 0x3a1   :  { %1168 = vmatprep.subr.bf16.mxu0 %v3029_v60  ;;  %1209 = vmatprep.subr.bf16.mxu1 %v3034_v59  ;;  %v3373_v59 = vld [vmem:[#allocation4 + $0x6c] ss:$16 sps:$4 sm:$0xff]   ;;  %v3376_v60 = vld [vmem:[#allocation4 + $0x60] ss:$16 sps:$4 sm:$0xff]   ;;  %4192 = vst [vmem:[#allocation23_spill] sm:$0xff] %v3397_v28 }
 0x3a2   :  { %4184 = vst [vmem:[#allocation15_spill] sm:$0xff] %v3373_v59  ;;  %4185 = vst [vmem:[#allocation16_spill] sm:$0xff] %v3376_v60 }
 0x3a4   :  { %1169 = vmatpush1.bf16.msra.mxu0 %v3041_v62  ;;  %1210 = vmatpush1.bf16.msra.mxu1 %v3046_v0  ;;  %v3335_v0 = vld [vmem:[#allocation4 + $0xcc] ss:$16 sps:$4 sm:$0xff]   ;;  %v3379_v62 = vld [vmem:[#allocation4 + $0x68] ss:$16 sps:$4 sm:$0xff]  }
 0x3a5   :  { %1267 = vmatprep.subr.bf16.mxu0 %v3320_v42  ;;  %1308 = vmatprep.subr.bf16.mxu1 %v3323_v43  ;;  %4186 = vst [vmem:[#allocation17_spill] sm:$0xff] %v3379_v62 }
 0x3a7   :  { %1187 = vmatmul.mubr.bf16.vlgmr.msra.gmra.mxu0 %v1152_v41  ;;  %1228 = vmatmul.mubr.bf16.vlgmr.msra.gmra.mxu1 %v1152_v41 }
 0x3a8   :  { %1268 = vmatpush1.bf16.msra.mxu0 %v3326_v1  ;;  %1309 = vmatpush1.bf16.msra.mxu1 %v3329_v44 }
 0x3a9   :  { %1269 = vmatprep.subr.bf16.mxu0 %v3332_v45  ;;  %1310 = vmatprep.subr.bf16.mxu1 %v3335_v0 }
 0x3aa   :  { %1299 = vmatprep.mubr.bf16.mxu0 %v4113_v56  ;;  %1340 = vmatprep.mubr.bf16.mxu1 %v4113_v56 }
 0x3ac   :  { %1270 = vmatpush1.bf16.msra.mxu0 %v3340_v46  ;;  %1311 = vmatpush1.bf16.msra.mxu1 %v3343_v47 }
 0x3ad   :  { %1271 = vmatprep.subr.bf16.mxu0 %v3346_v48  ;;  %1312 = vmatprep.subr.bf16.mxu1 %v3349_v49 }
 0x3b0   :  { %1272 = vmatpush1.bf16.msra.mxu0 %v3352_v50  ;;  %1313 = vmatpush1.bf16.msra.mxu1 %v3355_v51 }
 0x3b1   :  { %1273 = vmatprep.subr.bf16.mxu0 %v3358_v52  ;;  %1314 = vmatprep.subr.bf16.mxu1 %v3361_v53 }
 0x3b4   :  { %1274 = vmatpush1.bf16.msra.mxu0 %v3364_v54  ;;  %1315 = vmatpush1.bf16.msra.mxu1 %v3367_v55 }
 0x3b5   :  { %1275 = vmatprep.subr.bf16.mxu0 %v3370_v57  ;;  %1316 = vmatprep.subr.bf16.mxu1 %v3373_v59 }
 0x3b8   :  { %1276 = vmatpush1.bf16.msra.mxu0 %v3376_v60  ;;  %1317 = vmatpush1.bf16.msra.mxu1 %v3379_v62 }
 0x3b9   :  { %1277 = vmatprep.subr.bf16.mxu0 %v3382_v63  ;;  %1318 = vmatprep.subr.bf16.mxu1 %v3385_v23 }
 0x3bc   :  { %1278 = vmatpush1.bf16.msra.mxu0 %v3388_v33  ;;  %1319 = vmatpush1.bf16.msra.mxu1 %v3391_v58 }
 0x3bd   :  { %1279 = vmatprep.subr.bf16.mxu0 %v3394_v25  ;;  %1320 = vmatprep.subr.bf16.mxu1 %v3397_v28 }
 0x3c0   :  { %1280 = vmatpush1.bf16.msra.mxu0 %v3400_v32  ;;  %1321 = vmatpush1.bf16.msra.mxu1 %v3403_v8 }
 0x3c1   :  { %1281 = vmatprep.subr.bf16.mxu0 %v3406_v36  ;;  %1322 = vmatprep.subr.bf16.mxu1 %v3409_v14 }
 0x3c4   :  { %1282 = vmatpush1.bf16.msra.mxu0 %v3412_v27  ;;  %1323 = vmatpush1.bf16.msra.mxu1 %v3415_v37 }
 0x3c5   :  { %1362 = vmatprep.subr.bf16.mxu0 %v3421_v18  ;;  %1403 = vmatprep.subr.bf16.mxu1 %v3427_v30 }
 0x447   :  { %v1101_v2 = vpop.f32.mrf.mxu0  ;;  %v1142_v3 = vpop.f32.mrf.mxu1 }
 0x449   :  { %v1103_v7 = vpop.f32.mrf.mxu0  ;;  %v1144_v12 = vpop.f32.mrf.mxu1 }
 0x44b   :  { %v1105_v10 = vpop.f32.mrf.mxu0  ;;  %v1146_v9 = vpop.f32.mrf.mxu1 }
 0x44d   :  { %v1106_v11 = vpop.f32.mrf.mxu0  ;;  %v1147_v5 = vpop.f32.mrf.mxu1 }
 0x467   :  { %v1188_v13 = vpop.f32.mrf.mxu0  ;;  %v1229_v61 = vpop.f32.mrf.mxu1 }
 0x468   :  { %v1189_v26 = vadd.f32 %v1188_v13, %v1101_v2  ;;  %v1230_v10 = vadd.f32 %v1229_v61, %v1142_v3 }
 0x469   :  { %v1190_v20 = vpop.f32.mrf.mxu0  ;;  %v1231_v29 = vpop.f32.mrf.mxu1 }
 0x46a   :  { %v1236_v15 = vadd.f32 %v1189_v26, %v3094_v31  ;;  %v1191_v6 = vadd.f32 %v1190_v20, %v1103_v7  ;;  %v1232_v40 = vadd.f32 %v1231_v29, %v1144_v12  ;;  %v1238_v11 = vadd.f32 %v1230_v10, %v3103_v22  ;;  %v3479_v10 = vld [vmem:[%s3937_s1 + $0xa4] ss:$16 sps:$4 sm:$0xff]  }
 0x46b   :  { %v1192_v24 = vpop.f32.mrf.mxu0  ;;  %v1233_v34 = vpop.f32.mrf.mxu1 }
 0x46c   :  { %v2287_v16 = vmul.f32 -1.442695, %v1236_v15  ;;  %v1237_v17 = vadd.f32 %v1191_v6, %v3096_v21  ;;  %v1239_v41 = vadd.f32 %v1232_v40, %v3100_v35  ;;  %v3467_v40 = vld [vmem:[%s3937_s1 + $0xc0] ss:$16 sps:$4 sm:$0xff]  }
 0x46d   :  { %v1193_v19 = vpop.f32.mrf.mxu0  ;;  %v1234_v38 = vpop.f32.mrf.mxu1 }
 0x46e   :  { %2511 = vpow2.f32 %v2287_v16  ;;  %v2288_v39 = vmul.f32 -1.442695, %v1237_v17  ;;  %v2289_v2 = vmul.f32 -1.442695, %v1239_v41  ;;  %v3441_v19 = vld [vmem:[%s3937_s1 + $0xe0] ss:$16 sps:$4 sm:$0xff]  }
 0x46f   :  { %v3453_v38 = vld [vmem:[%s3937_s1 + $0xc4] ss:$16 sps:$4 sm:$0xff]   ;;  %v3473_v41 = vld [vmem:[%s3937_s1 + $0xc8] ss:$16 sps:$4 sm:$0xff]  }
 0x470   :  { %2513 = vpow2.f32 %v2288_v39  ;;  %v3459_v39 = vld [vmem:[%s3937_s1 + $0xcc] ss:$16 sps:$4 sm:$0xff]  }
 0x471   :  { %2515 = vpow2.f32 %v2289_v2  ;;  %v3485_v2 = vld [vmem:[%s3937_s1 + $0xac] ss:$16 sps:$4 sm:$0xff]  }
 0x47b   :  { %v2512_v9 = vpop.eup %2511 }
 0x47c   :  { %v1243_v5 = vadd.f32 1.0, %v2512_v9  ;;  %v3491_v9 = vld [vmem:[%s3937_s1 + $0xa0] ss:$16 sps:$4 sm:$0xff]  }
 0x47d   :  { %v2514_v7 = vpop.eup %2513 }
 0x47e   :  { %2517 = vrcp.f32 %v1243_v5  ;;  %v1249_v13 = vadd.f32 1.0, %v2514_v7  ;;  %v2516_v26 = vpop.eup %2515  ;;  %v3503_v5 = vld [vmem:[%s3937_s1 + $0x84] ss:$16 sps:$4 sm:$0xff]   ;;  %v3509_v7 = vld [vmem:[%s3937_s1 + $0x8c] ss:$16 sps:$4 sm:$0xff]  }
 0x47f   :  { %2519 = vtanh.f32 %v1238_v11  ;;  %v1256_v24 = vadd.f32 1.0, %v2516_v26  ;;  %v3497_v11 = vld [vmem:[%s3937_s1 + $0xa8] ss:$16 sps:$4 sm:$0xff]  }
 0x480   :  { %2521 = vrcp.f32 %v1249_v13  ;;  %v3515_v13 = vld [vmem:[%s3937_s1 + $0x80] ss:$16 sps:$4 sm:$0xff]   ;;  %v3521_v26 = vld [vmem:[%s3937_s1 + $0x88] ss:$16 sps:$4 sm:$0xff]  }
 0x481   :  { %2523 = vrcp.f32 %v1256_v24  ;;  %v3543_v24 = vld [vmem:[%s3937_s1 + $0x6c] ss:$16 sps:$4 sm:$0xff]  }
 0x482   :  { %4202 = vst [vmem:[#allocation33_spill] sm:$0xff] %v3543_v24 }
 0x48b   :  { %v2518_v20 = vpop.eup %2517 }
 0x48c   :  { %v2520_v15 = vpop.eup %2519 }
 0x48d   :  { %v2522_v6 = vpop.eup %2521  ;;  %v1260_v12 = vmul.f32 %v2520_v15, %v2518_v20  ;;  %v3527_v20 = vld [vmem:[%s3936_s0] ss:$0 sps:$4 sm:$0x44]   ;;  %v3532_v15 = vld [vmem:[%s3936_s0 + $0x4] ss:$0 sps:$4 sm:$0x44]  }
 0x48e   :  { %v1259_v29 = vmul.f32 %v2522_v6, %v3280_v4  ;;  %v2524_v61 = vpop.eup %2523  ;;  %v3447_v4 = vld [vmem:[%s3937_s1 + $0xe8] ss:$16 sps:$4 sm:$0xff]   ;;  %4201 = vst [vmem:[#allocation32_spill] sm:$0xff] %v3532_v15  ;;  %v3537_v6 = vld [vmem:[%s3937_s1 + $0x64] ss:$16 sps:$4 sm:$0xff]  }
 0x490   :  { %v3435_v3 = vadd.f32 %v1260_v12, %v1259_v29  ;;  %v3549_v12 = vld [vmem:[%s3937_s1 + $0x60] ss:$16 sps:$4 sm:$0xff]   ;;  %v3555_v29 = vld [vmem:[%s3937_s1 + $0x68] ss:$16 sps:$4 sm:$0xff]  }
 0x491   :  { %4203 = vst [vmem:[#allocation34_spill] sm:$0xff] %v3549_v12  ;;  %4204 = vst [vmem:[#allocation35_spill] sm:$0xff] %v3555_v29 }
 0x492   :  { %2525 = vtanh.f32 %v3435_v3 }
 0x49f   :  { %v2526_v34 = vpop.eup %2525 }
 0x4a0   :  { %v1263_v16 = vmul.f32 %v2526_v34, %v2524_v61  ;;  %v3575_v61 = vld [vmem:[%s3937_s1 + $0x40] ss:$16 sps:$4 sm:$0xff]   ;;  %v3581_v34 = vld [vmem:[%s3937_s1 + $0x48] ss:$16 sps:$4 sm:$0xff]  }
 0x4a1   :  { %4207 = vst [vmem:[#allocation44_spill] sm:$0xff] %v3575_v61 }
 0x4a2   :  { %v1266_v17 = vpack.c.bf16 %v1263_v16, %v1263_v16  ;;  %v3563_v16 = vld [vmem:[%s3937_s1 + $0x44] ss:$16 sps:$4 sm:$0xff]  }
 0x4a3   :  { %4205 = vst [vmem:[#allocation36_spill] sm:$0xff] %v3563_v16 }
 0x4a4   :  { %1300 = vmatmul.mubr.bf16.vlgmr.msra.gmra.mxu0 %v1266_v17  ;;  %1341 = vmatmul.mubr.bf16.vlgmr.msra.gmra.mxu1 %v1266_v17  ;;  %v3569_v17 = vld [vmem:[%s3937_s1 + $0x4c] ss:$16 sps:$4 sm:$0xff]  }
 0x4a5   :  { %1363 = vmatpush1.bf16.msra.mxu0 %v3441_v19  ;;  %1404 = vmatpush1.bf16.msra.mxu1 %v3447_v4  ;;  %4206 = vst [vmem:[#allocation37_spill] sm:$0xff] %v3569_v17 }
 0x4a6   :  { %1364 = vmatprep.subr.bf16.mxu0 %v3453_v38  ;;  %1405 = vmatprep.subr.bf16.mxu1 %v3459_v39 }
 0x4a7   :  { %1394 = vmatprep.mubr.bf16.mxu0 %v4113_v56  ;;  %1435 = vmatprep.mubr.bf16.mxu1 %v4113_v56 }
 0x4a9   :  { %1365 = vmatpush1.bf16.msra.mxu0 %v3467_v40  ;;  %1406 = vmatpush1.bf16.msra.mxu1 %v3473_v41 }
 0x4aa   :  { %1366 = vmatprep.subr.bf16.mxu0 %v3479_v10  ;;  %1407 = vmatprep.subr.bf16.mxu1 %v3485_v2 }
 0x4ad   :  { %1367 = vmatpush1.bf16.msra.mxu0 %v3491_v9  ;;  %1408 = vmatpush1.bf16.msra.mxu1 %v3497_v11 }
 0x4ae   :  { %1368 = vmatprep.subr.bf16.mxu0 %v3503_v5  ;;  %1409 = vmatprep.subr.bf16.mxu1 %v3509_v7 }
 0x4b1   :  { %1369 = vmatpush1.bf16.msra.mxu0 %v3515_v13  ;;  %1410 = vmatpush1.bf16.msra.mxu1 %v3521_v26 }
 0x4b2   :  { %1370 = vmatprep.subr.bf16.mxu0 %v3537_v6  ;;  %1411 = vmatprep.subr.bf16.mxu1 %v3543_v24  ;;  %v3591_v24 = vld [vmem:[%s3937_s1 + $0x24] ss:$16 sps:$4 sm:$0xff]  }
 0x4b3   :  { %4210 = vst [vmem:[#allocation45_spill] sm:$0xff] %v3591_v24 }
 0x4b5   :  { %1371 = vmatpush1.bf16.msra.mxu0 %v3549_v12  ;;  %1412 = vmatpush1.bf16.msra.mxu1 %v3555_v29  ;;  %v4209_v12 = vunpack.c.l.b16 %v3532_v15 }
 0x4b6   :  { %1372 = vmatprep.subr.bf16.mxu0 %v3563_v16  ;;  %1413 = vmatprep.subr.bf16.mxu1 %v3569_v17  ;;  %v4208_v16 = vunpack.c.l.b16 %v3527_v20 }
 0x4b7   :  { %v1358_v17 = vrot.slane %v4209_v12, 3  ;;  %v3609_v12 = vld [vmem:[%s3937_s1 + $0x28] ss:$16 sps:$4 sm:$0xff]  }
 0x4b8   :  { %v1357_v29 = vrot.slane %v4208_v16, 4  ;;  %v3603_v16 = vld [vmem:[%s3937_s1 + $0x20] ss:$16 sps:$4 sm:$0xff]   ;;  %4213 = vst [vmem:[#allocation48_spill] sm:$0xff] %v3609_v12 }
 0x4b9   :  { %1373 = vmatpush1.bf16.msra.mxu0 %v3575_v61  ;;  %1414 = vmatpush1.bf16.msra.mxu1 %v3581_v34  ;;  %v3597_v61 = vld [vmem:[%s3937_s1 + $0x2c] ss:$16 sps:$4 sm:$0xff]   ;;  %4212 = vst [vmem:[#allocation47_spill] sm:$0xff] %v3603_v16 }
 0x4ba   :  { %1374 = vmatprep.subr.bf16.mxu0 %v3591_v24  ;;  %4211 = vst [vmem:[#allocation46_spill] sm:$0xff] %v3597_v61  ;;  %1415 = vmatprep.subr.bf16.mxu1 %v3597_v61  ;;  %v1359_v24 = vsel %vm366_vm0, %v1358_v17, %v1357_v29  ;;  %v3616_v61 = vld [vmem:[%s3937_s1 + $0x4] ss:$16 sps:$4 sm:$0xff]   ;;  %v3634_v29 = vld [vmem:[%s3937_s1 + $0x8] ss:$16 sps:$4 sm:$0xff]  }
 0x4bb   :  { %v1360_v15 = vpack.c.b16 %v1359_v24, %v1359_v24 }
 0x4bd   :  { %1375 = vmatpush1.bf16.msra.mxu0 %v3603_v16  ;;  %1416 = vmatpush1.bf16.msra.mxu1 %v3609_v12  ;;  %v3622_v16 = vld [vmem:[%s3937_s1 + $0xc] ss:$16 sps:$4 sm:$0xff]   ;;  %v3628_v12 = vld [vmem:[%s3937_s1] ss:$16 sps:$4 sm:$0xff]  }
 0x4be   :  { %1376 = vmatprep.subr.bf16.mxu0 %v3616_v61  ;;  %1417 = vmatprep.subr.bf16.mxu1 %v3622_v16 }
 0x4c1   :  { %1377 = vmatpush1.bf16.msra.mxu0 %v3628_v12  ;;  %1418 = vmatpush1.bf16.msra.mxu1 %v3634_v29 }
 0x4c2   :  { %1473 = vmatprep.subr.bf16.mxu0 %v3320_v42  ;;  %1514 = vmatprep.subr.bf16.mxu1 %v3323_v43 }
 0x4c4   :  { %1395 = vmatmul.mubr.bf16.vlgmr.msra.gmra.mxu0 %v1360_v15  ;;  %1436 = vmatmul.mubr.bf16.vlgmr.msra.gmra.mxu1 %v1360_v15 }
 0x4c5   :  { %1474 = vmatpush1.bf16.msra.mxu0 %v3326_v1  ;;  %1515 = vmatpush1.bf16.msra.mxu1 %v3329_v44 }
 0x4c6   :  { %1475 = vmatprep.subr.bf16.mxu0 %v3332_v45  ;;  %1516 = vmatprep.subr.bf16.mxu1 %v3335_v0 }
 0x4c7   :  { %1505 = vmatprep.mubr.bf16.mxu0 %v4113_v56  ;;  %1546 = vmatprep.mubr.bf16.mxu1 %v4113_v56 }
 0x4c9   :  { %1476 = vmatpush1.bf16.msra.mxu0 %v3340_v46  ;;  %1517 = vmatpush1.bf16.msra.mxu1 %v3343_v47 }
 0x4ca   :  { %1477 = vmatprep.subr.bf16.mxu0 %v3346_v48  ;;  %1518 = vmatprep.subr.bf16.mxu1 %v3349_v49 }
 0x4cd   :  { %1478 = vmatpush1.bf16.msra.mxu0 %v3352_v50  ;;  %1519 = vmatpush1.bf16.msra.mxu1 %v3355_v51 }
 0x4ce   :  { %1479 = vmatprep.subr.bf16.mxu0 %v3358_v52  ;;  %1520 = vmatprep.subr.bf16.mxu1 %v3361_v53 }
 0x4d1   :  { %1480 = vmatpush1.bf16.msra.mxu0 %v3364_v54  ;;  %1521 = vmatpush1.bf16.msra.mxu1 %v3367_v55 }
 0x4d2   :  { %1481 = vmatprep.subr.bf16.mxu0 %v3370_v57  ;;  %1522 = vmatprep.subr.bf16.mxu1 %v3373_v59 }
 0x4d5   :  { %1482 = vmatpush1.bf16.msra.mxu0 %v3376_v60  ;;  %1523 = vmatpush1.bf16.msra.mxu1 %v3379_v62 }
 0x4d6   :  { %1483 = vmatprep.subr.bf16.mxu0 %v3382_v63  ;;  %1524 = vmatprep.subr.bf16.mxu1 %v3385_v23 }
 0x4d9   :  { %1484 = vmatpush1.bf16.msra.mxu0 %v3388_v33  ;;  %1525 = vmatpush1.bf16.msra.mxu1 %v3391_v58 }
 0x4da   :  { %1485 = vmatprep.subr.bf16.mxu0 %v3394_v25  ;;  %1526 = vmatprep.subr.bf16.mxu1 %v3397_v28 }
 0x4dd   :  { %1486 = vmatpush1.bf16.msra.mxu0 %v3400_v32  ;;  %1527 = vmatpush1.bf16.msra.mxu1 %v3403_v8 }
 0x4de   :  { %1487 = vmatprep.subr.bf16.mxu0 %v3406_v36  ;;  %1528 = vmatprep.subr.bf16.mxu1 %v3409_v14 }
 0x4e1   :  { %1488 = vmatpush1.bf16.msra.mxu0 %v3412_v27  ;;  %1529 = vmatpush1.bf16.msra.mxu1 %v3415_v37 }
 0x4e2   :  { %1560 = vmatprep.subr.bf16.mxu0 %v3421_v18  ;;  %1601 = vmatprep.subr.bf16.mxu1 %v3427_v30 }
 0x564   :  { %v1301_v15 = vpop.f32.mrf.mxu0  ;;  %v1342_v24 = vpop.f32.mrf.mxu1 }
 0x566   :  { %v1303_v17 = vpop.f32.mrf.mxu0  ;;  %v1344_v28 = vpop.f32.mrf.mxu1 }
 0x568   :  { %v1305_v25 = vpop.f32.mrf.mxu0  ;;  %v1346_v32 = vpop.f32.mrf.mxu1 }
 0x56a   :  { %v1306_v58 = vpop.f32.mrf.mxu0  ;;  %v1347_v8 = vpop.f32.mrf.mxu1 }
 0x584   :  { %v1396_v33 = vpop.f32.mrf.mxu0  ;;  %v1437_v36 = vpop.f32.mrf.mxu1 }
 0x585   :  { %v1397_v23 = vadd.f32 %v1396_v33, %v1301_v15  ;;  %v1438_v8 = vadd.f32 %v1437_v36, %v1342_v24 }
 0x586   :  { %v1398_v14 = vpop.f32.mrf.mxu0  ;;  %v1439_v63 = vpop.f32.mrf.mxu1 }
 0x587   :  { %v1444_v27 = vadd.f32 %v1397_v23, %v3094_v31  ;;  %v1399_v37 = vadd.f32 %v1398_v14, %v1303_v17  ;;  %v1440_v58 = vadd.f32 %v1439_v63, %v1344_v28  ;;  %v1446_v55 = vadd.f32 %v1438_v8, %v3103_v22  ;;  %v4219_v8 = vld [vmem:[#allocation44_spill] sm:$0xff] }
 0x588   :  { %v1400_v62 = vpop.f32.mrf.mxu0  ;;  %v1441_v18 = vpop.f32.mrf.mxu1 }
 0x589   :  { %v2292_v60 = vmul.f32 -1.442695, %v1444_v27  ;;  %v1445_v30 = vadd.f32 %v1399_v37, %v3096_v21  ;;  %v1447_v32 = vadd.f32 %v1440_v58, %v3100_v35  ;;  %v4217_v58 = vld [vmem:[#allocation36_spill] sm:$0xff] }
 0x58a   :  { %v1401_v59 = vpop.f32.mrf.mxu0  ;;  %v1442_v57 = vpop.f32.mrf.mxu1 }
 0x58b   :  { %2527 = vpow2.f32 %v2292_v60  ;;  %v2293_v25 = vmul.f32 -1.442695, %v1445_v30  ;;  %v2294_v33 = vmul.f32 -1.442695, %v1447_v32  ;;  %v4218_v32 = vld [vmem:[#allocation37_spill] sm:$0xff] }
 0x58d   :  { %2529 = vpow2.f32 %v2293_v25  ;;  %v4216_v25 = vld [vmem:[#allocation35_spill] sm:$0xff] }
 0x58e   :  { %2531 = vpow2.f32 %v2294_v33  ;;  %v4220_v33 = vunpack.c.l.b16 %v3527_v20  ;;  %v4227_v20 = vld [vmem:[#allocation13_spill] sm:$0xff] }
 0x598   :  { %v2528_v15 = vpop.eup %2527 }
 0x599   :  { %v1451_v23 = vadd.f32 1.0, %v2528_v15  ;;  %v1555_v15 = vrot.slane %v4220_v33, 5  ;;  %v4233_v33 = vld [vmem:[#allocation19_spill] sm:$0xff] }
 0x59a   :  { %v2530_v14 = vpop.eup %2529 }
 0x59b   :  { %2533 = vrcp.f32 %v1451_v23  ;;  %v1457_v62 = vadd.f32 1.0, %v2530_v14  ;;  %v2532_v59 = vpop.eup %2531  ;;  %v4221_v23 = vld [vmem:[#allocation32_spill] sm:$0xff] }
 0x59c   :  { %2535 = vtanh.f32 %v1446_v55  ;;  %v1464_v37 = vadd.f32 1.0, %v2532_v59  ;;  %v4214_v55 = vld [vmem:[#allocation33_spill] sm:$0xff]  ;;  %v4222_v14 = vunpack.c.l.b16 %v4221_v23 }
 0x59d   :  { %2537 = vrcp.f32 %v1457_v62  ;;  %v4223_v59 = vld [vmem:[#allocation45_spill] sm:$0xff] }
 0x59e   :  { %2539 = vrcp.f32 %v1464_v37  ;;  %v1556_v62 = vrot.slane %v4222_v14, 4  ;;  %v4235_v23 = vld [vmem:[#allocation21_spill] sm:$0xff]  ;;  %v4236_v14 = vld [vmem:[#allocation22_spill] sm:$0xff] }
 0x5a0   :  { %v1557_v37 = vsel %vm366_vm0, %v1556_v62, %v1555_v15  ;;  %v4234_v15 = vld [vmem:[#allocation20_spill] sm:$0xff]  ;;  %v4237_v62 = vld [vmem:[#allocation23_spill] sm:$0xff] }
 0x5a8   :  { %v2534_v57 = vpop.eup %2533 }
 0x5a9   :  { %v2536_v60 = vpop.eup %2535 }
 0x5aa   :  { %v2538_v27 = vpop.eup %2537  ;;  %v1468_v63 = vmul.f32 %v2536_v60, %v2534_v57  ;;  %v4224_v57 = vld [vmem:[#allocation46_spill] sm:$0xff]  ;;  %v4225_v60 = vld [vmem:[#allocation47_spill] sm:$0xff] }
 0x5ab   :  { %v1467_v28 = vmul.f32 %v2538_v27, %v3435_v3  ;;  %v2540_v18 = vpop.eup %2539  ;;  %v4215_v3 = vld [vmem:[#allocation34_spill] sm:$0xff]  ;;  %v4226_v27 = vld [vmem:[#allocation48_spill] sm:$0xff] }
 0x5ad   :  { %v3678_v36 = vadd.f32 %v1468_v63, %v1467_v28  ;;  %v1558_v63 = vpack.c.b16 %v1557_v37, %v1557_v37  ;;  %v4228_v28 = vld [vmem:[#allocation14_spill] sm:$0xff]  ;;  %v4238_v37 = vld [vmem:[#allocation24_spill] sm:$0xff] }
 0x5af   :  { %2541 = vtanh.f32 %v3678_v36 }
 0x5bc   :  { %v2542_v30 = vpop.eup %2541 }
 0x5bd   :  { %v1471_v24 = vmul.f32 %v2542_v30, %v2540_v18  ;;  %v4229_v18 = vld [vmem:[#allocation15_spill] sm:$0xff]  ;;  %v4230_v30 = vld [vmem:[#allocation16_spill] sm:$0xff] }
 0x5bf   :  { %v1472_v17 = vpack.c.bf16 %v1471_v24, %v1471_v24  ;;  %v4231_v24 = vld [vmem:[#allocation17_spill] sm:$0xff] }
 0x5c1   :  { %1506 = vmatmul.mubr.bf16.vlgmr.msra.gmra.mxu0 %v1472_v17  ;;  %1547 = vmatmul.mubr.bf16.vlgmr.msra.gmra.mxu1 %v1472_v17  ;;  %v4232_v17 = vld [vmem:[#allocation18_spill] sm:$0xff] }
 0x5c2   :  { %1561 = vmatpush1.bf16.msra.mxu0 %v3441_v19  ;;  %1602 = vmatpush1.bf16.msra.mxu1 %v3447_v4 }
 0x5c3   :  { %1562 = vmatprep.subr.bf16.mxu0 %v3453_v38  ;;  %1603 = vmatprep.subr.bf16.mxu1 %v3459_v39 }
 0x5c4   :  { %1592 = vmatprep.mubr.bf16.mxu0 %v4113_v56  ;;  %1633 = vmatprep.mubr.bf16.mxu1 %v4113_v56 }
 0x5c6   :  { %1563 = vmatpush1.bf16.msra.mxu0 %v3467_v40  ;;  %1604 = vmatpush1.bf16.msra.mxu1 %v3473_v41 }
 0x5c7   :  { %1564 = vmatprep.subr.bf16.mxu0 %v3479_v10  ;;  %1605 = vmatprep.subr.bf16.mxu1 %v3485_v2 }
 0x5ca   :  { %1565 = vmatpush1.bf16.msra.mxu0 %v3491_v9  ;;  %1606 = vmatpush1.bf16.msra.mxu1 %v3497_v11 }
 0x5cb   :  { %1566 = vmatprep.subr.bf16.mxu0 %v3503_v5  ;;  %1607 = vmatprep.subr.bf16.mxu1 %v3509_v7 }
 0x5ce   :  { %1567 = vmatpush1.bf16.msra.mxu0 %v3515_v13  ;;  %1608 = vmatpush1.bf16.msra.mxu1 %v3521_v26 }
 0x5cf   :  { %1568 = vmatprep.subr.bf16.mxu0 %v3537_v6  ;;  %1609 = vmatprep.subr.bf16.mxu1 %v4214_v55 }
 0x5d2   :  { %1569 = vmatpush1.bf16.msra.mxu0 %v4215_v3  ;;  %1610 = vmatpush1.bf16.msra.mxu1 %v4216_v25 }
 0x5d3   :  { %1570 = vmatprep.subr.bf16.mxu0 %v4217_v58  ;;  %1611 = vmatprep.subr.bf16.mxu1 %v4218_v32 }
 0x5d6   :  { %1571 = vmatpush1.bf16.msra.mxu0 %v4219_v8  ;;  %1612 = vmatpush1.bf16.msra.mxu1 %v3581_v34 }
 0x5d7   :  { %1572 = vmatprep.subr.bf16.mxu0 %v4223_v59  ;;  %1613 = vmatprep.subr.bf16.mxu1 %v4224_v57 }
 0x5da   :  { %1573 = vmatpush1.bf16.msra.mxu0 %v4225_v60  ;;  %1614 = vmatpush1.bf16.msra.mxu1 %v4226_v27 }
 0x5db   :  { %1574 = vmatprep.subr.bf16.mxu0 %v3616_v61  ;;  %1615 = vmatprep.subr.bf16.mxu1 %v3622_v16 }
 0x5de   :  { %1575 = vmatpush1.bf16.msra.mxu0 %v3628_v12  ;;  %1616 = vmatpush1.bf16.msra.mxu1 %v3634_v29 }
 0x5df   :  { %1673 = vmatprep.subr.bf16.mxu0 %v3320_v42  ;;  %1714 = vmatprep.subr.bf16.mxu1 %v3323_v43 }
 0x5e1   :  { %1593 = vmatmul.mubr.bf16.vlgmr.msra.gmra.mxu0 %v1558_v63  ;;  %1634 = vmatmul.mubr.bf16.vlgmr.msra.gmra.mxu1 %v1558_v63  ;;  %v4239_v63 = vld [vmem:[#allocation25_spill] sm:$0xff] }
 0x5e2   :  { %1674 = vmatpush1.bf16.msra.mxu0 %v3326_v1  ;;  %1715 = vmatpush1.bf16.msra.mxu1 %v3329_v44 }
 0x5e3   :  { %1675 = vmatprep.subr.bf16.mxu0 %v3332_v45  ;;  %1716 = vmatprep.subr.bf16.mxu1 %v3335_v0 }
 0x5e4   :  { %1705 = vmatprep.mubr.bf16.mxu0 %v4113_v56  ;;  %1746 = vmatprep.mubr.bf16.mxu1 %v4113_v56 }
 0x5e6   :  { %1676 = vmatpush1.bf16.msra.mxu0 %v3340_v46  ;;  %1717 = vmatpush1.bf16.msra.mxu1 %v3343_v47 }
 0x5e7   :  { %1677 = vmatprep.subr.bf16.mxu0 %v3346_v48  ;;  %1718 = vmatprep.subr.bf16.mxu1 %v3349_v49 }
 0x5ea   :  { %1678 = vmatpush1.bf16.msra.mxu0 %v3352_v50  ;;  %1719 = vmatpush1.bf16.msra.mxu1 %v3355_v51 }
 0x5eb   :  { %1679 = vmatprep.subr.bf16.mxu0 %v3358_v52  ;;  %1720 = vmatprep.subr.bf16.mxu1 %v3361_v53 }
 0x5ee   :  { %1680 = vmatpush1.bf16.msra.mxu0 %v3364_v54  ;;  %1721 = vmatpush1.bf16.msra.mxu1 %v4227_v20 }
 0x5ef   :  { %1681 = vmatprep.subr.bf16.mxu0 %v4228_v28  ;;  %1722 = vmatprep.subr.bf16.mxu1 %v4229_v18  ;;  %v4240_v18 = vld [vmem:[#allocation26_spill] sm:$0xff] }
 0x5f2   :  { %1682 = vmatpush1.bf16.msra.mxu0 %v4230_v30  ;;  %1723 = vmatpush1.bf16.msra.mxu1 %v4231_v24  ;;  %v4241_v30 = vld [vmem:[#allocation27_spill] sm:$0xff]  ;;  %v4242_v24 = vld [vmem:[#allocation28_spill] sm:$0xff] }
 0x5f3   :  { %1683 = vmatprep.subr.bf16.mxu0 %v4232_v17  ;;  %1724 = vmatprep.subr.bf16.mxu1 %v4233_v33  ;;  %v4243_v17 = vld [vmem:[#allocation29_spill] sm:$0xff]  ;;  %v4244_v33 = vld [vmem:[#allocation30_spill] sm:$0xff] }
 0x5f6   :  { %1684 = vmatpush1.bf16.msra.mxu0 %v4234_v15  ;;  %1725 = vmatpush1.bf16.msra.mxu1 %v4235_v23  ;;  %v4245_v15 = vld [vmem:[#allocation31_spill] sm:$0xff] }
 0x5f7   :  { %1685 = vmatprep.subr.bf16.mxu0 %v4236_v14  ;;  %1726 = vmatprep.subr.bf16.mxu1 %v4237_v62 }
 0x5fa   :  { %1686 = vmatpush1.bf16.msra.mxu0 %v4238_v37  ;;  %1727 = vmatpush1.bf16.msra.mxu1 %v4239_v63 }
 0x5fb   :  { %1687 = vmatprep.subr.bf16.mxu0 %v4240_v18  ;;  %1728 = vmatprep.subr.bf16.mxu1 %v4241_v30 }
 0x5fe   :  { %1688 = vmatpush1.bf16.msra.mxu0 %v4242_v24  ;;  %1729 = vmatpush1.bf16.msra.mxu1 %v4243_v17 }
 0x5ff   :  { %1768 = vmatprep.subr.bf16.mxu0 %v4244_v33  ;;  %1809 = vmatprep.subr.bf16.mxu1 %v4245_v15 }
 0x681   :  { %v1507_v23 = vpop.f32.mrf.mxu0  ;;  %v1548_v14 = vpop.f32.mrf.mxu1 }
 0x683   :  { %v1509_v28 = vpop.f32.mrf.mxu0  ;;  %v1550_v62 = vpop.f32.mrf.mxu1 }
 0x685   :  { %v1511_v20 = vpop.f32.mrf.mxu0  ;;  %v1552_v37 = vpop.f32.mrf.mxu1 }
 0x687   :  { %v1512_v54 = vpop.f32.mrf.mxu0  ;;  %v1553_v63 = vpop.f32.mrf.mxu1 }
 0x6a1   :  { %v1594_v53 = vpop.f32.mrf.mxu0  ;;  %v1635_v18 = vpop.f32.mrf.mxu1 }
 0x6a2   :  { %v1595_v52 = vadd.f32 %v1594_v53, %v1507_v23  ;;  %v1636_v63 = vadd.f32 %v1635_v18, %v1548_v14 }
 0x6a3   :  { %v1596_v30 = vpop.f32.mrf.mxu0  ;;  %v1637_v51 = vpop.f32.mrf.mxu1 }
 0x6a4   :  { %v1642_v24 = vadd.f32 %v1595_v52, %v3094_v31  ;;  %v1597_v17 = vadd.f32 %v1596_v30, %v1509_v28  ;;  %v1638_v54 = vadd.f32 %v1637_v51, %v1550_v62  ;;  %v1644_v46 = vadd.f32 %v1636_v63, %v3103_v22 }
 0x6a5   :  { %v1598_v50 = vpop.f32.mrf.mxu0  ;;  %v1639_v33 = vpop.f32.mrf.mxu1 }
 0x6a6   :  { %v2295_v49 = vmul.f32 -1.442695, %v1642_v24  ;;  %v1643_v15 = vadd.f32 %v1597_v17, %v3096_v21  ;;  %v1645_v37 = vadd.f32 %v1638_v54, %v3100_v35 }
 0x6a7   :  { %v1599_v48 = vpop.f32.mrf.mxu0  ;;  %v1640_v47 = vpop.f32.mrf.mxu1 }
 0x6a8   :  { %2543 = vpow2.f32 %v2295_v49  ;;  %v2296_v20 = vmul.f32 -1.442695, %v1643_v15  ;;  %v2297_v53 = vmul.f32 -1.442695, %v1645_v37 }
 0x6aa   :  { %2545 = vpow2.f32 %v2296_v20 }
 0x6ab   :  { %2547 = vpow2.f32 %v2297_v53 }
 0x6b5   :  { %v2544_v23 = vpop.eup %2543 }
 0x6b6   :  { %v1649_v52 = vadd.f32 1.0, %v2544_v23 }
 0x6b7   :  { %v2546_v28 = vpop.eup %2545 }
 0x6b8   :  { %2549 = vrcp.f32 %v1649_v52  ;;  %v1655_v50 = vadd.f32 1.0, %v2546_v28  ;;  %v2548_v48 = vpop.eup %2547  ;;  %v4246_v52 = vld [vmem:[#allocation39_spill] sm:$0xff]  ;;  %v4247_v28 = vld [vmem:[#allocation40_spill] sm:$0xff] }
 0x6b9   :  { %2551 = vtanh.f32 %v1644_v46  ;;  %v1662_v24 = vadd.f32 1.0, %v2548_v48  ;;  %v3781_v46 = vld [vmem:[%s3936_s0] ss:$0 sps:$4 sm:$0x88]  }
 0x6ba   :  { %2553 = vrcp.f32 %v1655_v50  ;;  %v1761_v20 = vunpack.c.l.b16 %v3781_v46  ;;  %v4250_v50 = vld [vmem:[#allocation43_spill] sm:$0xff]  ;;  %v4255_v48 = vld [vmem:[#allocation13_spill] sm:$0xff] }
 0x6bb   :  { %2555 = vrcp.f32 %v1662_v24  ;;  %v4259_v24 = vld [vmem:[#allocation17_spill] sm:$0xff] }
 0x6bc   :  { %v1763_v37 = vrot.slane %v1761_v20, 6 }
 0x6c5   :  { %v2550_v47 = vpop.eup %2549 }
 0x6c6   :  { %v2552_v49 = vpop.eup %2551 }
 0x6c7   :  { %v2554_v30 = vpop.eup %2553  ;;  %v1666_v51 = vmul.f32 %v2552_v49, %v2550_v47  ;;  %v4256_v47 = vld [vmem:[#allocation14_spill] sm:$0xff]  ;;  %v4257_v49 = vld [vmem:[#allocation15_spill] sm:$0xff] }
 0x6c8   :  { %v1665_v17 = vmul.f32 %v2554_v30, %v3678_v36  ;;  %v2556_v33 = vpop.eup %2555  ;;  %v3786_v36 = vld [vmem:[%s3936_s0 + $0x4] ss:$0 sps:$4 sm:$0x88]   ;;  %v4258_v30 = vld [vmem:[#allocation16_spill] sm:$0xff] }
 0x6c9   :  { %v1762_v54 = vunpack.c.l.b16 %v3786_v36 }
 0x6ca   :  { %v3759_v18 = vadd.f32 %v1666_v51, %v1665_v17  ;;  %v4260_v51 = vld [vmem:[#allocation18_spill] sm:$0xff]  ;;  %v4261_v17 = vld [vmem:[#allocation19_spill] sm:$0xff] }
 0x6cb   :  { %v1764_v63 = vrot.slane %v1762_v54, 5 }
 0x6cc   :  { %2557 = vtanh.f32 %v3759_v18 }
 0x6cd   :  { %v1765_v53 = vsel %vm366_vm0, %v1764_v63, %v1763_v37  ;;  %v4266_v37 = vld [vmem:[#allocation24_spill] sm:$0xff]  ;;  %v4267_v63 = vld [vmem:[#allocation25_spill] sm:$0xff] }
 0x6ce   :  { %v1766_v23 = vpack.c.b16 %v1765_v53, %v1765_v53  ;;  %v4268_v53 = vld [vmem:[#allocation26_spill] sm:$0xff] }
 0x6d9   :  { %v2558_v15 = vpop.eup %2557 }
 0x6da   :  { %v1669_v14 = vmul.f32 %v2558_v15, %v2556_v33  ;;  %v4262_v33 = vld [vmem:[#allocation20_spill] sm:$0xff]  ;;  %v4263_v15 = vld [vmem:[#allocation21_spill] sm:$0xff] }
 0x6dc   :  { %v1672_v62 = vpack.c.bf16 %v1669_v14, %v1669_v14  ;;  %v4264_v14 = vld [vmem:[#allocation22_spill] sm:$0xff] }
 0x6de   :  { %1706 = vmatmul.mubr.bf16.vlgmr.msra.gmra.mxu0 %v1672_v62  ;;  %1747 = vmatmul.mubr.bf16.vlgmr.msra.gmra.mxu1 %v1672_v62  ;;  %v4265_v62 = vld [vmem:[#allocation23_spill] sm:$0xff] }
 0x6df   :  { %1769 = vmatpush1.bf16.msra.mxu0 %v3441_v19  ;;  %1810 = vmatpush1.bf16.msra.mxu1 %v3447_v4 }
 0x6e0   :  { %1770 = vmatprep.subr.bf16.mxu0 %v3453_v38  ;;  %1811 = vmatprep.subr.bf16.mxu1 %v3459_v39 }
 0x6e1   :  { %1800 = vmatprep.mubr.bf16.mxu0 %v4113_v56  ;;  %1841 = vmatprep.mubr.bf16.mxu1 %v4113_v56 }
 0x6e3   :  { %1771 = vmatpush1.bf16.msra.mxu0 %v3467_v40  ;;  %1812 = vmatpush1.bf16.msra.mxu1 %v3473_v41 }
 0x6e4   :  { %1772 = vmatprep.subr.bf16.mxu0 %v3479_v10  ;;  %1813 = vmatprep.subr.bf16.mxu1 %v3485_v2 }
 0x6e7   :  { %1773 = vmatpush1.bf16.msra.mxu0 %v3491_v9  ;;  %1814 = vmatpush1.bf16.msra.mxu1 %v3497_v11 }
 0x6e8   :  { %1774 = vmatprep.subr.bf16.mxu0 %v3503_v5  ;;  %1815 = vmatprep.subr.bf16.mxu1 %v3509_v7 }
 0x6eb   :  { %1775 = vmatpush1.bf16.msra.mxu0 %v3515_v13  ;;  %1816 = vmatpush1.bf16.msra.mxu1 %v3521_v26 }
 0x6ec   :  { %1776 = vmatprep.subr.bf16.mxu0 %v3537_v6  ;;  %1817 = vmatprep.subr.bf16.mxu1 %v4214_v55 }
 0x6ef   :  { %1777 = vmatpush1.bf16.msra.mxu0 %v4215_v3  ;;  %1818 = vmatpush1.bf16.msra.mxu1 %v4216_v25 }
 0x6f0   :  { %1778 = vmatprep.subr.bf16.mxu0 %v4217_v58  ;;  %1819 = vmatprep.subr.bf16.mxu1 %v4218_v32 }
 0x6f3   :  { %1779 = vmatpush1.bf16.msra.mxu0 %v4219_v8  ;;  %1820 = vmatpush1.bf16.msra.mxu1 %v3581_v34 }
 0x6f4   :  { %1780 = vmatprep.subr.bf16.mxu0 %v4223_v59  ;;  %1821 = vmatprep.subr.bf16.mxu1 %v4224_v57 }
 0x6f7   :  { %1781 = vmatpush1.bf16.msra.mxu0 %v4225_v60  ;;  %1822 = vmatpush1.bf16.msra.mxu1 %v4226_v27 }
 0x6f8   :  { %1782 = vmatprep.subr.bf16.mxu0 %v3616_v61  ;;  %1823 = vmatprep.subr.bf16.mxu1 %v3622_v16 }
 0x6fb   :  { %1783 = vmatpush1.bf16.msra.mxu0 %v3628_v12  ;;  %1824 = vmatpush1.bf16.msra.mxu1 %v3634_v29 }
 0x6fc   :  { %1879 = vmatprep.subr.bf16.mxu0 %v3320_v42  ;;  %1920 = vmatprep.subr.bf16.mxu1 %v3323_v43  ;;  %v4248_v42 = vld [vmem:[#allocation41_spill] sm:$0xff]  ;;  %v4249_v43 = vld [vmem:[#allocation42_spill] sm:$0xff] }
 0x6fe   :  { %1801 = vmatmul.mubr.bf16.vlgmr.msra.gmra.mxu0 %v1766_v23  ;;  %1842 = vmatmul.mubr.bf16.vlgmr.msra.gmra.mxu1 %v1766_v23  ;;  %v4269_v23 = vld [vmem:[#allocation27_spill] sm:$0xff] }
 0x6ff   :  { %1880 = vmatpush1.bf16.msra.mxu0 %v3326_v1  ;;  %1921 = vmatpush1.bf16.msra.mxu1 %v3329_v44  ;;  %v4251_v1 = vld [vmem:[#allocation38_spill] sm:$0xff] }
 0x700   :  { %1881 = vmatprep.subr.bf16.mxu0 %v3332_v45  ;;  %1922 = vmatprep.subr.bf16.mxu1 %v3335_v0  ;;  %v4252_v44 = vld [vmem:[#allocation10_spill] sm:$0xff]  ;;  %v4253_v45 = vld [vmem:[#allocation11_spill] sm:$0xff]  ;;  %v4254_v0 = vld [vmem:[#allocation12_spill] sm:$0xff] }
 0x701   :  { %1911 = vmatprep.mubr.bf16.mxu0 %v4113_v56  ;;  %1952 = vmatprep.mubr.bf16.mxu1 %v4113_v56 }
 0x703   :  { %1882 = vmatpush1.bf16.msra.mxu0 %v4246_v52  ;;  %1923 = vmatpush1.bf16.msra.mxu1 %v4247_v28  ;;  %v4270_v52 = vld [vmem:[#allocation28_spill] sm:$0xff]  ;;  %v4271_v28 = vld [vmem:[#allocation29_spill] sm:$0xff] }
 0x704   :  { %1883 = vmatprep.subr.bf16.mxu0 %v4248_v42  ;;  %1924 = vmatprep.subr.bf16.mxu1 %v4249_v43  ;;  %v4272_v42 = vld [vmem:[#allocation30_spill] sm:$0xff]  ;;  %v4273_v43 = vld [vmem:[#allocation31_spill] sm:$0xff] }
 0x707   :  { %1884 = vmatpush1.bf16.msra.mxu0 %v4250_v50  ;;  %1925 = vmatpush1.bf16.msra.mxu1 %v4251_v1 }
 0x708   :  { %1885 = vmatprep.subr.bf16.mxu0 %v4252_v44  ;;  %1926 = vmatprep.subr.bf16.mxu1 %v4253_v45 }
 0x70b   :  { %1886 = vmatpush1.bf16.msra.mxu0 %v4254_v0  ;;  %1927 = vmatpush1.bf16.msra.mxu1 %v4255_v48 }
 0x70c   :  { %1887 = vmatprep.subr.bf16.mxu0 %v4256_v47  ;;  %1928 = vmatprep.subr.bf16.mxu1 %v4257_v49 }
 0x70f   :  { %1888 = vmatpush1.bf16.msra.mxu0 %v4258_v30  ;;  %1929 = vmatpush1.bf16.msra.mxu1 %v4259_v24 }
 0x710   :  { %1889 = vmatprep.subr.bf16.mxu0 %v4260_v51  ;;  %1930 = vmatprep.subr.bf16.mxu1 %v4261_v17 }
 0x713   :  { %1890 = vmatpush1.bf16.msra.mxu0 %v4262_v33  ;;  %1931 = vmatpush1.bf16.msra.mxu1 %v4263_v15 }
 0x714   :  { %1891 = vmatprep.subr.bf16.mxu0 %v4264_v14  ;;  %1932 = vmatprep.subr.bf16.mxu1 %v4265_v62 }
 0x717   :  { %1892 = vmatpush1.bf16.msra.mxu0 %v4266_v37  ;;  %1933 = vmatpush1.bf16.msra.mxu1 %v4267_v63 }
 0x718   :  { %1893 = vmatprep.subr.bf16.mxu0 %v4268_v53  ;;  %1934 = vmatprep.subr.bf16.mxu1 %v4269_v23 }
 0x71b   :  { %1894 = vmatpush1.bf16.msra.mxu0 %v4270_v52  ;;  %1935 = vmatpush1.bf16.msra.mxu1 %v4271_v28 }
 0x71c   :  { %1966 = vmatprep.subr.bf16.mxu0 %v4272_v42  ;;  %2007 = vmatprep.subr.bf16.mxu1 %v4273_v43 }
 0x79e   :  { %v1707_v50 = vpop.f32.mrf.mxu0  ;;  %v1748_v1 = vpop.f32.mrf.mxu1 }
 0x7a0   :  { %v1709_v44 = vpop.f32.mrf.mxu0  ;;  %v1750_v45 = vpop.f32.mrf.mxu1 }
 0x7a2   :  { %v1711_v0 = vpop.f32.mrf.mxu0  ;;  %v1752_v48 = vpop.f32.mrf.mxu1 }
 0x7a4   :  { %v1712_v47 = vpop.f32.mrf.mxu0  ;;  %v1753_v49 = vpop.f32.mrf.mxu1 }
 0x7be   :  { %v1802_v30 = vpop.f32.mrf.mxu0  ;;  %v1843_v24 = vpop.f32.mrf.mxu1 }
 0x7bf   :  { %v1803_v51 = vadd.f32 %v1802_v30, %v1707_v50  ;;  %v1844_v0 = vadd.f32 %v1843_v24, %v1748_v1 }
 0x7c0   :  { %v1804_v17 = vpop.f32.mrf.mxu0  ;;  %v1845_v33 = vpop.f32.mrf.mxu1 }
 0x7c1   :  { %v1850_v15 = vadd.f32 %v1803_v51, %v3094_v31  ;;  %v1805_v14 = vadd.f32 %v1804_v17, %v1709_v44  ;;  %v1846_v42 = vadd.f32 %v1845_v33, %v1750_v45  ;;  %v1852_v47 = vadd.f32 %v1844_v0, %v3103_v22 }
 0x7c2   :  { %v1806_v62 = vpop.f32.mrf.mxu0  ;;  %v1847_v37 = vpop.f32.mrf.mxu1 }
 0x7c3   :  { %v2300_v63 = vmul.f32 -1.442695, %v1850_v15  ;;  %v1851_v53 = vadd.f32 %v1805_v14, %v3096_v21  ;;  %v1853_v43 = vadd.f32 %v1846_v42, %v3100_v35 }
 0x7c4   :  { %v1807_v23 = vpop.f32.mrf.mxu0  ;;  %v1848_v52 = vpop.f32.mrf.mxu1 }
 0x7c5   :  { %2559 = vpow2.f32 %v2300_v63  ;;  %v2301_v28 = vmul.f32 -1.442695, %v1851_v53  ;;  %v2302_v50 = vmul.f32 -1.442695, %v1853_v43 }
 0x7c7   :  { %2561 = vpow2.f32 %v2301_v28 }
 0x7c8   :  { %2563 = vpow2.f32 %v2302_v50 }
 0x7d2   :  { %v2560_v48 = vpop.eup %2559 }
 0x7d3   :  { %v1857_v49 = vadd.f32 1.0, %v2560_v48 }
 0x7d4   :  { %v2562_v44 = vpop.eup %2561 }
 0x7d5   :  { %2565 = vrcp.f32 %v1857_v49  ;;  %v1863_v30 = vadd.f32 1.0, %v2562_v44  ;;  %v2564_v51 = vpop.eup %2563 }
 0x7d6   :  { %2567 = vtanh.f32 %v1852_v47  ;;  %v1870_v62 = vadd.f32 1.0, %v2564_v51 }
 0x7d7   :  { %2569 = vrcp.f32 %v1863_v30 }
 0x7d8   :  { %2571 = vrcp.f32 %v1870_v62  ;;  %v2306_v62 = vld [vmem:[%s3941_s5] ss:$0 sm:$0xff] }
 0x7e2   :  { %v2566_v17 = vpop.eup %2565 }
 0x7e3   :  { %v2568_v15 = vpop.eup %2567 }
 0x7e4   :  { %v2570_v14 = vpop.eup %2569  ;;  %v1874_v45 = vmul.f32 %v2568_v15, %v2566_v17 }
 0x7e5   :  { %v1873_v33 = vmul.f32 %v2570_v14, %v3759_v18  ;;  %v2572_v24 = vpop.eup %2571 }
 0x7e7   :  { %v3852_v1 = vadd.f32 %v1874_v45, %v1873_v33 }
 0x7e9   :  { %2573 = vtanh.f32 %v3852_v1 }
 0x7f6   :  { %v2574_v37 = vpop.eup %2573 }
 0x7f7   :  { %v1877_v63 = vmul.f32 %v2574_v37, %v2572_v24 }
 0x7f9   :  { %v1878_v53 = vpack.c.bf16 %v1877_v63, %v1877_v63 }
 0x7fb   :  { %1912 = vmatmul.mubr.bf16.vlgmr.msra.gmra.mxu0 %v1878_v53  ;;  %1953 = vmatmul.mubr.bf16.vlgmr.msra.gmra.mxu1 %v1878_v53 }
 0x7fc   :  { %1967 = vmatpush1.bf16.msra.mxu0 %v3441_v19  ;;  %2008 = vmatpush1.bf16.msra.mxu1 %v3447_v4  ;;  %v1962_v19 = vrot.slane %v1762_v54, 6 }
 0x7fd   :  { %1968 = vmatprep.subr.bf16.mxu0 %v3453_v38  ;;  %2009 = vmatprep.subr.bf16.mxu1 %v3459_v39  ;;  %v4274_v39 = vmov 0.0  }
 0x7fe   :  { %1998 = vmatprep.mubr.bf16.mxu0 %v4113_v56  ;;  %2039 = vmatprep.mubr.bf16.mxu1 %v4113_v56  ;;  %v1961_v56 = vrot.slane %v1761_v20, 7 }
 0x800   :  { %1969 = vmatpush1.bf16.msra.mxu0 %v3467_v40  ;;  %2010 = vmatpush1.bf16.msra.mxu1 %v3473_v41  ;;  %v1963_v4 = vsel %vm366_vm0, %v1962_v19, %v1961_v56  ;;  %v2455_v40 = vld [vmem:[%s3940_s4 + $0x38] sm:$0xff]   ;;  %v2456_v41 = vld [vmem:[%s3940_s4 + $0x30] sm:$0xff]  }
 0x801   :  { %1970 = vmatprep.subr.bf16.mxu0 %v3479_v10  ;;  %2011 = vmatprep.subr.bf16.mxu1 %v3485_v2  ;;  %v1964_v38 = vpack.c.b16 %v1963_v4, %v1963_v4  ;;  %v2457_v10 = vld [vmem:[%s3940_s4 + $0x28] sm:$0xff]   ;;  %v2458_v2 = vld [vmem:[%s3940_s4 + $0x20] sm:$0xff]  }
 0x804   :  { %1971 = vmatpush1.bf16.msra.mxu0 %v3491_v9  ;;  %2012 = vmatpush1.bf16.msra.mxu1 %v3497_v11  ;;  %v2459_v9 = vld [vmem:[%s3940_s4 + $0x18] sm:$0xff]   ;;  %v2460_v11 = vld [vmem:[%s3940_s4 + $0x10] sm:$0xff]  }
 0x805   :  { %1972 = vmatprep.subr.bf16.mxu0 %v3503_v5  ;;  %2013 = vmatprep.subr.bf16.mxu1 %v3509_v7  ;;  %v2461_v5 = vld [vmem:[%s3940_s4 + $0x8] sm:$0xff]   ;;  %v2462_v7 = vld [vmem:[%s3940_s4] sm:$0xff]  }
 0x808   :  { %1973 = vmatpush1.bf16.msra.mxu0 %v3515_v13  ;;  %2014 = vmatpush1.bf16.msra.mxu1 %v3521_v26 }
 0x809   :  { %1974 = vmatprep.subr.bf16.mxu0 %v3537_v6  ;;  %2015 = vmatprep.subr.bf16.mxu1 %v4214_v55 }
 0x80c   :  { %1975 = vmatpush1.bf16.msra.mxu0 %v4215_v3  ;;  %2016 = vmatpush1.bf16.msra.mxu1 %v4216_v25 }
 0x80d   :  { %1976 = vmatprep.subr.bf16.mxu0 %v4217_v58  ;;  %2017 = vmatprep.subr.bf16.mxu1 %v4218_v32 }
 0x810   :  { %1977 = vmatpush1.bf16.msra.mxu0 %v4219_v8  ;;  %2018 = vmatpush1.bf16.msra.mxu1 %v3581_v34 }
 0x811   :  { %1978 = vmatprep.subr.bf16.mxu0 %v4223_v59  ;;  %2019 = vmatprep.subr.bf16.mxu1 %v4224_v57 }
 0x814   :  { %1979 = vmatpush1.bf16.msra.mxu0 %v4225_v60  ;;  %2020 = vmatpush1.bf16.msra.mxu1 %v4226_v27 }
 0x815   :  { %1980 = vmatprep.subr.bf16.mxu0 %v3616_v61  ;;  %2021 = vmatprep.subr.bf16.mxu1 %v3622_v16 }
 0x818   :  { %1981 = vmatpush1.bf16.msra.mxu0 %v3628_v12  ;;  %2022 = vmatpush1.bf16.msra.mxu1 %v3634_v29 }
 0x819   :  { %2324 = vmatprep.subr.bf16.mxu0 %v4274_v39 }
 0x81b   :  { %1999 = vmatmul.mubr.bf16.vlgmr.msra.gmra.mxu0 %v1964_v38  ;;  %2040 = vmatmul.mubr.bf16.vlgmr.msra.gmra.mxu1 %v1964_v38 }
 0x81c   :  { %2325 = vmatpush3.bf16.msra.mxu0 %v2455_v40  ;;  %2340 = vmatprep.mubr.msk.bf16.mxu0 %vm2704_vm1, %v4274_v39 }
 0x81d   :  { %2326 = vmatprep.subr.bf16.mxu0 %v4274_v39 }
 0x820   :  { %2327 = vmatpush3.bf16.msra.mxu0 %v2456_v41 }
 0x821   :  { %2328 = vmatprep.subr.bf16.mxu0 %v4274_v39 }
 0x824   :  { %2329 = vmatpush3.bf16.msra.mxu0 %v2457_v10 }
 0x825   :  { %2330 = vmatprep.subr.bf16.mxu0 %v4274_v39 }
 0x828   :  { %2331 = vmatpush3.bf16.msra.mxu0 %v2458_v2 }
 0x829   :  { %2332 = vmatprep.subr.bf16.mxu0 %v4274_v39 }
 0x82c   :  { %2333 = vmatpush3.bf16.msra.mxu0 %v2459_v9 }
 0x82d   :  { %2334 = vmatprep.subr.bf16.mxu0 %v4274_v39 }
 0x830   :  { %2335 = vmatpush3.bf16.msra.mxu0 %v2460_v11 }
 0x831   :  { %2336 = vmatprep.subr.bf16.mxu0 %v4274_v39 }
 0x834   :  { %2337 = vmatpush3.bf16.msra.mxu0 %v2461_v5 }
 0x835   :  { %2338 = vmatprep.subr.bf16.mxu0 %v4274_v39 }
 0x838   :  { %2339 = vmatpush3.bf16.msra.mxu0 %v2462_v7 }
 0x8bb   :  { %v1913_v13 = vpop.f32.mrf.mxu0  ;;  %v1954_v26 = vpop.f32.mrf.mxu1 }
 0x8bd   :  { %v1915_v6 = vpop.f32.mrf.mxu0  ;;  %v1956_v61 = vpop.f32.mrf.mxu1 }
 0x8bf   :  { %v1917_v34 = vpop.f32.mrf.mxu0  ;;  %v1958_v16 = vpop.f32.mrf.mxu1 }
 0x8c1   :  { %v1918_v12 = vpop.f32.mrf.mxu0  ;;  %v1959_v29 = vpop.f32.mrf.mxu1 }
 0x8db   :  { %v2000_v55 = vpop.f32.mrf.mxu0  ;;  %v2041_v3 = vpop.f32.mrf.mxu1 }
 0x8dc   :  { %v2001_v25 = vadd.f32 %v2000_v55, %v1913_v13  ;;  %v2042_v52 = vadd.f32 %v2041_v3, %v1954_v26 }
 0x8dd   :  { %v2002_v58 = vpop.f32.mrf.mxu0  ;;  %v2043_v32 = vpop.f32.mrf.mxu1 }
 0x8de   :  { %v2048_v8 = vadd.f32 %v2001_v25, %v3094_v31  ;;  %v2003_v59 = vadd.f32 %v2002_v58, %v1915_v6  ;;  %v2044_v54 = vadd.f32 %v2043_v32, %v1956_v61  ;;  %v2050_v43 = vadd.f32 %v2042_v52, %v3103_v22 }
 0x8df   :  { %v2004_v57 = vpop.f32.mrf.mxu0  ;;  %v2045_v60 = vpop.f32.mrf.mxu1 }
 0x8e0   :  { %v2303_v27 = vmul.f32 -1.442695, %v2048_v8  ;;  %v2049_v18 = vadd.f32 %v2003_v59, %v3096_v21  ;;  %v2051_v23 = vadd.f32 %v2044_v54, %v3100_v35 }
 0x8e1   :  { %v2005_v46 = vpop.f32.mrf.mxu0  ;;  %v2046_v36 = vpop.f32.mrf.mxu1 }
 0x8e2   :  { %2575 = vpow2.f32 %v2303_v27  ;;  %v2304_v20 = vmul.f32 -1.442695, %v2049_v18  ;;  %v2305_v28 = vmul.f32 -1.442695, %v2051_v23 }
 0x8e4   :  { %2577 = vpow2.f32 %v2304_v20 }
 0x8e5   :  { %2579 = vpow2.f32 %v2305_v28 }
 0x8ef   :  { %v2576_v42 = vpop.eup %2575 }
 0x8f0   :  { %v2055_v31 = vadd.f32 1.0, %v2576_v42 }
 0x8f1   :  { %v2578_v0 = vpop.eup %2577 }
 0x8f2   :  { %2581 = vrcp.f32 %v2055_v31  ;;  %v2061_v50 = vadd.f32 1.0, %v2578_v0  ;;  %v2580_v21 = vpop.eup %2579 }
 0x8f3   :  { %2583 = vtanh.f32 %v2050_v43  ;;  %v2068_v44 = vadd.f32 1.0, %v2580_v21 }
 0x8f4   :  { %2585 = vrcp.f32 %v2061_v50 }
 0x8f5   :  { %2587 = vrcp.f32 %v2068_v44 }
 0x8ff   :  { %v2582_v48 = vpop.eup %2581 }
 0x900   :  { %v2584_v47 = vpop.eup %2583 }
 0x901   :  { %v2586_v49 = vpop.eup %2585  ;;  %v2072_v30 = vmul.f32 %v2584_v47, %v2582_v48 }
 0x902   :  { %v2071_v35 = vmul.f32 %v2586_v49, %v3852_v1  ;;  %v2588_v22 = vpop.eup %2587 }
 0x904   :  { %v2073_v51 = vadd.f32 %v2072_v30, %v2071_v35 }
 0x906   :  { %2077 = vst [vmem:[#allocation3] sm:$0x3] %v2073_v51  ;;  %2589 = vtanh.f32 %v2073_v51 }
 0x913   :  { %v2590_v17 = vpop.eup %2589 }
 0x914   :  { %v2075_v15 = vmul.f32 %v2590_v17, %v2588_v22 }
 0x916   :  { %2076 = vst [vmem:[#allocation2] sm:$0x3] %v2075_v15  ;;  %v2081_v14 = vpack.c.bf16 %v2075_v15, %v2075_v15 }
 0x918   :  { %2341 = vmatmul.mubr.bf16.vlgmr.msra.gmra.mxu0 %v2081_v14 }
 0x9d8   :  { %v2187_v45 = vpop.f32.mrf.mxu0 }
 0x9d9   :  { %v2188_v33 = vadd.f32 %v2306_v62, %v2187_v45 }
 0x9da   :  { %v2342_v1 = vpop.f32.mrf.mxu0 }
 0x9db   :  { %2194 = vst.msk [vmem:[#allocation7] sm:$0x3] %vm2193_vm2, %v2188_v33 }
 0x9dc   :  { %v2190_v24 = vpop.f32.mrf.mxu0 }
 0x9dd   :  { %2686 = shalt.err (!%p2683_p9)
}
 0x9de   :  { %2204 = dma.vmem_to_hbm [thread:$0]  %s2202_s11, 32, %s3942_s6, [#allocation6]   ;;  %v2343_v37 = vpop.f32.mrf.mxu0 }
 0x9df   :  { %2697 = dma.done.wait [#allocation6], 32  }
 0x9e0   :  { %2698 = vsyncadd [#allocation6], 4294967264 }
 0x9e1   :  { %2208 = vsyncpa [#allocation5], 1 }
 0x9e2   :  { %2209 = vsyncpa [#allocation6], 1 }

// kernel: lstm_forward.2
= control target key start
LH: loop header
LB: loop body
LE: loop exit
PB: predicated region body
PF: predicated region fallthrough
CT: control target
= control target key end

     0   :  { %9 = vsyncpa [#allocation5], 0  ;;  %s5450_s0 = inlined_call_operand.vmem [shape: bf16[2,8,16], index: 0, kind: input, shape index: {}]   ;;  %s5451_s1 = inlined_call_operand.hbm [shape: bf16[16,512], index: 1, kind: input, shape index: {}]   ;;  %s5452_s2 = inlined_call_operand.hbm [shape: bf16[128,512], index: 2, kind: input, shape index: {}]   ;;  %s5453_s3 = inlined_call_operand.hbm [shape: f32[1,512], index: 3, kind: input, shape index: {}]   ;;  %s5454_s4 = inlined_call_operand.vmem [shape: bf16[2,8,128], index: 4, kind: output, shape index: {}]  }
   0x1   :  { %10 = vsyncpa [#allocation7], 0  ;;  %s4583_s15 = smov [#allocation6]   ;;  %s4584_s17 = smov [#allocation4]  }
   0x2   :  { %s30_s16 = sshll.u32 %s4583_s15, 4  ;;  %s18_s18 = sshll.u32 %s4584_s17, 4  ;;  %s31_s16 = int_to_ptr.vmem [resolvable:$true] %s30_s16  ;;  %s19_s18 = int_to_ptr.vmem [resolvable:$true] %s18_s18 }
   0x3   :  { %s4527_s19 = scalar_lea.vmem %s31_s16, 4096  ;;  %p4532_p1 = scmp.lt.s32.totalorder %s31_s16, %s31_s16 }
   0x4   :  { %p4528_p0 = scmp.ne.s32.totalorder %s31_s16, %s4527_s19  ;;  %p4533_p2 = scmp.lt.s32.totalorder %s4527_s19, %s4527_s19 }
   0x6   :  { %p4534_p3 = por %p4533_p2, %p4532_p1 }
   0x8   :  { %p4535_p4 = pnand %p4534_p3, %p4528_p0 }
   0xa   :  { %4538 = shalt.err (!%p4535_p4)
}
   0xb   :  { %s4585_s20 = smov 256   ;;  %s4586_s21 = smov 16  }
   0xc   :  { %36 = dma.hbm_to_vmem [thread:$0]  %s5452_s2, 4096, %s31_s16, [#allocation7], %s4585_s20, %s4585_s20, %s4586_s21  }
   0xd   :  { %s4547_s24 = scalar_lea.vmem %s19_s18, 512  ;;  %p4552_p6 = scmp.lt.s32.totalorder %s19_s18, %s19_s18 }
   0xe   :  { %p4548_p5 = scmp.ne.s32.totalorder %s19_s18, %s4547_s24  ;;  %p4553_p7 = scmp.lt.s32.totalorder %s4547_s24, %s4547_s24 }
  0x10   :  { %p4554_p8 = por %p4553_p7, %p4552_p6 }
  0x12   :  { %p4555_p9 = pnand %p4554_p8, %p4548_p5 }
  0x14   :  { %4558 = shalt.err (!%p4555_p9)
}
  0x15   :  { %24 = dma.hbm_to_vmem [thread:$0]  %s5451_s1, 512, %s19_s18, [#allocation5], %s4585_s20, %s4585_s20, %s4586_s21  }
  0x16   :  { %s4587_s27 = smov [#allocation8]  }
  0x17   :  { %s43_s28 = sshll.u32 %s4587_s27, 4  ;;  %s44_s28 = int_to_ptr.vmem [resolvable:$true] %s43_s28 }
  0x18   :  { %s4567_s29 = scalar_lea.vmem %s44_s28, 64  ;;  %p4572_p11 = scmp.lt.s32.totalorder %s44_s28, %s44_s28 }
  0x19   :  { %p4568_p10 = scmp.ne.s32.totalorder %s44_s28, %s4567_s29  ;;  %p4573_p12 = scmp.lt.s32.totalorder %s4567_s29, %s4567_s29 }
  0x1b   :  { %p4574_p13 = por %p4573_p12, %p4572_p11 }
  0x1d   :  { %p4575_p0 = pnand %p4574_p13, %p4568_p10 }
  0x1f   :  { %4578 = shalt.err (!%p4575_p0)
}
  0x20   :  { %46 = dma.hbm_to_vmem [thread:$0]  %s5453_s3, 64, %s44_s28, [#allocation7]  }
  0x21   :  { %4579 = dma.done.wait [#allocation5], 512  }
  0x22   :  { %4580 = vsyncadd [#allocation5], 4294966784 }
  0x23   :  { %4581 = dma.done.wait [#allocation7], 4160  }
  0x24   :  { %4582 = vsyncadd [#allocation7], 4294963136  ;;  %v5455_v0 = vmov 0   ;;  %v4589_v1 = vmov 0.0   ;;  %v4628_v2 = vld [vmem:[#allocation6 + $0xe4] ss:$16 sps:$4 sm:$0xff]   ;;  %v466_v47 = vlaneseq }
  0x25   :  { %297 = vmatprep.mubr.bf16.mxu0 %v5455_v0  ;;  %61 = vst [vmem:[#allocation2] sm:$0x3] %v4589_v1  ;;  %62 = vst [vmem:[#allocation3] sm:$0x3] %v4589_v1  ;;  %338 = vmatprep.mubr.bf16.mxu1 %v5455_v0  ;;  %v4630_v3 = vld [vmem:[#allocation6 + $0xe0] ss:$16 sps:$4 sm:$0xff]  }
  0x26   :  { %265 = vmatprep.subr.bf16.mxu0 %v4628_v2  ;;  %v4633_v4 = vld [vmem:[#allocation6 + $0xc4] ss:$16 sps:$4 sm:$0xff]   ;;  %v4636_v5 = vld [vmem:[#allocation6 + $0xc0] ss:$16 sps:$4 sm:$0xff]   ;;  %v4641_v7 = vld [vmem:[#allocation6 + $0xec] ss:$16 sps:$4 sm:$0xff]  }
  0x27   :  { %266 = vmatpush1.bf16.msra.mxu0 %v4630_v3  ;;  %v4638_v6 = vld [vmem:[#allocation6 + $0xa4] ss:$16 sps:$4 sm:$0xff]   ;;  %v4643_v8 = vld [vmem:[#allocation6 + $0xe8] ss:$16 sps:$4 sm:$0xff]   ;;  %v4645_v9 = vld [vmem:[#allocation6 + $0xa0] ss:$16 sps:$4 sm:$0xff]   ;;  %306 = vmatprep.subr.bf16.mxu1 %v4641_v7 }
  0x28   :  { %267 = vmatprep.subr.bf16.mxu0 %v4633_v4  ;;  %307 = vmatpush1.bf16.msra.mxu1 %v4643_v8  ;;  %v4650_v10 = vld [vmem:[#allocation6 + $0xcc] ss:$16 sps:$4 sm:$0xff]   ;;  %v4652_v11 = vld [vmem:[#allocation6 + $0xc8] ss:$16 sps:$4 sm:$0xff]   ;;  %v4655_v12 = vld [vmem:[#allocation6 + $0x84] ss:$16 sps:$4 sm:$0xff]  }
  0x29   :  { %308 = vmatprep.subr.bf16.mxu1 %v4650_v10  ;;  %v4658_v13 = vld [vmem:[#allocation6 + $0x80] ss:$16 sps:$4 sm:$0xff]   ;;  %v4660_v14 = vld [vmem:[#allocation6 + $0xac] ss:$16 sps:$4 sm:$0xff]   ;;  %v4664_v15 = vld [vmem:[#allocation6 + $0x64] ss:$16 sps:$4 sm:$0xff]  }
  0x2a   :  { %v4666_v16 = vld [vmem:[#allocation6 + $0xa8] ss:$16 sps:$4 sm:$0xff]   ;;  %v4670_v17 = vld [vmem:[#allocation6 + $0x8c] ss:$16 sps:$4 sm:$0xff]   ;;  %v4672_v18 = vld [vmem:[#allocation6 + $0x60] ss:$16 sps:$4 sm:$0xff]  }
  0x2b   :  { %268 = vmatpush1.bf16.msra.mxu0 %v4636_v5  ;;  %v4676_v19 = vld [vmem:[#allocation6 + $0x44] ss:$16 sps:$4 sm:$0xff]   ;;  %v4678_v20 = vld [vmem:[#allocation6 + $0x88] ss:$16 sps:$4 sm:$0xff]   ;;  %v4682_v21 = vld [vmem:[#allocation6 + $0x6c] ss:$16 sps:$4 sm:$0xff]  }
  0x2c   :  { %269 = vmatprep.subr.bf16.mxu0 %v4638_v6  ;;  %309 = vmatpush1.bf16.msra.mxu1 %v4652_v11  ;;  %v4684_v22 = vld [vmem:[#allocation6 + $0x40] ss:$16 sps:$4 sm:$0xff]   ;;  %v4686_v23 = vld [vmem:[#allocation6 + $0x24] ss:$16 sps:$4 sm:$0xff]   ;;  %v4690_v24 = vld [vmem:[#allocation6 + $0x68] ss:$16 sps:$4 sm:$0xff]  }
  0x2d   :  { %310 = vmatprep.subr.bf16.mxu1 %v4660_v14  ;;  %v4694_v25 = vld [vmem:[#allocation6 + $0x4c] ss:$16 sps:$4 sm:$0xff]   ;;  %v4696_v26 = vld [vmem:[#allocation6 + $0x20] ss:$16 sps:$4 sm:$0xff]   ;;  %v4698_v27 = vld [vmem:[#allocation6 + $0x4] ss:$16 sps:$4 sm:$0xff]  }
  0x2e   :  { %v4700_v28 = vld [vmem:[#allocation6 + $0x48] ss:$16 sps:$4 sm:$0xff]   ;;  %v4706_v29 = vld [vmem:[#allocation6 + $0x2c] ss:$16 sps:$4 sm:$0xff]   ;;  %v4711_v31 = vld [vmem:[#allocation6] ss:$16 sps:$4 sm:$0xff]  }
  0x2f   :  { %270 = vmatpush1.bf16.msra.mxu0 %v4645_v9  ;;  %v4265_v30 = vld [vmem:[%s5450_s0 + $0x4] ss:$0 sps:$4 sm:$0x11]   ;;  %v64_v32 = vld [vmem:[#allocation2] sm:$0x3]  ;;  %vm356_vm0 = vcmask 1041409  }
  0x30   :  { %271 = vmatprep.subr.bf16.mxu0 %v4655_v12  ;;  %311 = vmatpush1.bf16.msra.mxu1 %v4666_v16  ;;  %v4713_v33 = vld [vmem:[#allocation6 + $0x28] ss:$16 sps:$4 sm:$0xff]   ;;  %v4264_v34 = vld [vmem:[%s5450_s0] ss:$0 sps:$4 sm:$0x11]   ;;  %v354_v37 = vunpack.c.l.b16 %v4265_v30  ;;  %v72_v40 = vpack.c.bf16 %v64_v32, %v64_v32  ;;  %vm379_vm1 = vcmask 130048  }
  0x31   :  { %312 = vmatprep.subr.bf16.mxu1 %v4670_v17  ;;  %v4718_v35 = vld [vmem:[#allocation4 + $0x4] ss:$16 sps:$4 sm:$0xff]   ;;  %v4720_v36 = vld [vmem:[#allocation6 + $0xc] ss:$16 sps:$4 sm:$0xff]   ;;  %v4726_v38 = vld [vmem:[#allocation4] ss:$16 sps:$4 sm:$0xff]   ;;  %v353_v42 = vunpack.c.l.b16 %v4264_v34 }
  0x32   :  { %v4728_v39 = vld [vmem:[#allocation6 + $0x8] ss:$16 sps:$4 sm:$0xff]   ;;  %v4730_v41 = vld [vmem:[#allocation4 + $0xc] ss:$16 sps:$4 sm:$0xff]   ;;  %v355_v43 = vrot.slane %v354_v37, 7  ;;  %v4783_v48 = vshrl.u32 %v466_v47, 7 }
  0x33   :  { %272 = vmatpush1.bf16.msra.mxu0 %v4658_v13  ;;  %v4736_v44 = vld [vmem:[#allocation4 + $0x8] ss:$16 sps:$4 sm:$0xff]   ;;  %v63_v53 = vld [vmem:[#allocation8] sm:$0xf]  ;;  %vm550_vm2 = vcmask 1040384   ;;  %vm2427_vm11 = vcmask 1042434  }
  0x34   :  { %273 = vmatprep.subr.bf16.mxu0 %v4664_v15  ;;  %313 = vmatpush1.bf16.msra.mxu1 %v4678_v20  ;;  %v357_v45 = vsel %vm356_vm0, %v355_v43, %v353_v42  ;;  %v468_v51 = vsub.s32 0, %v4783_v48  ;;  %v472_v55 = vsub.s32 1, %v4783_v48  ;;  %vm551_vm3 = vsmask.f32 256 }
  0x35   :  { %314 = vmatprep.subr.bf16.mxu1 %v4682_v21  ;;  %v358_v46 = vpack.c.b16 %v357_v45, %v357_v45  ;;  %vm552_vm4 = vmand %vm550_vm2, %vm551_vm3  ;;  %vm1019_vm5 = vsmask.f32 7938  ;;  %vm1489_vm7 = vsmask.f32 1280  ;;  %vm1958_vm9 = vsmask.f32 7942 }
  0x36   :  { %v4787_v58 = vrot.slane %v63_v53, %v468_v51  ;;  %v4789_v62 = vrot.slane %v63_v53, %v472_v55  ;;  %vm1020_vm6 = vmand %vm550_vm2, %vm1019_vm5  ;;  %vm2428_vm12 = vsmask.f32 2304  ;;  %vm2897_vm14 = vsmask.f32 7946 }
  0x37   :  { %274 = vmatpush1.bf16.msra.mxu0 %v4672_v18  ;;  %vm1490_vm8 = vmand %vm356_vm0, %vm1489_vm7  ;;  %vm3366_vm2 = vcmask 1043459   ;;  %vm3367_vm3 = vsmask.f32 3328 }
  0x38   :  { %275 = vmatprep.subr.bf16.mxu0 %v4676_v19  ;;  %315 = vmatpush1.bf16.msra.mxu1 %v4690_v24  ;;  %vm1959_vm10 = vmand %vm356_vm0, %vm1958_vm9 }
  0x39   :  { %316 = vmatprep.subr.bf16.mxu1 %v4694_v25  ;;  %vm2429_vm13 = vmand %vm2427_vm11, %vm2428_vm12 }
  0x3a   :  { %vm2898_vm15 = vmand %vm2427_vm11, %vm2897_vm14 }
  0x3b   :  { %276 = vmatpush1.bf16.msra.mxu0 %v4684_v22 }
  0x3c   :  { %277 = vmatprep.subr.bf16.mxu0 %v4686_v23  ;;  %317 = vmatpush1.bf16.msra.mxu1 %v4700_v28 }
  0x3d   :  { %318 = vmatprep.subr.bf16.mxu1 %v4706_v29 }
  0x3f   :  { %278 = vmatpush1.bf16.msra.mxu0 %v4696_v26 }
  0x40   :  { %279 = vmatprep.subr.bf16.mxu0 %v4698_v27  ;;  %319 = vmatpush1.bf16.msra.mxu1 %v4713_v33 }
  0x41   :  { %320 = vmatprep.subr.bf16.mxu1 %v4720_v36 }
  0x43   :  { %280 = vmatpush1.bf16.msra.mxu0 %v4711_v31 }
  0x44   :  { %397 = vmatprep.subr.bf16.mxu0 %v4718_v35  ;;  %321 = vmatpush1.bf16.msra.mxu1 %v4728_v39 }
  0x45   :  { %438 = vmatprep.subr.bf16.mxu1 %v4730_v41 }
  0x46   :  { %298 = vmatmul.mubr.bf16.vlgmr.msra.gmra.mxu0 %v72_v40 }
  0x47   :  { %398 = vmatpush1.bf16.msra.mxu0 %v4726_v38  ;;  %415 = vmatprep.mubr.bf16.mxu0 %v5455_v0 }
  0x48   :  { %757 = vmatprep.subr.bf16.mxu0 %v4628_v2  ;;  %339 = vmatmul.mubr.bf16.vlgmr.msra.gmra.mxu1 %v72_v40 }
  0x49   :  { %439 = vmatpush1.bf16.msra.mxu1 %v4736_v44  ;;  %456 = vmatprep.mubr.bf16.mxu1 %v5455_v0 }
  0x4a   :  { %798 = vmatprep.subr.bf16.mxu1 %v4641_v7 }
  0x4e   :  { %3890 = vmatmul.mubr.msk.bf16.vlgmr.msra.gmra.mxu0 %vm379_vm1, %v358_v46 }
  0x4f   :  { %758 = vmatpush1.bf16.msra.mxu0 %v4630_v3  ;;  %789 = vmatprep.mubr.bf16.mxu0 %v5455_v0 }
  0x50   :  { %759 = vmatprep.subr.bf16.mxu0 %v4633_v4  ;;  %3891 = vmatmul.mubr.msk.bf16.vlgmr.msra.gmra.mxu1 %vm379_vm1, %v358_v46  ;;  %v480_v46 = vsub.s32 3, %v4783_v48 }
  0x51   :  { %799 = vmatpush1.bf16.msra.mxu1 %v4643_v8  ;;  %830 = vmatprep.mubr.bf16.mxu1 %v5455_v0 }
  0x52   :  { %800 = vmatprep.subr.bf16.mxu1 %v4650_v10 }
  0x53   :  { %760 = vmatpush1.bf16.msra.mxu0 %v4636_v5 }
  0x54   :  { %761 = vmatprep.subr.bf16.mxu0 %v4638_v6 }
  0x55   :  { %801 = vmatpush1.bf16.msra.mxu1 %v4652_v11 }
  0x56   :  { %802 = vmatprep.subr.bf16.mxu1 %v4660_v14 }
  0x57   :  { %762 = vmatpush1.bf16.msra.mxu0 %v4645_v9 }
  0x58   :  { %763 = vmatprep.subr.bf16.mxu0 %v4655_v12 }
  0x59   :  { %803 = vmatpush1.bf16.msra.mxu1 %v4666_v16 }
  0x5a   :  { %804 = vmatprep.subr.bf16.mxu1 %v4670_v17 }
  0x5b   :  { %764 = vmatpush1.bf16.msra.mxu0 %v4658_v13 }
  0x5c   :  { %765 = vmatprep.subr.bf16.mxu0 %v4664_v15 }
  0x5d   :  { %805 = vmatpush1.bf16.msra.mxu1 %v4678_v20 }
  0x5e   :  { %806 = vmatprep.subr.bf16.mxu1 %v4682_v21 }
  0x5f   :  { %766 = vmatpush1.bf16.msra.mxu0 %v4672_v18 }
  0x60   :  { %767 = vmatprep.subr.bf16.mxu0 %v4676_v19 }
  0x61   :  { %807 = vmatpush1.bf16.msra.mxu1 %v4690_v24 }
  0x62   :  { %808 = vmatprep.subr.bf16.mxu1 %v4694_v25 }
  0x63   :  { %768 = vmatpush1.bf16.msra.mxu0 %v4684_v22 }
  0x64   :  { %769 = vmatprep.subr.bf16.mxu0 %v4686_v23 }
  0x65   :  { %809 = vmatpush1.bf16.msra.mxu1 %v4700_v28 }
  0x66   :  { %810 = vmatprep.subr.bf16.mxu1 %v4706_v29 }
  0x67   :  { %770 = vmatpush1.bf16.msra.mxu0 %v4696_v26 }
  0x68   :  { %771 = vmatprep.subr.bf16.mxu0 %v4698_v27 }
  0x69   :  { %811 = vmatpush1.bf16.msra.mxu1 %v4713_v33 }
  0x6a   :  { %812 = vmatprep.subr.bf16.mxu1 %v4720_v36 }
  0x6b   :  { %772 = vmatpush1.bf16.msra.mxu0 %v4711_v31 }
  0x6c   :  { %887 = vmatprep.subr.bf16.mxu0 %v4718_v35 }
  0x6d   :  { %813 = vmatpush1.bf16.msra.mxu1 %v4728_v39 }
  0x6e   :  { %928 = vmatprep.subr.bf16.mxu1 %v4730_v41 }
 0x106   :  { %v299_v49 = vpop.f32.mrf.mxu0 }
 0x108   :  { %v301_v50 = vpop.f32.mrf.mxu0  ;;  %v340_v54 = vpop.f32.mrf.mxu1 }
 0x10a   :  { %v303_v52 = vpop.f32.mrf.mxu0  ;;  %v342_v57 = vpop.f32.mrf.mxu1 }
 0x10b   :  { %v4794_v52 = vrot.slane %v63_v53, %v480_v46 }
 0x10c   :  { %v304_v56 = vpop.f32.mrf.mxu0  ;;  %v344_v60 = vpop.f32.mrf.mxu1 }
 0x10d   :  { %v476_v56 = vsub.s32 2, %v4783_v48 }
 0x10e   :  { %v417_v59 = vpop.f32.mrf.mxu0  ;;  %v345_v1 = vpop.f32.mrf.mxu1 }
 0x10f   :  { %v418_v61 = vadd.f32 %v417_v59, %v299_v49  ;;  %v4798_v60 = vrot.slane %v63_v53, %v476_v56  ;;  %v4270_v56 = vld [vmem:[%s5450_s0 + $0x4] ss:$0 sps:$4 sm:$0x11]  }
 0x110   :  { %v419_v63 = vpop.f32.mrf.mxu0  ;;  %v458_v37 = vpop.f32.mrf.mxu1 }
 0x111   :  { %v486_v30 = vadd.f32 %v4787_v58, %v418_v61  ;;  %v420_v32 = vadd.f32 %v419_v63, %v301_v50  ;;  %v459_v59 = vadd.f32 %v458_v37, %v340_v54 }
 0x112   :  { %v421_v34 = vpop.f32.mrf.mxu0  ;;  %v460_v45 = vpop.f32.mrf.mxu1 }
 0x113   :  { %v3892_v40 = vmul.f32 -1.442695, %v486_v30  ;;  %v487_v42 = vadd.f32 %v4789_v62, %v420_v32  ;;  %v461_v49 = vadd.f32 %v460_v45, %v342_v57  ;;  %v488_v1 = vadd.f32 %v4798_v60, %v459_v59 }
 0x114   :  { %v422_v43 = vpop.f32.mrf.mxu0  ;;  %v462_v51 = vpop.f32.mrf.mxu1 }
 0x115   :  { %4391 = vpow2.f32 %v3892_v40  ;;  %v3893_v47 = vmul.f32 -1.442695, %v487_v42  ;;  %v489_v50 = vadd.f32 %v4794_v52, %v461_v49  ;;  %v65_v42 = vld [vmem:[#allocation3] sm:$0x3] }
 0x116   :  { %v463_v55 = vpop.f32.mrf.mxu1  ;;  %v4269_v49 = vld [vmem:[%s5450_s0] ss:$0 sps:$4 sm:$0x11]  }
 0x117   :  { %4393 = vpow2.f32 %v3893_v47  ;;  %v3894_v61 = vmul.f32 -1.442695, %v489_v50  ;;  %v4590_v47 = vmov 1966171168   ;;  %v845_v50 = vunpack.c.l.b16 %v4269_v49 }
 0x118   :  { %v517_v51 = vunpack.c.l.s4 %v4590_v47 }
 0x119   :  { %4395 = vpow2.f32 %v3894_v61  ;;  %v4591_v61 = vmov 286326784  }
 0x11a   :  { %v518_v55 = vunpack.c.0.s8 %v517_v51 }
 0x122   :  { %v4392_v63 = vpop.eup %4391 }
 0x123   :  { %v493_v30 = vadd.f32 1.0, %v4392_v63  ;;  %v535_v63 = vunpack.c.l.s4 %v4591_v61 }
 0x124   :  { %v4394_v32 = vpop.eup %4393 }
 0x125   :  { %4397 = vrcp.f32 %v493_v30  ;;  %v499_v34 = vadd.f32 1.0, %v4394_v32  ;;  %v4811_v30 = vsub.s32 %v518_v55, %v4783_v48 }
 0x126   :  { %4399 = vtanh.f32 %v488_v1  ;;  %v4396_v57 = vpop.eup %4395 }
 0x127   :  { %4401 = vrcp.f32 %v499_v34  ;;  %v506_v46 = vadd.f32 1.0, %v4396_v57  ;;  %v846_v34 = vunpack.c.l.b16 %v4270_v56  ;;  %v847_v57 = vrot.slane %v845_v50, 1  ;;  %v556_v56 = vld [vmem:[%s5454_s4 + $0x4] sm:$0x1] }
 0x129   :  { %4403 = vrcp.f32 %v506_v46 }
 0x132   :  { %v4398_v40 = vpop.eup %4397 }
 0x133   :  { %v4400_v43 = vpop.eup %4399 }
 0x134   :  { %v4402_v45 = vpop.eup %4401  ;;  %v510_v53 = vmul.f32 %v4400_v43, %v4398_v40  ;;  %v536_v40 = vunpack.c.0.s8 %v535_v63 }
 0x135   :  { %v509_v54 = vmul.f32 %v4402_v45, %v65_v42  ;;  %v848_v45 = vsel %vm356_vm0, %v846_v34, %v847_v57 }
 0x136   :  { %v4404_v59 = vpop.eup %4403  ;;  %v4818_v46 = vsub.s32 %v536_v40, %v4783_v48  ;;  %v849_v51 = vpack.c.b16 %v848_v45, %v848_v45  ;;  %v553_v48 = vld [vmem:[%s5454_s4] sm:$0x1] }
 0x137   :  { %v4801_v37 = vadd.f32 %v510_v53, %v509_v54  ;;  %v4271_v40 = vld [vmem:[%s5450_s0] ss:$0 sps:$4 sm:$0x22]  }
 0x139   :  { %4405 = vtanh.f32 %v4801_v37 }
 0x146   :  { %v4406_v1 = vpop.eup %4405 }
 0x147   :  { %v513_v32 = vmul.f32 %v4406_v1, %v4404_v59 }
 0x149   :  { %v514_v42 = vpack.c.bf16 %v513_v32, %v513_v32 }
 0x14b   :  { %v522_v43 = vrot.slane %v514_v42, %v4811_v30  ;;  %790 = vmatmul.mubr.bf16.vlgmr.msra.gmra.mxu0 %v514_v42  ;;  %831 = vmatmul.mubr.bf16.vlgmr.msra.gmra.mxu1 %v514_v42  ;;  %v4272_v42 = vld [vmem:[%s5450_s0 + $0x4] ss:$0 sps:$4 sm:$0x22]  }
 0x14c   :  { %888 = vmatpush1.bf16.msra.mxu0 %v4726_v38  ;;  %929 = vmatpush1.bf16.msra.mxu1 %v4736_v44  ;;  %v1314_v45 = vunpack.c.l.b16 %v4272_v42 }
 0x14d   :  { %v529_v54 = vrot.slane %v522_v43, %v4811_v30  ;;  %905 = vmatprep.mubr.bf16.mxu0 %v5455_v0  ;;  %946 = vmatprep.mubr.bf16.mxu1 %v5455_v0  ;;  %v1313_v43 = vunpack.c.l.b16 %v4271_v40  ;;  %v5014_v40 = vld [vmem:[#allocation4 + $0xc] ss:$16 sps:$4 sm:$0xff]  }
 0x14e   :  { %1225 = vmatprep.subr.bf16.mxu0 %v4628_v2  ;;  %1266 = vmatprep.subr.bf16.mxu1 %v4641_v7  ;;  %5458 = vst [vmem:[#allocation11_spill] sm:$0xff] %v5014_v40 }
 0x14f   :  { %v531_v53 = vunpack.i.h.s16 %v529_v54  ;;  %v3895_v47 = vpack.i.b16 %v529_v54, %v529_v54 }
 0x151   :  { %v533_v49 = vpack.i.b16 %v531_v53, %v531_v53  ;;  %v540_v55 = vrot.slane %v3895_v47, %v4818_v46 }
 0x153   :  { %v547_v2 = vrot.slane %v533_v49, %v4818_v46  ;;  %v554_v50 = vsel %vm552_vm4, %v540_v55, %v553_v48  ;;  %3934 = vmatmul.mubr.msk.bf16.vlgmr.msra.gmra.mxu0 %vm379_vm1, %v849_v51  ;;  %3935 = vmatmul.mubr.msk.bf16.vlgmr.msra.gmra.mxu1 %vm379_vm1, %v849_v51  ;;  %v1315_v51 = vrot.slane %v1313_v43, 2 }
 0x154   :  { %555 = vst [vmem:[%s5454_s4] sm:$0x1] %v554_v50  ;;  %1226 = vmatpush1.bf16.msra.mxu0 %v4630_v3  ;;  %1267 = vmatpush1.bf16.msra.mxu1 %v4643_v8 }
 0x155   :  { %v557_v7 = vsel %vm552_vm4, %v547_v2, %v556_v56  ;;  %1227 = vmatprep.subr.bf16.mxu0 %v4633_v4  ;;  %1268 = vmatprep.subr.bf16.mxu1 %v4650_v10  ;;  %vm3368_vm4 = vmand %vm3366_vm2, %vm3367_vm3 }
 0x156   :  { %558 = vst [vmem:[%s5454_s4 + $0x4] sm:$0x1] %v557_v7  ;;  %1257 = vmatprep.mubr.bf16.mxu0 %v5455_v0  ;;  %1298 = vmatprep.mubr.bf16.mxu1 %v5455_v0 }
 0x158   :  { %1228 = vmatpush1.bf16.msra.mxu0 %v4636_v5  ;;  %1269 = vmatpush1.bf16.msra.mxu1 %v4652_v11 }
 0x159   :  { %1229 = vmatprep.subr.bf16.mxu0 %v4638_v6  ;;  %1270 = vmatprep.subr.bf16.mxu1 %v4660_v14 }
 0x15c   :  { %1230 = vmatpush1.bf16.msra.mxu0 %v4645_v9  ;;  %1271 = vmatpush1.bf16.msra.mxu1 %v4666_v16 }
 0x15d   :  { %1231 = vmatprep.subr.bf16.mxu0 %v4655_v12  ;;  %1272 = vmatprep.subr.bf16.mxu1 %v4670_v17 }
 0x160   :  { %1232 = vmatpush1.bf16.msra.mxu0 %v4658_v13  ;;  %1273 = vmatpush1.bf16.msra.mxu1 %v4678_v20 }
 0x161   :  { %1233 = vmatprep.subr.bf16.mxu0 %v4664_v15  ;;  %1274 = vmatprep.subr.bf16.mxu1 %v4682_v21 }
 0x164   :  { %1234 = vmatpush1.bf16.msra.mxu0 %v4672_v18  ;;  %1275 = vmatpush1.bf16.msra.mxu1 %v4690_v24 }
 0x165   :  { %1235 = vmatprep.subr.bf16.mxu0 %v4676_v19  ;;  %1276 = vmatprep.subr.bf16.mxu1 %v4694_v25 }
 0x168   :  { %1236 = vmatpush1.bf16.msra.mxu0 %v4684_v22  ;;  %1277 = vmatpush1.bf16.msra.mxu1 %v4700_v28 }
 0x169   :  { %1237 = vmatprep.subr.bf16.mxu0 %v4686_v23  ;;  %1278 = vmatprep.subr.bf16.mxu1 %v4706_v29 }
 0x16c   :  { %1238 = vmatpush1.bf16.msra.mxu0 %v4696_v26  ;;  %1279 = vmatpush1.bf16.msra.mxu1 %v4713_v33 }
 0x16d   :  { %1239 = vmatprep.subr.bf16.mxu0 %v4698_v27  ;;  %1280 = vmatprep.subr.bf16.mxu1 %v4720_v36 }
 0x170   :  { %1240 = vmatpush1.bf16.msra.mxu0 %v4711_v31  ;;  %1281 = vmatpush1.bf16.msra.mxu1 %v4728_v39 }
 0x171   :  { %1356 = vmatprep.subr.bf16.mxu0 %v4718_v35  ;;  %1397 = vmatprep.subr.bf16.mxu1 %v4730_v41 }
 0x20b   :  { %v791_v3 = vpop.f32.mrf.mxu0  ;;  %v832_v4 = vpop.f32.mrf.mxu1 }
 0x20d   :  { %v793_v5 = vpop.f32.mrf.mxu0  ;;  %v834_v6 = vpop.f32.mrf.mxu1 }
 0x20f   :  { %v795_v8 = vpop.f32.mrf.mxu0  ;;  %v836_v9 = vpop.f32.mrf.mxu1 }
 0x210   :  { %v4916_v9 = vld [vmem:[#allocation6 + $0xe4] ss:$16 sps:$4 sm:$0xff]  }
 0x211   :  { %v796_v10 = vpop.f32.mrf.mxu0  ;;  %v837_v11 = vpop.f32.mrf.mxu1 }
 0x212   :  { %v4918_v10 = vld [vmem:[#allocation6 + $0xec] ss:$16 sps:$4 sm:$0xff]   ;;  %v4920_v11 = vld [vmem:[#allocation6 + $0xe0] ss:$16 sps:$4 sm:$0xff]  }
 0x213   :  { %v907_v12 = vpop.f32.mrf.mxu0  ;;  %v948_v13 = vpop.f32.mrf.mxu1 }
 0x214   :  { %v908_v14 = vadd.f32 %v907_v12, %v791_v3  ;;  %v949_v28 = vadd.f32 %v948_v13, %v832_v4  ;;  %v4922_v12 = vld [vmem:[#allocation6 + $0xe8] ss:$16 sps:$4 sm:$0xff]   ;;  %v4928_v13 = vld [vmem:[#allocation6 + $0xc4] ss:$16 sps:$4 sm:$0xff]  }
 0x215   :  { %v909_v15 = vpop.f32.mrf.mxu0  ;;  %v950_v16 = vpop.f32.mrf.mxu1 }
 0x216   :  { %v955_v17 = vadd.f32 %v908_v14, %v4787_v58  ;;  %v910_v18 = vadd.f32 %v909_v15, %v793_v5  ;;  %v951_v26 = vadd.f32 %v950_v16, %v834_v6  ;;  %v957_v33 = vadd.f32 %v949_v28, %v4798_v60  ;;  %v1024_v6 = vld [vmem:[%s5454_s4 + $0x4] sm:$0x1]  ;;  %v4930_v14 = vld [vmem:[#allocation6 + $0xcc] ss:$16 sps:$4 sm:$0xff]   ;;  %v4934_v16 = vld [vmem:[#allocation6 + $0xc8] ss:$16 sps:$4 sm:$0xff]  }
 0x217   :  { %v911_v19 = vpop.f32.mrf.mxu0  ;;  %v952_v20 = vpop.f32.mrf.mxu1  ;;  %v4932_v15 = vld [vmem:[#allocation6 + $0xc0] ss:$16 sps:$4 sm:$0xff]   ;;  %v4970_v28 = vld [vmem:[#allocation6 + $0x68] ss:$16 sps:$4 sm:$0xff]  }
 0x218   :  { %v3936_v21 = vmul.f32 -1.442695, %v955_v17  ;;  %v956_v22 = vadd.f32 %v910_v18, %v4789_v62  ;;  %v958_v27 = vadd.f32 %v951_v26, %v4794_v52  ;;  %v4940_v17 = vld [vmem:[#allocation6 + $0xa4] ss:$16 sps:$4 sm:$0xff]   ;;  %v4942_v18 = vld [vmem:[#allocation6 + $0xac] ss:$16 sps:$4 sm:$0xff]  }
 0x219   :  { %v912_v23 = vpop.f32.mrf.mxu0  ;;  %v953_v24 = vpop.f32.mrf.mxu1  ;;  %v4944_v19 = vld [vmem:[#allocation6 + $0xa0] ss:$16 sps:$4 sm:$0xff]   ;;  %v4946_v20 = vld [vmem:[#allocation6 + $0xa8] ss:$16 sps:$4 sm:$0xff]   ;;  %v4964_v26 = vld [vmem:[#allocation6 + $0x6c] ss:$16 sps:$4 sm:$0xff]  }
 0x21a   :  { %4407 = vpow2.f32 %v3936_v21  ;;  %v3937_v25 = vmul.f32 -1.442695, %v956_v22  ;;  %v3938_v29 = vmul.f32 -1.442695, %v958_v27  ;;  %v4952_v21 = vld [vmem:[#allocation6 + $0x84] ss:$16 sps:$4 sm:$0xff]  }
 0x21b   :  { %v4954_v22 = vld [vmem:[#allocation6 + $0x8c] ss:$16 sps:$4 sm:$0xff]   ;;  %v4956_v23 = vld [vmem:[#allocation6 + $0x80] ss:$16 sps:$4 sm:$0xff]   ;;  %v4958_v24 = vld [vmem:[#allocation6 + $0x88] ss:$16 sps:$4 sm:$0xff]  }
 0x21c   :  { %4409 = vpow2.f32 %v3937_v25  ;;  %v4962_v25 = vld [vmem:[#allocation6 + $0x64] ss:$16 sps:$4 sm:$0xff]   ;;  %v4968_v27 = vld [vmem:[#allocation6 + $0x60] ss:$16 sps:$4 sm:$0xff]  }
 0x21d   :  { %4411 = vpow2.f32 %v3938_v29  ;;  %v4974_v29 = vld [vmem:[#allocation6 + $0x44] ss:$16 sps:$4 sm:$0xff]  }
 0x227   :  { %v4408_v31 = vpop.eup %4407 }
 0x228   :  { %v962_v35 = vadd.f32 1.0, %v4408_v31  ;;  %v4976_v31 = vld [vmem:[#allocation6 + $0x4c] ss:$16 sps:$4 sm:$0xff]  }
 0x229   :  { %v4410_v36 = vpop.eup %4409 }
 0x22a   :  { %4413 = vrcp.f32 %v962_v35  ;;  %v968_v39 = vadd.f32 1.0, %v4410_v36  ;;  %v4412_v41 = vpop.eup %4411  ;;  %v4982_v35 = vld [vmem:[#allocation6 + $0x48] ss:$16 sps:$4 sm:$0xff]   ;;  %v4986_v36 = vld [vmem:[#allocation6 + $0x24] ss:$16 sps:$4 sm:$0xff]  }
 0x22b   :  { %4415 = vtanh.f32 %v957_v33  ;;  %v975_v1 = vadd.f32 1.0, %v4412_v41  ;;  %v4980_v33 = vld [vmem:[#allocation6 + $0x40] ss:$16 sps:$4 sm:$0xff]  }
 0x22c   :  { %4417 = vrcp.f32 %v968_v39  ;;  %v4988_v39 = vld [vmem:[#allocation6 + $0x2c] ss:$16 sps:$4 sm:$0xff]   ;;  %v4992_v41 = vld [vmem:[#allocation6 + $0x20] ss:$16 sps:$4 sm:$0xff]  }
 0x22d   :  { %4419 = vrcp.f32 %v975_v1  ;;  %v5004_v1 = vld [vmem:[#allocation6] ss:$16 sps:$4 sm:$0xff]  }
 0x237   :  { %v4414_v59 = vpop.eup %4413 }
 0x238   :  { %v4416_v61 = vpop.eup %4415 }
 0x239   :  { %v4418_v63 = vpop.eup %4417  ;;  %v979_v32 = vmul.f32 %v4416_v61, %v4414_v59  ;;  %v4994_v59 = vld [vmem:[#allocation6 + $0x28] ss:$16 sps:$4 sm:$0xff]   ;;  %v4998_v61 = vld [vmem:[#allocation6 + $0x4] ss:$16 sps:$4 sm:$0xff]  }
 0x23a   :  { %v978_v34 = vmul.f32 %v4418_v63, %v4801_v37  ;;  %v4420_v54 = vpop.eup %4419  ;;  %v1316_v37 = vrot.slane %v1314_v45, 1  ;;  %v5000_v63 = vld [vmem:[#allocation6 + $0xc] ss:$16 sps:$4 sm:$0xff]  }
 0x23c   :  { %v4881_v57 = vadd.f32 %v979_v32, %v978_v34  ;;  %v1317_v55 = vsel %vm356_vm0, %v1316_v37, %v1315_v51  ;;  %v5006_v32 = vld [vmem:[#allocation6 + $0x8] ss:$16 sps:$4 sm:$0xff]   ;;  %v5012_v34 = vld [vmem:[#allocation4 + $0x4] ss:$16 sps:$4 sm:$0xff]  }
 0x23d   :  { %v1318_v7 = vpack.c.b16 %v1317_v55, %v1317_v55 }
 0x23e   :  { %4421 = vtanh.f32 %v4881_v57 }
 0x24b   :  { %v4422_v53 = vpop.eup %4421 }
 0x24c   :  { %v982_v47 = vmul.f32 %v4422_v53, %v4420_v54 }
 0x24e   :  { %v983_v48 = vpack.c.bf16 %v982_v47, %v982_v47 }
 0x250   :  { %v991_v49 = vrot.slane %v983_v48, %v4811_v30  ;;  %1258 = vmatmul.mubr.bf16.vlgmr.msra.gmra.mxu0 %v983_v48  ;;  %1299 = vmatmul.mubr.bf16.vlgmr.msra.gmra.mxu1 %v983_v48 }
 0x251   :  { %1357 = vmatpush1.bf16.msra.mxu0 %v4726_v38  ;;  %1398 = vmatpush1.bf16.msra.mxu1 %v4736_v44  ;;  %v1021_v38 = vld [vmem:[%s5454_s4] sm:$0x1] }
 0x252   :  { %v998_v56 = vrot.slane %v991_v49, %v4811_v30  ;;  %1374 = vmatprep.mubr.bf16.mxu0 %v5455_v0  ;;  %1415 = vmatprep.mubr.bf16.mxu1 %v5455_v0 }
 0x253   :  { %1695 = vmatprep.subr.bf16.mxu0 %v4916_v9  ;;  %1736 = vmatprep.subr.bf16.mxu1 %v4918_v10 }
 0x254   :  { %v1000_v2 = vunpack.i.h.s16 %v998_v56  ;;  %v3939_v50 = vpack.i.b16 %v998_v56, %v998_v56 }
 0x256   :  { %v1002_v3 = vpack.i.b16 %v1000_v2, %v1000_v2  ;;  %v1009_v4 = vrot.slane %v3939_v50, %v4818_v46 }
 0x258   :  { %v1016_v44 = vrot.slane %v1002_v3, %v4818_v46  ;;  %v1022_v5 = vsel %vm1020_vm6, %v1009_v4, %v1021_v38  ;;  %3978 = vmatmul.mubr.msk.bf16.vlgmr.msra.gmra.mxu0 %vm379_vm1, %v1318_v7  ;;  %3979 = vmatmul.mubr.msk.bf16.vlgmr.msra.gmra.mxu1 %vm379_vm1, %v1318_v7 }
 0x259   :  { %1023 = vst [vmem:[%s5454_s4] sm:$0x1] %v1022_v5  ;;  %1727 = vmatprep.mubr.bf16.mxu0 %v5455_v0  ;;  %1768 = vmatprep.mubr.bf16.mxu1 %v5455_v0 }
 0x25a   :  { %v1025_v8 = vsel %vm1020_vm6, %v1016_v44, %v1024_v6  ;;  %1696 = vmatpush1.bf16.msra.mxu0 %v4920_v11  ;;  %1737 = vmatpush1.bf16.msra.mxu1 %v4922_v12 }
 0x25b   :  { %1026 = vst [vmem:[%s5454_s4 + $0x4] sm:$0x1] %v1025_v8  ;;  %1697 = vmatprep.subr.bf16.mxu0 %v4928_v13  ;;  %1738 = vmatprep.subr.bf16.mxu1 %v4930_v14 }
 0x25e   :  { %1698 = vmatpush1.bf16.msra.mxu0 %v4932_v15  ;;  %1739 = vmatpush1.bf16.msra.mxu1 %v4934_v16 }
 0x25f   :  { %1699 = vmatprep.subr.bf16.mxu0 %v4940_v17  ;;  %1740 = vmatprep.subr.bf16.mxu1 %v4942_v18 }
 0x262   :  { %1700 = vmatpush1.bf16.msra.mxu0 %v4944_v19  ;;  %1741 = vmatpush1.bf16.msra.mxu1 %v4946_v20 }
 0x263   :  { %1701 = vmatprep.subr.bf16.mxu0 %v4952_v21  ;;  %1742 = vmatprep.subr.bf16.mxu1 %v4954_v22 }
 0x266   :  { %1702 = vmatpush1.bf16.msra.mxu0 %v4956_v23  ;;  %1743 = vmatpush1.bf16.msra.mxu1 %v4958_v24 }
 0x267   :  { %1703 = vmatprep.subr.bf16.mxu0 %v4962_v25  ;;  %1744 = vmatprep.subr.bf16.mxu1 %v4964_v26 }
 0x26a   :  { %1704 = vmatpush1.bf16.msra.mxu0 %v4968_v27  ;;  %1745 = vmatpush1.bf16.msra.mxu1 %v4970_v28 }
 0x26b   :  { %1705 = vmatprep.subr.bf16.mxu0 %v4974_v29  ;;  %1746 = vmatprep.subr.bf16.mxu1 %v4976_v31 }
 0x26e   :  { %1706 = vmatpush1.bf16.msra.mxu0 %v4980_v33  ;;  %1747 = vmatpush1.bf16.msra.mxu1 %v4982_v35 }
 0x26f   :  { %1707 = vmatprep.subr.bf16.mxu0 %v4986_v36  ;;  %1748 = vmatprep.subr.bf16.mxu1 %v4988_v39 }
 0x272   :  { %1708 = vmatpush1.bf16.msra.mxu0 %v4992_v41  ;;  %1749 = vmatpush1.bf16.msra.mxu1 %v4994_v59 }
 0x273   :  { %1709 = vmatprep.subr.bf16.mxu0 %v4998_v61  ;;  %1750 = vmatprep.subr.bf16.mxu1 %v5000_v63 }
 0x276   :  { %1710 = vmatpush1.bf16.msra.mxu0 %v5004_v1  ;;  %1751 = vmatpush1.bf16.msra.mxu1 %v5006_v32 }
 0x277   :  { %1826 = vmatprep.subr.bf16.mxu0 %v5012_v34  ;;  %1867 = vmatprep.subr.bf16.mxu1 %v5014_v40 }
 0x310   :  { %v1259_v42 = vpop.f32.mrf.mxu0  ;;  %v1300_v43 = vpop.f32.mrf.mxu1 }
 0x312   :  { %v1261_v45 = vpop.f32.mrf.mxu0  ;;  %v1302_v54 = vpop.f32.mrf.mxu1 }
 0x314   :  { %v1263_v53 = vpop.f32.mrf.mxu0  ;;  %v1304_v47 = vpop.f32.mrf.mxu1 }
 0x316   :  { %v1264_v51 = vpop.f32.mrf.mxu0  ;;  %v1305_v37 = vpop.f32.mrf.mxu1 }
 0x318   :  { %v1376_v48 = vpop.f32.mrf.mxu0  ;;  %v1417_v49 = vpop.f32.mrf.mxu1 }
 0x319   :  { %v1377_v55 = vadd.f32 %v1376_v48, %v1259_v42  ;;  %v1418_v51 = vadd.f32 %v1417_v49, %v1300_v43  ;;  %v4327_v49 = vld [vmem:[%s5450_s0] ss:$0 sps:$4 sm:$0x22]  }
 0x31a   :  { %v1378_v56 = vpop.f32.mrf.mxu0  ;;  %v1419_v2 = vpop.f32.mrf.mxu1 }
 0x31b   :  { %v1424_v50 = vadd.f32 %v1377_v55, %v4787_v58  ;;  %v1379_v7 = vadd.f32 %v1378_v56, %v1261_v45  ;;  %v1420_v53 = vadd.f32 %v1419_v2, %v1302_v54  ;;  %v1426_v48 = vadd.f32 %v1418_v51, %v4798_v60  ;;  %v5032_v51 = vld [vmem:[#allocation4] ss:$16 sps:$4 sm:$0xff]  }
 0x31c   :  { %v1380_v3 = vpop.f32.mrf.mxu0  ;;  %v1421_v4 = vpop.f32.mrf.mxu1 }
 0x31d   :  { %v3980_v38 = vmul.f32 -1.442695, %v1424_v50  ;;  %v1425_v44 = vadd.f32 %v1379_v7, %v4789_v62  ;;  %v1427_v47 = vadd.f32 %v1420_v53, %v4794_v52 }
 0x31e   :  { %v1381_v5 = vpop.f32.mrf.mxu0  ;;  %v1422_v6 = vpop.f32.mrf.mxu1 }
 0x31f   :  { %4423 = vpow2.f32 %v3980_v38  ;;  %v3981_v8 = vmul.f32 -1.442695, %v1425_v44  ;;  %v3982_v42 = vmul.f32 -1.442695, %v1427_v47  ;;  %v1783_v5 = vunpack.c.l.b16 %v4327_v49 }
 0x320   :  { %v4328_v44 = vld [vmem:[%s5450_s0 + $0x4] ss:$0 sps:$4 sm:$0x22]  }
 0x321   :  { %4425 = vpow2.f32 %v3981_v8  ;;  %v1784_v6 = vunpack.c.l.b16 %v4328_v44 }
 0x322   :  { %4427 = vpow2.f32 %v3982_v42  ;;  %v1785_v42 = vrot.slane %v1783_v5, 3 }
 0x32c   :  { %v4424_v37 = vpop.eup %4423 }
 0x32d   :  { %v1431_v55 = vadd.f32 1.0, %v4424_v37  ;;  %v1786_v37 = vrot.slane %v1784_v6, 2 }
 0x32e   :  { %v4426_v45 = vpop.eup %4425 }
 0x32f   :  { %4429 = vrcp.f32 %v1431_v55  ;;  %v1437_v56 = vadd.f32 1.0, %v4426_v45  ;;  %v4428_v50 = vpop.eup %4427  ;;  %v1787_v45 = vsel %vm356_vm0, %v1786_v37, %v1785_v42 }
 0x330   :  { %4431 = vtanh.f32 %v1426_v48  ;;  %v1444_v38 = vadd.f32 1.0, %v4428_v50 }
 0x331   :  { %4433 = vrcp.f32 %v1437_v56 }
 0x332   :  { %4435 = vrcp.f32 %v1444_v38 }
 0x33c   :  { %v4430_v7 = vpop.eup %4429 }
 0x33d   :  { %v4432_v3 = vpop.eup %4431 }
 0x33e   :  { %v4434_v4 = vpop.eup %4433  ;;  %v1448_v54 = vmul.f32 %v4432_v3, %v4430_v7  ;;  %v1788_v3 = vpack.c.b16 %v1787_v45, %v1787_v45 }
 0x33f   :  { %v1447_v2 = vmul.f32 %v4434_v4, %v4881_v57  ;;  %v4436_v8 = vpop.eup %4435  ;;  %v5034_v57 = vld [vmem:[#allocation4 + $0x8] ss:$16 sps:$4 sm:$0xff]   ;;  %v1491_v4 = vld [vmem:[%s5454_s4] sm:$0x2] }
 0x341   :  { %v5023_v43 = vadd.f32 %v1448_v54, %v1447_v2  ;;  %v1494_v2 = vld [vmem:[%s5454_s4 + $0x4] sm:$0x2] }
 0x343   :  { %4437 = vtanh.f32 %v5023_v43 }
 0x350   :  { %v4438_v53 = vpop.eup %4437 }
 0x351   :  { %v1451_v47 = vmul.f32 %v4438_v53, %v4436_v8 }
 0x353   :  { %v1452_v48 = vpack.c.bf16 %v1451_v47, %v1451_v47 }
 0x355   :  { %v1460_v55 = vrot.slane %v1452_v48, %v4811_v30  ;;  %1728 = vmatmul.mubr.bf16.vlgmr.msra.gmra.mxu0 %v1452_v48  ;;  %1769 = vmatmul.mubr.bf16.vlgmr.msra.gmra.mxu1 %v1452_v48 }
 0x356   :  { %1827 = vmatpush1.bf16.msra.mxu0 %v5032_v51  ;;  %1868 = vmatpush1.bf16.msra.mxu1 %v5034_v57 }
 0x357   :  { %v1467_v56 = vrot.slane %v1460_v55, %v4811_v30  ;;  %1844 = vmatprep.mubr.bf16.mxu0 %v5455_v0  ;;  %1885 = vmatprep.mubr.bf16.mxu1 %v5455_v0 }
 0x358   :  { %2164 = vmatprep.subr.bf16.mxu0 %v4916_v9  ;;  %2205 = vmatprep.subr.bf16.mxu1 %v4918_v10 }
 0x359   :  { %v1469_v50 = vunpack.i.h.s16 %v1467_v56  ;;  %v3983_v7 = vpack.i.b16 %v1467_v56, %v1467_v56 }
 0x35b   :  { %v1471_v38 = vpack.i.b16 %v1469_v50, %v1469_v50  ;;  %v1478_v54 = vrot.slane %v3983_v7, %v4818_v46 }
 0x35d   :  { %v1485_v49 = vrot.slane %v1471_v38, %v4818_v46  ;;  %v1492_v44 = vsel %vm1490_vm8, %v1478_v54, %v1491_v4  ;;  %4022 = vmatmul.mubr.msk.bf16.vlgmr.msra.gmra.mxu0 %vm379_vm1, %v1788_v3  ;;  %4023 = vmatmul.mubr.msk.bf16.vlgmr.msra.gmra.mxu1 %vm379_vm1, %v1788_v3 }
 0x35e   :  { %1493 = vst [vmem:[%s5454_s4] sm:$0x2] %v1492_v44  ;;  %2165 = vmatpush1.bf16.msra.mxu0 %v4920_v11  ;;  %2206 = vmatpush1.bf16.msra.mxu1 %v4922_v12 }
 0x35f   :  { %v1495_v5 = vsel %vm1490_vm8, %v1485_v49, %v1494_v2  ;;  %2166 = vmatprep.subr.bf16.mxu0 %v4928_v13  ;;  %2207 = vmatprep.subr.bf16.mxu1 %v4930_v14 }
 0x360   :  { %1496 = vst [vmem:[%s5454_s4 + $0x4] sm:$0x2] %v1495_v5  ;;  %2196 = vmatprep.mubr.bf16.mxu0 %v5455_v0  ;;  %2237 = vmatprep.mubr.bf16.mxu1 %v5455_v0 }
 0x362   :  { %2167 = vmatpush1.bf16.msra.mxu0 %v4932_v15  ;;  %2208 = vmatpush1.bf16.msra.mxu1 %v4934_v16 }
 0x363   :  { %2168 = vmatprep.subr.bf16.mxu0 %v4940_v17  ;;  %2209 = vmatprep.subr.bf16.mxu1 %v4942_v18 }
 0x366   :  { %2169 = vmatpush1.bf16.msra.mxu0 %v4944_v19  ;;  %2210 = vmatpush1.bf16.msra.mxu1 %v4946_v20 }
 0x367   :  { %2170 = vmatprep.subr.bf16.mxu0 %v4952_v21  ;;  %2211 = vmatprep.subr.bf16.mxu1 %v4954_v22 }
 0x36a   :  { %2171 = vmatpush1.bf16.msra.mxu0 %v4956_v23  ;;  %2212 = vmatpush1.bf16.msra.mxu1 %v4958_v24 }
 0x36b   :  { %2172 = vmatprep.subr.bf16.mxu0 %v4962_v25  ;;  %2213 = vmatprep.subr.bf16.mxu1 %v4964_v26 }
 0x36e   :  { %2173 = vmatpush1.bf16.msra.mxu0 %v4968_v27  ;;  %2214 = vmatpush1.bf16.msra.mxu1 %v4970_v28 }
 0x36f   :  { %2174 = vmatprep.subr.bf16.mxu0 %v4974_v29  ;;  %2215 = vmatprep.subr.bf16.mxu1 %v4976_v31 }
 0x372   :  { %2175 = vmatpush1.bf16.msra.mxu0 %v4980_v33  ;;  %2216 = vmatpush1.bf16.msra.mxu1 %v4982_v35 }
 0x373   :  { %2176 = vmatprep.subr.bf16.mxu0 %v4986_v36  ;;  %2217 = vmatprep.subr.bf16.mxu1 %v4988_v39 }
 0x376   :  { %2177 = vmatpush1.bf16.msra.mxu0 %v4992_v41  ;;  %2218 = vmatpush1.bf16.msra.mxu1 %v4994_v59 }
 0x377   :  { %2178 = vmatprep.subr.bf16.mxu0 %v4998_v61  ;;  %2219 = vmatprep.subr.bf16.mxu1 %v5000_v63 }
 0x37a   :  { %2179 = vmatpush1.bf16.msra.mxu0 %v5004_v1  ;;  %2220 = vmatpush1.bf16.msra.mxu1 %v5006_v32 }
 0x37b   :  { %2295 = vmatprep.subr.bf16.mxu0 %v5012_v34  ;;  %2336 = vmatprep.subr.bf16.mxu1 %v5014_v40 }
 0x415   :  { %v1729_v6 = vpop.f32.mrf.mxu0  ;;  %v1770_v8 = vpop.f32.mrf.mxu1 }
 0x417   :  { %v1731_v53 = vpop.f32.mrf.mxu0  ;;  %v1772_v47 = vpop.f32.mrf.mxu1 }
 0x419   :  { %v1733_v42 = vpop.f32.mrf.mxu0  ;;  %v1774_v37 = vpop.f32.mrf.mxu1 }
 0x41b   :  { %v1734_v48 = vpop.f32.mrf.mxu0  ;;  %v1775_v55 = vpop.f32.mrf.mxu1 }
 0x41d   :  { %v1846_v45 = vpop.f32.mrf.mxu0  ;;  %v1887_v56 = vpop.f32.mrf.mxu1 }
 0x41e   :  { %v1847_v50 = vadd.f32 %v1846_v45, %v1729_v6  ;;  %v1888_v55 = vadd.f32 %v1887_v56, %v1770_v8  ;;  %v4329_v56 = vld [vmem:[%s5450_s0] ss:$0 sps:$4 sm:$0x44]  }
 0x41f   :  { %v1848_v7 = vpop.f32.mrf.mxu0  ;;  %v1889_v3 = vpop.f32.mrf.mxu1 }
 0x420   :  { %v1894_v4 = vadd.f32 %v1847_v50, %v4787_v58  ;;  %v1849_v38 = vadd.f32 %v1848_v7, %v1731_v53  ;;  %v1890_v37 = vadd.f32 %v1889_v3, %v1772_v47  ;;  %v1896_v40 = vadd.f32 %v1888_v55, %v4798_v60 }
 0x421   :  { %v1850_v54 = vpop.f32.mrf.mxu0  ;;  %v1891_v2 = vpop.f32.mrf.mxu1 }
 0x422   :  { %v4024_v49 = vmul.f32 -1.442695, %v1894_v4  ;;  %v1895_v44 = vadd.f32 %v1849_v38, %v4789_v62  ;;  %v1897_v48 = vadd.f32 %v1890_v37, %v4794_v52 }
 0x423   :  { %v1851_v5 = vpop.f32.mrf.mxu0  ;;  %v1892_v0 = vpop.f32.mrf.mxu1 }
 0x424   :  { %4439 = vpow2.f32 %v4024_v49  ;;  %v4025_v42 = vmul.f32 -1.442695, %v1895_v44  ;;  %v4026_v6 = vmul.f32 -1.442695, %v1897_v48  ;;  %v2252_v49 = vunpack.c.l.b16 %v4329_v56 }
 0x426   :  { %4441 = vpow2.f32 %v4025_v42  ;;  %v2254_v48 = vrot.slane %v2252_v49, 4 }
 0x427   :  { %4443 = vpow2.f32 %v4026_v6 }
 0x431   :  { %v4440_v45 = vpop.eup %4439 }
 0x432   :  { %v1901_v50 = vadd.f32 1.0, %v4440_v45 }
 0x433   :  { %v4442_v53 = vpop.eup %4441 }
 0x434   :  { %4445 = vrcp.f32 %v1901_v50  ;;  %v1907_v7 = vadd.f32 1.0, %v4442_v53  ;;  %v4444_v4 = vpop.eup %4443  ;;  %v5459_v53 = vmov 0  }
 0x435   :  { %4447 = vtanh.f32 %v1896_v40  ;;  %v1914_v2 = vadd.f32 1.0, %v4444_v4  ;;  %v4330_v40 = vld [vmem:[%s5450_s0 + $0x4] ss:$0 sps:$4 sm:$0x44]  }
 0x436   :  { %4449 = vrcp.f32 %v1907_v7  ;;  %v2253_v44 = vunpack.c.l.b16 %v4330_v40 }
 0x437   :  { %4451 = vrcp.f32 %v1914_v2  ;;  %v1960_v2 = vld [vmem:[%s5454_s4] sm:$0x2] }
 0x441   :  { %v4446_v0 = vpop.eup %4445 }
 0x442   :  { %v4448_v38 = vpop.eup %4447 }
 0x443   :  { %v4450_v54 = vpop.eup %4449  ;;  %v1918_v47 = vmul.f32 %v4448_v38, %v4446_v0 }
 0x444   :  { %v1917_v3 = vmul.f32 %v4450_v54, %v5023_v43  ;;  %v4452_v5 = vpop.eup %4451  ;;  %v2255_v43 = vrot.slane %v2253_v44, 3 }
 0x446   :  { %v5101_v8 = vadd.f32 %v1918_v47, %v1917_v3  ;;  %v2256_v45 = vsel %vm356_vm0, %v2255_v43, %v2254_v48 }
 0x447   :  { %v2257_v0 = vpack.c.b16 %v2256_v45, %v2256_v45 }
 0x448   :  { %4453 = vtanh.f32 %v5101_v8 }
 0x455   :  { %v4454_v42 = vpop.eup %4453 }
 0x456   :  { %v1921_v37 = vmul.f32 %v4454_v42, %v4452_v5 }
 0x458   :  { %v1922_v55 = vpack.c.bf16 %v1921_v37, %v1921_v37 }
 0x45a   :  { %v1930_v6 = vrot.slane %v1922_v55, %v4811_v30  ;;  %2197 = vmatmul.mubr.bf16.vlgmr.msra.gmra.mxu0 %v1922_v55  ;;  %2238 = vmatmul.mubr.bf16.vlgmr.msra.gmra.mxu1 %v1922_v55  ;;  %v4331_v55 = vld [vmem:[%s5450_s0] ss:$0 sps:$4 sm:$0x44]  }
 0x45b   :  { %2296 = vmatpush1.bf16.msra.mxu0 %v5032_v51  ;;  %2337 = vmatpush1.bf16.msra.mxu1 %v5034_v57  ;;  %v2722_v45 = vunpack.c.l.b16 %v4331_v55  ;;  %v5308_v55 = vld [vmem:[#allocation4 + $0xc] ss:$16 sps:$4 sm:$0xff]  }
 0x45c   :  { %v1937_v50 = vrot.slane %v1930_v6, %v4811_v30  ;;  %2313 = vmatprep.mubr.bf16.mxu0 %v5459_v53  ;;  %2354 = vmatprep.mubr.bf16.mxu1 %v5459_v53  ;;  %v4332_v6 = vld [vmem:[%s5450_s0 + $0x4] ss:$0 sps:$4 sm:$0x44]  }
 0x45d   :  { %2634 = vmatprep.subr.bf16.mxu0 %v4916_v9  ;;  %2675 = vmatprep.subr.bf16.mxu1 %v4918_v10  ;;  %v1963_v9 = vld [vmem:[%s5454_s4 + $0x4] sm:$0x2] }
 0x45e   :  { %v1939_v7 = vunpack.i.h.s16 %v1937_v50  ;;  %v4027_v4 = vpack.i.b16 %v1937_v50, %v1937_v50  ;;  %v2723_v50 = vunpack.c.l.b16 %v4332_v6 }
 0x460   :  { %v1941_v38 = vpack.i.b16 %v1939_v7, %v1939_v7  ;;  %v1948_v54 = vrot.slane %v4027_v4, %v4818_v46 }
 0x462   :  { %v1955_v47 = vrot.slane %v1941_v38, %v4818_v46  ;;  %v1961_v3 = vsel %vm1959_vm10, %v1948_v54, %v1960_v2  ;;  %4066 = vmatmul.mubr.msk.bf16.vlgmr.msra.gmra.mxu0 %vm379_vm1, %v2257_v0  ;;  %4067 = vmatmul.mubr.msk.bf16.vlgmr.msra.gmra.mxu1 %vm379_vm1, %v2257_v0  ;;  %v2724_v38 = vrot.slane %v2722_v45, 5 }
 0x463   :  { %1962 = vst [vmem:[%s5454_s4] sm:$0x2] %v1961_v3  ;;  %2635 = vmatpush1.bf16.msra.mxu0 %v4920_v11  ;;  %2676 = vmatpush1.bf16.msra.mxu1 %v4922_v12  ;;  %v5460_v11 = vld [vmem:[#allocation11_spill] sm:$0xff] }
 0x464   :  { %v1964_v10 = vsel %vm1959_vm10, %v1955_v47, %v1963_v9  ;;  %2636 = vmatprep.subr.bf16.mxu0 %v4928_v13  ;;  %2677 = vmatprep.subr.bf16.mxu1 %v4930_v14 }
 0x465   :  { %1965 = vst [vmem:[%s5454_s4 + $0x4] sm:$0x2] %v1964_v10  ;;  %2666 = vmatprep.mubr.bf16.mxu0 %v5459_v53  ;;  %2707 = vmatprep.mubr.bf16.mxu1 %v5459_v53 }
 0x467   :  { %2637 = vmatpush1.bf16.msra.mxu0 %v4932_v15  ;;  %2678 = vmatpush1.bf16.msra.mxu1 %v4934_v16 }
 0x468   :  { %2638 = vmatprep.subr.bf16.mxu0 %v4940_v17  ;;  %2679 = vmatprep.subr.bf16.mxu1 %v4942_v18 }
 0x46b   :  { %2639 = vmatpush1.bf16.msra.mxu0 %v4944_v19  ;;  %2680 = vmatpush1.bf16.msra.mxu1 %v4946_v20 }
 0x46c   :  { %2640 = vmatprep.subr.bf16.mxu0 %v4952_v21  ;;  %2681 = vmatprep.subr.bf16.mxu1 %v4954_v22 }
 0x46f   :  { %2641 = vmatpush1.bf16.msra.mxu0 %v4956_v23  ;;  %2682 = vmatpush1.bf16.msra.mxu1 %v4958_v24 }
 0x470   :  { %2642 = vmatprep.subr.bf16.mxu0 %v4962_v25  ;;  %2683 = vmatprep.subr.bf16.mxu1 %v4964_v26 }
 0x473   :  { %2643 = vmatpush1.bf16.msra.mxu0 %v4968_v27  ;;  %2684 = vmatpush1.bf16.msra.mxu1 %v4970_v28 }
 0x474   :  { %2644 = vmatprep.subr.bf16.mxu0 %v4974_v29  ;;  %2685 = vmatprep.subr.bf16.mxu1 %v4976_v31 }
 0x477   :  { %2645 = vmatpush1.bf16.msra.mxu0 %v4980_v33  ;;  %2686 = vmatpush1.bf16.msra.mxu1 %v4982_v35 }
 0x478   :  { %2646 = vmatprep.subr.bf16.mxu0 %v4986_v36  ;;  %2687 = vmatprep.subr.bf16.mxu1 %v4988_v39 }
 0x47b   :  { %2647 = vmatpush1.bf16.msra.mxu0 %v4992_v41  ;;  %2688 = vmatpush1.bf16.msra.mxu1 %v4994_v59 }
 0x47c   :  { %2648 = vmatprep.subr.bf16.mxu0 %v4998_v61  ;;  %2689 = vmatprep.subr.bf16.mxu1 %v5000_v63 }
 0x47f   :  { %2649 = vmatpush1.bf16.msra.mxu0 %v5004_v1  ;;  %2690 = vmatpush1.bf16.msra.mxu1 %v5006_v32 }
 0x480   :  { %2765 = vmatprep.subr.bf16.mxu0 %v5012_v34  ;;  %2806 = vmatprep.subr.bf16.mxu1 %v5460_v11 }
 0x51a   :  { %v2198_v12 = vpop.f32.mrf.mxu0  ;;  %v2239_v13 = vpop.f32.mrf.mxu1 }
 0x51c   :  { %v2200_v14 = vpop.f32.mrf.mxu0  ;;  %v2241_v15 = vpop.f32.mrf.mxu1 }
 0x51e   :  { %v2202_v16 = vpop.f32.mrf.mxu0  ;;  %v2243_v17 = vpop.f32.mrf.mxu1 }
 0x51f   :  { %v5210_v17 = vld [vmem:[#allocation6 + $0xe4] ss:$16 sps:$4 sm:$0xff]  }
 0x520   :  { %v2203_v18 = vpop.f32.mrf.mxu0  ;;  %v2244_v19 = vpop.f32.mrf.mxu1 }
 0x521   :  { %v5212_v18 = vld [vmem:[#allocation6 + $0xec] ss:$16 sps:$4 sm:$0xff]   ;;  %v5214_v19 = vld [vmem:[#allocation6 + $0xe0] ss:$16 sps:$4 sm:$0xff]  }
 0x522   :  { %v2315_v20 = vpop.f32.mrf.mxu0  ;;  %v2356_v21 = vpop.f32.mrf.mxu1 }
 0x523   :  { %v2316_v22 = vadd.f32 %v2315_v20, %v2198_v12  ;;  %v2357_v59 = vadd.f32 %v2356_v21, %v2239_v13  ;;  %v2433_v13 = vld [vmem:[%s5454_s4 + $0x4] sm:$0x4]  ;;  %v5216_v20 = vld [vmem:[#allocation6 + $0xe8] ss:$16 sps:$4 sm:$0xff]   ;;  %v5222_v21 = vld [vmem:[#allocation6 + $0xc4] ss:$16 sps:$4 sm:$0xff]  }
 0x524   :  { %v2317_v23 = vpop.f32.mrf.mxu0  ;;  %v2358_v24 = vpop.f32.mrf.mxu1 }
 0x525   :  { %v2363_v25 = vadd.f32 %v2316_v22, %v4787_v58  ;;  %v2318_v26 = vadd.f32 %v2317_v23, %v2200_v14  ;;  %v2359_v39 = vadd.f32 %v2358_v24, %v2241_v15  ;;  %v2365_v1 = vadd.f32 %v2357_v59, %v4798_v60  ;;  %v5224_v22 = vld [vmem:[#allocation6 + $0xcc] ss:$16 sps:$4 sm:$0xff]   ;;  %v5226_v23 = vld [vmem:[#allocation6 + $0xc0] ss:$16 sps:$4 sm:$0xff]   ;;  %v5228_v24 = vld [vmem:[#allocation6 + $0xc8] ss:$16 sps:$4 sm:$0xff]  }
 0x526   :  { %v2319_v27 = vpop.f32.mrf.mxu0  ;;  %v2360_v28 = vpop.f32.mrf.mxu1  ;;  %v5264_v59 = vld [vmem:[#allocation6 + $0x68] ss:$16 sps:$4 sm:$0xff]  }
 0x527   :  { %v4068_v29 = vmul.f32 -1.442695, %v2363_v25  ;;  %v2364_v31 = vadd.f32 %v2318_v26, %v4789_v62  ;;  %v2366_v41 = vadd.f32 %v2359_v39, %v4794_v52  ;;  %v5234_v25 = vld [vmem:[#allocation6 + $0xa4] ss:$16 sps:$4 sm:$0xff]   ;;  %v5236_v26 = vld [vmem:[#allocation6 + $0xac] ss:$16 sps:$4 sm:$0xff]  }
 0x528   :  { %v2320_v33 = vpop.f32.mrf.mxu0  ;;  %v2361_v35 = vpop.f32.mrf.mxu1  ;;  %v5238_v27 = vld [vmem:[#allocation6 + $0xa0] ss:$16 sps:$4 sm:$0xff]   ;;  %v5240_v28 = vld [vmem:[#allocation6 + $0xa8] ss:$16 sps:$4 sm:$0xff]   ;;  %v5258_v39 = vld [vmem:[#allocation6 + $0x6c] ss:$16 sps:$4 sm:$0xff]  }
 0x529   :  { %4455 = vpow2.f32 %v4068_v29  ;;  %v4069_v36 = vmul.f32 -1.442695, %v2364_v31  ;;  %v4070_v61 = vmul.f32 -1.442695, %v2366_v41  ;;  %v5246_v29 = vld [vmem:[#allocation6 + $0x84] ss:$16 sps:$4 sm:$0xff]  }
 0x52a   :  { %v5248_v31 = vld [vmem:[#allocation6 + $0x8c] ss:$16 sps:$4 sm:$0xff]   ;;  %v5250_v33 = vld [vmem:[#allocation6 + $0x80] ss:$16 sps:$4 sm:$0xff]   ;;  %v5252_v35 = vld [vmem:[#allocation6 + $0x88] ss:$16 sps:$4 sm:$0xff]  }
 0x52b   :  { %4457 = vpow2.f32 %v4069_v36  ;;  %v5256_v36 = vld [vmem:[#allocation6 + $0x64] ss:$16 sps:$4 sm:$0xff]   ;;  %v5262_v41 = vld [vmem:[#allocation6 + $0x60] ss:$16 sps:$4 sm:$0xff]  }
 0x52c   :  { %4459 = vpow2.f32 %v4070_v61  ;;  %v5268_v61 = vld [vmem:[#allocation6 + $0x44] ss:$16 sps:$4 sm:$0xff]  }
 0x536   :  { %v4456_v63 = vpop.eup %4455 }
 0x537   :  { %v2370_v32 = vadd.f32 1.0, %v4456_v63  ;;  %v5270_v63 = vld [vmem:[#allocation6 + $0x4c] ss:$16 sps:$4 sm:$0xff]  }
 0x538   :  { %v4458_v34 = vpop.eup %4457 }
 0x539   :  { %4461 = vrcp.f32 %v2370_v32  ;;  %v2376_v56 = vadd.f32 1.0, %v4458_v34  ;;  %v4460_v40 = vpop.eup %4459  ;;  %v5276_v32 = vld [vmem:[#allocation6 + $0x48] ss:$16 sps:$4 sm:$0xff]   ;;  %v5280_v34 = vld [vmem:[#allocation6 + $0x24] ss:$16 sps:$4 sm:$0xff]  }
 0x53a   :  { %4463 = vtanh.f32 %v2365_v1  ;;  %v2383_v42 = vadd.f32 1.0, %v4460_v40  ;;  %v5274_v1 = vld [vmem:[#allocation6 + $0x40] ss:$16 sps:$4 sm:$0xff]  }
 0x53b   :  { %4465 = vrcp.f32 %v2376_v56  ;;  %v5282_v56 = vld [vmem:[#allocation6 + $0x2c] ss:$16 sps:$4 sm:$0xff]   ;;  %v5286_v40 = vld [vmem:[#allocation6 + $0x20] ss:$16 sps:$4 sm:$0xff]  }
 0x53c   :  { %4467 = vrcp.f32 %v2383_v42  ;;  %v5298_v42 = vld [vmem:[#allocation6] ss:$16 sps:$4 sm:$0xff]  }
 0x546   :  { %v4462_v49 = vpop.eup %4461 }
 0x547   :  { %v4464_v44 = vpop.eup %4463 }
 0x548   :  { %v4466_v5 = vpop.eup %4465  ;;  %v2387_v37 = vmul.f32 %v4464_v44, %v4462_v49  ;;  %v5288_v49 = vld [vmem:[#allocation6 + $0x28] ss:$16 sps:$4 sm:$0xff]   ;;  %v5292_v44 = vld [vmem:[#allocation6 + $0x4] ss:$16 sps:$4 sm:$0xff]  }
 0x549   :  { %v2386_v48 = vmul.f32 %v4466_v5, %v5101_v8  ;;  %v4468_v7 = vpop.eup %4467  ;;  %v2725_v8 = vrot.slane %v2723_v50, 4  ;;  %v5294_v5 = vld [vmem:[#allocation6 + $0xc] ss:$16 sps:$4 sm:$0xff]  }
 0x54b   :  { %v5175_v43 = vadd.f32 %v2387_v37, %v2386_v48  ;;  %v2726_v47 = vsel %vm356_vm0, %v2725_v8, %v2724_v38  ;;  %v5300_v37 = vld [vmem:[#allocation6 + $0x8] ss:$16 sps:$4 sm:$0xff]   ;;  %v5306_v48 = vld [vmem:[#allocation4 + $0x4] ss:$16 sps:$4 sm:$0xff]  }
 0x54c   :  { %v2727_v11 = vpack.c.b16 %v2726_v47, %v2726_v47 }
 0x54d   :  { %4469 = vtanh.f32 %v5175_v43 }
 0x55a   :  { %v4470_v4 = vpop.eup %4469 }
 0x55b   :  { %v2390_v0 = vmul.f32 %v4470_v4, %v4468_v7 }
 0x55d   :  { %v2391_v54 = vpack.c.bf16 %v2390_v0, %v2390_v0 }
 0x55f   :  { %v2399_v2 = vrot.slane %v2391_v54, %v4811_v30  ;;  %2667 = vmatmul.mubr.bf16.vlgmr.msra.gmra.mxu0 %v2391_v54  ;;  %2708 = vmatmul.mubr.bf16.vlgmr.msra.gmra.mxu1 %v2391_v54 }
 0x560   :  { %2766 = vmatpush1.bf16.msra.mxu0 %v5032_v51  ;;  %2807 = vmatpush1.bf16.msra.mxu1 %v5034_v57  ;;  %v2430_v51 = vld [vmem:[%s5454_s4] sm:$0x4] }
 0x561   :  { %v2406_v3 = vrot.slane %v2399_v2, %v4811_v30  ;;  %2783 = vmatprep.mubr.bf16.mxu0 %v5459_v53  ;;  %2824 = vmatprep.mubr.bf16.mxu1 %v5459_v53 }
 0x562   :  { %3103 = vmatprep.subr.bf16.mxu0 %v5210_v17  ;;  %3144 = vmatprep.subr.bf16.mxu1 %v5212_v18 }
 0x563   :  { %v2408_v9 = vunpack.i.h.s16 %v2406_v3  ;;  %v4071_v10 = vpack.i.b16 %v2406_v3, %v2406_v3 }
 0x565   :  { %v2410_v57 = vpack.i.b16 %v2408_v9, %v2408_v9  ;;  %v2417_v12 = vrot.slane %v4071_v10, %v4818_v46 }
 0x567   :  { %v2424_v14 = vrot.slane %v2410_v57, %v4818_v46  ;;  %v2431_v15 = vsel %vm2429_vm13, %v2417_v12, %v2430_v51  ;;  %4110 = vmatmul.mubr.msk.bf16.vlgmr.msra.gmra.mxu0 %vm379_vm1, %v2727_v11  ;;  %4111 = vmatmul.mubr.msk.bf16.vlgmr.msra.gmra.mxu1 %vm379_vm1, %v2727_v11 }
 0x568   :  { %2432 = vst [vmem:[%s5454_s4] sm:$0x4] %v2431_v15  ;;  %3135 = vmatprep.mubr.bf16.mxu0 %v5459_v53  ;;  %3176 = vmatprep.mubr.bf16.mxu1 %v5459_v53 }
 0x569   :  { %v2434_v16 = vsel %vm2429_vm13, %v2424_v14, %v2433_v13  ;;  %3104 = vmatpush1.bf16.msra.mxu0 %v5214_v19  ;;  %3145 = vmatpush1.bf16.msra.mxu1 %v5216_v20 }
 0x56a   :  { %2435 = vst [vmem:[%s5454_s4 + $0x4] sm:$0x4] %v2434_v16  ;;  %3105 = vmatprep.subr.bf16.mxu0 %v5222_v21  ;;  %3146 = vmatprep.subr.bf16.mxu1 %v5224_v22 }
 0x56d   :  { %3106 = vmatpush1.bf16.msra.mxu0 %v5226_v23  ;;  %3147 = vmatpush1.bf16.msra.mxu1 %v5228_v24 }
 0x56e   :  { %3107 = vmatprep.subr.bf16.mxu0 %v5234_v25  ;;  %3148 = vmatprep.subr.bf16.mxu1 %v5236_v26 }
 0x571   :  { %3108 = vmatpush1.bf16.msra.mxu0 %v5238_v27  ;;  %3149 = vmatpush1.bf16.msra.mxu1 %v5240_v28 }
 0x572   :  { %3109 = vmatprep.subr.bf16.mxu0 %v5246_v29  ;;  %3150 = vmatprep.subr.bf16.mxu1 %v5248_v31 }
 0x575   :  { %3110 = vmatpush1.bf16.msra.mxu0 %v5250_v33  ;;  %3151 = vmatpush1.bf16.msra.mxu1 %v5252_v35 }
 0x576   :  { %3111 = vmatprep.subr.bf16.mxu0 %v5256_v36  ;;  %3152 = vmatprep.subr.bf16.mxu1 %v5258_v39 }
 0x579   :  { %3112 = vmatpush1.bf16.msra.mxu0 %v5262_v41  ;;  %3153 = vmatpush1.bf16.msra.mxu1 %v5264_v59 }
 0x57a   :  { %3113 = vmatprep.subr.bf16.mxu0 %v5268_v61  ;;  %3154 = vmatprep.subr.bf16.mxu1 %v5270_v63 }
 0x57d   :  { %3114 = vmatpush1.bf16.msra.mxu0 %v5274_v1  ;;  %3155 = vmatpush1.bf16.msra.mxu1 %v5276_v32 }
 0x57e   :  { %3115 = vmatprep.subr.bf16.mxu0 %v5280_v34  ;;  %3156 = vmatprep.subr.bf16.mxu1 %v5282_v56 }
 0x581   :  { %3116 = vmatpush1.bf16.msra.mxu0 %v5286_v40  ;;  %3157 = vmatpush1.bf16.msra.mxu1 %v5288_v49 }
 0x582   :  { %3117 = vmatprep.subr.bf16.mxu0 %v5292_v44  ;;  %3158 = vmatprep.subr.bf16.mxu1 %v5294_v5 }
 0x585   :  { %3118 = vmatpush1.bf16.msra.mxu0 %v5298_v42  ;;  %3159 = vmatpush1.bf16.msra.mxu1 %v5300_v37 }
 0x586   :  { %3234 = vmatprep.subr.bf16.mxu0 %v5306_v48  ;;  %3275 = vmatprep.subr.bf16.mxu1 %v5308_v55 }
 0x61f   :  { %v2668_v6 = vpop.f32.mrf.mxu0  ;;  %v2709_v45 = vpop.f32.mrf.mxu1 }
 0x621   :  { %v2670_v50 = vpop.f32.mrf.mxu0  ;;  %v2711_v7 = vpop.f32.mrf.mxu1 }
 0x623   :  { %v2672_v4 = vpop.f32.mrf.mxu0  ;;  %v2713_v0 = vpop.f32.mrf.mxu1 }
 0x625   :  { %v2673_v38 = vpop.f32.mrf.mxu0  ;;  %v2714_v8 = vpop.f32.mrf.mxu1 }
 0x627   :  { %v2785_v54 = vpop.f32.mrf.mxu0  ;;  %v2826_v2 = vpop.f32.mrf.mxu1 }
 0x628   :  { %v2786_v47 = vadd.f32 %v2785_v54, %v2668_v6  ;;  %v2827_v38 = vadd.f32 %v2826_v2, %v2709_v45  ;;  %v4387_v2 = vld [vmem:[%s5450_s0] ss:$0 sps:$4 sm:$0x88]  }
 0x629   :  { %v2787_v3 = vpop.f32.mrf.mxu0  ;;  %v2828_v9 = vpop.f32.mrf.mxu1 }
 0x62a   :  { %v2833_v10 = vadd.f32 %v2786_v47, %v4787_v58  ;;  %v2788_v11 = vadd.f32 %v2787_v3, %v2670_v50  ;;  %v2829_v4 = vadd.f32 %v2828_v9, %v2711_v7  ;;  %v2835_v54 = vadd.f32 %v2827_v38, %v4798_v60  ;;  %v5326_v38 = vld [vmem:[#allocation4] ss:$16 sps:$4 sm:$0xff]  }
 0x62b   :  { %v2789_v51 = vpop.f32.mrf.mxu0  ;;  %v2830_v57 = vpop.f32.mrf.mxu1 }
 0x62c   :  { %v4112_v12 = vmul.f32 -1.442695, %v2833_v10  ;;  %v2834_v13 = vadd.f32 %v2788_v11, %v4789_v62  ;;  %v2836_v0 = vadd.f32 %v2829_v4, %v4794_v52 }
 0x62d   :  { %v2790_v14 = vpop.f32.mrf.mxu0  ;;  %v2831_v15 = vpop.f32.mrf.mxu1 }
 0x62e   :  { %4471 = vpow2.f32 %v4112_v12  ;;  %v4113_v16 = vmul.f32 -1.442695, %v2834_v13  ;;  %v4114_v6 = vmul.f32 -1.442695, %v2836_v0  ;;  %v3191_v14 = vunpack.c.l.b16 %v4387_v2 }
 0x62f   :  { %v4388_v13 = vld [vmem:[%s5450_s0 + $0x4] ss:$0 sps:$4 sm:$0x88]  }
 0x630   :  { %4473 = vpow2.f32 %v4113_v16  ;;  %v3192_v15 = vunpack.c.l.b16 %v4388_v13 }
 0x631   :  { %4475 = vpow2.f32 %v4114_v6  ;;  %v3193_v6 = vrot.slane %v3191_v14, 6 }
 0x63b   :  { %v4472_v8 = vpop.eup %4471 }
 0x63c   :  { %v2840_v47 = vadd.f32 1.0, %v4472_v8  ;;  %v3194_v8 = vrot.slane %v3192_v15, 5 }
 0x63d   :  { %v4474_v50 = vpop.eup %4473 }
 0x63e   :  { %4477 = vrcp.f32 %v2840_v47  ;;  %v2846_v3 = vadd.f32 1.0, %v4474_v50  ;;  %v4476_v10 = vpop.eup %4475  ;;  %v3195_v50 = vsel %vm356_vm0, %v3194_v8, %v3193_v6  ;;  %v4389_v8 = vld [vmem:[%s5450_s0] ss:$0 sps:$4 sm:$0x88]  }
 0x63f   :  { %4479 = vtanh.f32 %v2835_v54  ;;  %v2853_v12 = vadd.f32 1.0, %v4476_v10 }
 0x640   :  { %4481 = vrcp.f32 %v2846_v3 }
 0x641   :  { %4483 = vrcp.f32 %v2853_v12 }
 0x64b   :  { %v4478_v11 = vpop.eup %4477 }
 0x64c   :  { %v4480_v51 = vpop.eup %4479 }
 0x64d   :  { %v4482_v57 = vpop.eup %4481  ;;  %v2857_v7 = vmul.f32 %v4480_v51, %v4478_v11  ;;  %v3196_v51 = vpack.c.b16 %v3195_v50, %v3195_v50 }
 0x64e   :  { %v2856_v9 = vmul.f32 %v4482_v57, %v5175_v43  ;;  %v4484_v16 = vpop.eup %4483  ;;  %v5328_v43 = vld [vmem:[#allocation4 + $0x8] ss:$16 sps:$4 sm:$0xff]  }
 0x650   :  { %v5317_v45 = vadd.f32 %v2857_v7, %v2856_v9  ;;  %v2899_v7 = vld [vmem:[%s5454_s4] sm:$0x4] }
 0x652   :  { %4485 = vtanh.f32 %v5317_v45 }
 0x65f   :  { %v4486_v4 = vpop.eup %4485 }
 0x660   :  { %v2860_v0 = vmul.f32 %v4486_v4, %v4484_v16 }
 0x662   :  { %v2861_v54 = vpack.c.bf16 %v2860_v0, %v2860_v0 }
 0x664   :  { %v2869_v47 = vrot.slane %v2861_v54, %v4811_v30  ;;  %3136 = vmatmul.mubr.bf16.vlgmr.msra.gmra.mxu0 %v2861_v54  ;;  %3177 = vmatmul.mubr.bf16.vlgmr.msra.gmra.mxu1 %v2861_v54  ;;  %v4390_v54 = vld [vmem:[%s5450_s0 + $0x4] ss:$0 sps:$4 sm:$0x88]  }
 0x665   :  { %3235 = vmatpush1.bf16.msra.mxu0 %v5326_v38  ;;  %3276 = vmatpush1.bf16.msra.mxu1 %v5328_v43  ;;  %v3662_v50 = vunpack.c.l.b16 %v4390_v54 }
 0x666   :  { %v2876_v3 = vrot.slane %v2869_v47, %v4811_v30  ;;  %3252 = vmatprep.mubr.bf16.mxu0 %v5459_v53  ;;  %3293 = vmatprep.mubr.bf16.mxu1 %v5459_v53  ;;  %v3661_v47 = vunpack.c.l.b16 %v4389_v8 }
 0x667   :  { %3573 = vmatprep.subr.bf16.mxu0 %v5210_v17  ;;  %3614 = vmatprep.subr.bf16.mxu1 %v5212_v18  ;;  %v2902_v17 = vld [vmem:[%s5454_s4 + $0x4] sm:$0x4] }
 0x668   :  { %v2878_v10 = vunpack.i.h.s16 %v2876_v3  ;;  %v4115_v11 = vpack.i.b16 %v2876_v3, %v2876_v3 }
 0x66a   :  { %v2880_v57 = vpack.i.b16 %v2878_v10, %v2878_v10  ;;  %v2887_v12 = vrot.slane %v4115_v11, %v4818_v46 }
 0x66c   :  { %v2894_v9 = vrot.slane %v2880_v57, %v4818_v46  ;;  %v2900_v2 = vsel %vm2898_vm15, %v2887_v12, %v2899_v7  ;;  %4154 = vmatmul.mubr.msk.bf16.vlgmr.msra.gmra.mxu0 %vm379_vm1, %v3196_v51  ;;  %4155 = vmatmul.mubr.msk.bf16.vlgmr.msra.gmra.mxu1 %vm379_vm1, %v3196_v51  ;;  %v3663_v51 = vrot.slane %v3661_v47, 7 }
 0x66d   :  { %2901 = vst [vmem:[%s5454_s4] sm:$0x4] %v2900_v2  ;;  %3574 = vmatpush1.bf16.msra.mxu0 %v5214_v19  ;;  %3615 = vmatpush1.bf16.msra.mxu1 %v5216_v20 }
 0x66e   :  { %v2903_v18 = vsel %vm2898_vm15, %v2894_v9, %v2902_v17  ;;  %3575 = vmatprep.subr.bf16.mxu0 %v5222_v21  ;;  %3616 = vmatprep.subr.bf16.mxu1 %v5224_v22 }
 0x66f   :  { %2904 = vst [vmem:[%s5454_s4 + $0x4] sm:$0x4] %v2903_v18  ;;  %3605 = vmatprep.mubr.bf16.mxu0 %v5459_v53  ;;  %3646 = vmatprep.mubr.bf16.mxu1 %v5459_v53 }
 0x671   :  { %3576 = vmatpush1.bf16.msra.mxu0 %v5226_v23  ;;  %3617 = vmatpush1.bf16.msra.mxu1 %v5228_v24 }
 0x672   :  { %3577 = vmatprep.subr.bf16.mxu0 %v5234_v25  ;;  %3618 = vmatprep.subr.bf16.mxu1 %v5236_v26 }
 0x675   :  { %3578 = vmatpush1.bf16.msra.mxu0 %v5238_v27  ;;  %3619 = vmatpush1.bf16.msra.mxu1 %v5240_v28 }
 0x676   :  { %3579 = vmatprep.subr.bf16.mxu0 %v5246_v29  ;;  %3620 = vmatprep.subr.bf16.mxu1 %v5248_v31 }
 0x679   :  { %3580 = vmatpush1.bf16.msra.mxu0 %v5250_v33  ;;  %3621 = vmatpush1.bf16.msra.mxu1 %v5252_v35 }
 0x67a   :  { %3581 = vmatprep.subr.bf16.mxu0 %v5256_v36  ;;  %3622 = vmatprep.subr.bf16.mxu1 %v5258_v39 }
 0x67d   :  { %3582 = vmatpush1.bf16.msra.mxu0 %v5262_v41  ;;  %3623 = vmatpush1.bf16.msra.mxu1 %v5264_v59 }
 0x67e   :  { %3583 = vmatprep.subr.bf16.mxu0 %v5268_v61  ;;  %3624 = vmatprep.subr.bf16.mxu1 %v5270_v63 }
 0x681   :  { %3584 = vmatpush1.bf16.msra.mxu0 %v5274_v1  ;;  %3625 = vmatpush1.bf16.msra.mxu1 %v5276_v32 }
 0x682   :  { %3585 = vmatprep.subr.bf16.mxu0 %v5280_v34  ;;  %3626 = vmatprep.subr.bf16.mxu1 %v5282_v56 }
 0x685   :  { %3586 = vmatpush1.bf16.msra.mxu0 %v5286_v40  ;;  %3627 = vmatpush1.bf16.msra.mxu1 %v5288_v49 }
 0x686   :  { %3587 = vmatprep.subr.bf16.mxu0 %v5292_v44  ;;  %3628 = vmatprep.subr.bf16.mxu1 %v5294_v5 }
 0x689   :  { %3588 = vmatpush1.bf16.msra.mxu0 %v5298_v42  ;;  %3629 = vmatpush1.bf16.msra.mxu1 %v5300_v37 }
 0x68a   :  { %3704 = vmatprep.subr.bf16.mxu0 %v5306_v48  ;;  %3745 = vmatprep.subr.bf16.mxu1 %v5308_v55 }
 0x724   :  { %v3137_v19 = vpop.f32.mrf.mxu0  ;;  %v3178_v20 = vpop.f32.mrf.mxu1 }
 0x726   :  { %v3139_v21 = vpop.f32.mrf.mxu0  ;;  %v3180_v22 = vpop.f32.mrf.mxu1 }
 0x728   :  { %v3141_v23 = vpop.f32.mrf.mxu0  ;;  %v3182_v24 = vpop.f32.mrf.mxu1 }
 0x72a   :  { %v3142_v25 = vpop.f32.mrf.mxu0  ;;  %v3183_v26 = vpop.f32.mrf.mxu1 }
 0x72c   :  { %v3254_v27 = vpop.f32.mrf.mxu0  ;;  %v3295_v28 = vpop.f32.mrf.mxu1 }
 0x72d   :  { %v3255_v29 = vadd.f32 %v3254_v27, %v3137_v19  ;;  %v3296_v40 = vadd.f32 %v3295_v28, %v3178_v20  ;;  %v3372_v20 = vld [vmem:[%s5454_s4 + $0x4] sm:$0x8] }
 0x72e   :  { %v3256_v31 = vpop.f32.mrf.mxu0  ;;  %v3297_v33 = vpop.f32.mrf.mxu1 }
 0x72f   :  { %v3302_v35 = vadd.f32 %v3255_v29, %v4787_v58  ;;  %v3257_v36 = vadd.f32 %v3256_v31, %v3139_v21  ;;  %v3298_v34 = vadd.f32 %v3297_v33, %v3180_v22  ;;  %v3304_v5 = vadd.f32 %v3296_v40, %v4798_v60 }
 0x730   :  { %v3258_v39 = vpop.f32.mrf.mxu0  ;;  %v3299_v41 = vpop.f32.mrf.mxu1 }
 0x731   :  { %v4156_v59 = vmul.f32 -1.442695, %v3302_v35  ;;  %v3303_v61 = vadd.f32 %v3257_v36, %v4789_v62  ;;  %v3305_v56 = vadd.f32 %v3298_v34, %v4794_v52 }
 0x732   :  { %v3259_v63 = vpop.f32.mrf.mxu0  ;;  %v3300_v1 = vpop.f32.mrf.mxu1 }
 0x733   :  { %4487 = vpow2.f32 %v4156_v59  ;;  %v4157_v32 = vmul.f32 -1.442695, %v3303_v61  ;;  %v4158_v49 = vmul.f32 -1.442695, %v3305_v56 }
 0x735   :  { %4489 = vpow2.f32 %v4157_v32 }
 0x736   :  { %4491 = vpow2.f32 %v4158_v49 }
 0x740   :  { %v4488_v44 = vpop.eup %4487 }
 0x741   :  { %v3309_v42 = vadd.f32 1.0, %v4488_v44 }
 0x742   :  { %v4490_v37 = vpop.eup %4489 }
 0x743   :  { %4493 = vrcp.f32 %v3309_v42  ;;  %v3315_v48 = vadd.f32 1.0, %v4490_v37  ;;  %v4492_v55 = vpop.eup %4491 }
 0x744   :  { %4495 = vtanh.f32 %v3304_v5  ;;  %v3322_v16 = vadd.f32 1.0, %v4492_v55 }
 0x745   :  { %4497 = vrcp.f32 %v3315_v48 }
 0x746   :  { %4499 = vrcp.f32 %v3322_v16 }
 0x750   :  { %v4494_v13 = vpop.eup %4493 }
 0x751   :  { %v4496_v14 = vpop.eup %4495 }
 0x752   :  { %v4498_v15 = vpop.eup %4497  ;;  %v3326_v4 = vmul.f32 %v4496_v14, %v4494_v13 }
 0x753   :  { %v3325_v0 = vmul.f32 %v4498_v15, %v5317_v45  ;;  %v4500_v3 = vpop.eup %4499  ;;  %v3664_v45 = vrot.slane %v3662_v50, 6 }
 0x755   :  { %v5395_v6 = vadd.f32 %v3326_v4, %v3325_v0  ;;  %v3665_v7 = vsel %vm356_vm0, %v3664_v45, %v3663_v51  ;;  %vm3836_vm0 = vsmask.f32 7950 }
 0x756   :  { %v3666_v18 = vpack.c.b16 %v3665_v7, %v3665_v7 }
 0x757   :  { %4501 = vtanh.f32 %v5395_v6 }
 0x764   :  { %v4502_v10 = vpop.eup %4501 }
 0x765   :  { %v3329_v11 = vmul.f32 %v4502_v10, %v4500_v3 }
 0x767   :  { %v3330_v57 = vpack.c.bf16 %v3329_v11, %v3329_v11 }
 0x769   :  { %v3338_v12 = vrot.slane %v3330_v57, %v4811_v30  ;;  %3606 = vmatmul.mubr.bf16.vlgmr.msra.gmra.mxu0 %v3330_v57  ;;  %3647 = vmatmul.mubr.bf16.vlgmr.msra.gmra.mxu1 %v3330_v57 }
 0x76a   :  { %3705 = vmatpush1.bf16.msra.mxu0 %v5326_v38  ;;  %3746 = vmatpush1.bf16.msra.mxu1 %v5328_v43  ;;  %v3369_v38 = vld [vmem:[%s5454_s4] sm:$0x8] }
 0x76b   :  { %v3345_v9 = vrot.slane %v3338_v12, %v4811_v30  ;;  %3722 = vmatprep.mubr.bf16.mxu0 %v5459_v53  ;;  %3763 = vmatprep.mubr.bf16.mxu1 %v5459_v53 }
 0x76d   :  { %v3347_v2 = vunpack.i.h.s16 %v3345_v9  ;;  %v4159_v17 = vpack.i.b16 %v3345_v9, %v3345_v9 }
 0x76f   :  { %v3349_v43 = vpack.i.b16 %v3347_v2, %v3347_v2  ;;  %v3356_v19 = vrot.slane %v4159_v17, %v4818_v46 }
 0x771   :  { %v3363_v21 = vrot.slane %v3349_v43, %v4818_v46  ;;  %v3370_v22 = vsel %vm3368_vm4, %v3356_v19, %v3369_v38  ;;  %4198 = vmatmul.mubr.msk.bf16.vlgmr.msra.gmra.mxu0 %vm379_vm1, %v3666_v18  ;;  %4199 = vmatmul.mubr.msk.bf16.vlgmr.msra.gmra.mxu1 %vm379_vm1, %v3666_v18  ;;  %vm3837_vm1 = vmand %vm3366_vm2, %vm3836_vm0 }
 0x772   :  { %3371 = vst [vmem:[%s5454_s4] sm:$0x8] %v3370_v22 }
 0x773   :  { %v3373_v53 = vsel %vm3368_vm4, %v3363_v21, %v3372_v20 }
 0x774   :  { %3374 = vst [vmem:[%s5454_s4 + $0x4] sm:$0x8] %v3373_v53 }
 0x779   :  { %v3838_v12 = vld [vmem:[%s5454_s4] sm:$0x8] }
 0x829   :  { %v3607_v23 = vpop.f32.mrf.mxu0  ;;  %v3648_v24 = vpop.f32.mrf.mxu1 }
 0x82b   :  { %v3609_v25 = vpop.f32.mrf.mxu0  ;;  %v3650_v26 = vpop.f32.mrf.mxu1 }
 0x82d   :  { %v3611_v27 = vpop.f32.mrf.mxu0  ;;  %v3652_v28 = vpop.f32.mrf.mxu1 }
 0x82f   :  { %v3612_v29 = vpop.f32.mrf.mxu0  ;;  %v3653_v31 = vpop.f32.mrf.mxu1 }
 0x831   :  { %v3724_v33 = vpop.f32.mrf.mxu0  ;;  %v3765_v35 = vpop.f32.mrf.mxu1 }
 0x832   :  { %v3725_v36 = vadd.f32 %v3724_v33, %v3607_v23  ;;  %v3766_v42 = vadd.f32 %v3765_v35, %v3648_v24 }
 0x833   :  { %v3726_v39 = vpop.f32.mrf.mxu0  ;;  %v3767_v41 = vpop.f32.mrf.mxu1 }
 0x834   :  { %v3772_v59 = vadd.f32 %v3725_v36, %v4787_v58  ;;  %v3727_v61 = vadd.f32 %v3726_v39, %v3609_v25  ;;  %v3768_v44 = vadd.f32 %v3767_v41, %v3650_v26  ;;  %v3774_v55 = vadd.f32 %v3766_v42, %v4798_v60 }
 0x835   :  { %v3728_v63 = vpop.f32.mrf.mxu0  ;;  %v3769_v1 = vpop.f32.mrf.mxu1 }
 0x836   :  { %v4200_v32 = vmul.f32 -1.442695, %v3772_v59  ;;  %v3773_v34 = vadd.f32 %v3727_v61, %v4789_v62  ;;  %v3775_v5 = vadd.f32 %v3768_v44, %v4794_v52 }
 0x837   :  { %v3729_v56 = vpop.f32.mrf.mxu0  ;;  %v3770_v40 = vpop.f32.mrf.mxu1 }
 0x838   :  { %4503 = vpow2.f32 %v4200_v32  ;;  %v4201_v49 = vmul.f32 -1.442695, %v3773_v34  ;;  %v4202_v37 = vmul.f32 -1.442695, %v3775_v5 }
 0x83a   :  { %4505 = vpow2.f32 %v4201_v49 }
 0x83b   :  { %4507 = vpow2.f32 %v4202_v37 }
 0x845   :  { %v4504_v48 = vpop.eup %4503 }
 0x846   :  { %v3779_v58 = vadd.f32 1.0, %v4504_v48 }
 0x847   :  { %v4506_v13 = vpop.eup %4505 }
 0x848   :  { %4509 = vrcp.f32 %v3779_v58  ;;  %v3785_v14 = vadd.f32 1.0, %v4506_v13  ;;  %v4508_v62 = vpop.eup %4507 }
 0x849   :  { %4511 = vtanh.f32 %v3774_v55  ;;  %v3792_v0 = vadd.f32 1.0, %v4508_v62 }
 0x84a   :  { %4513 = vrcp.f32 %v3785_v14 }
 0x84b   :  { %4515 = vrcp.f32 %v3792_v0 }
 0x855   :  { %v4510_v15 = vpop.eup %4509 }
 0x856   :  { %v4512_v16 = vpop.eup %4511 }
 0x857   :  { %v4514_v4 = vpop.eup %4513  ;;  %v3796_v8 = vmul.f32 %v4512_v16, %v4510_v15 }
 0x858   :  { %v3795_v52 = vmul.f32 %v4514_v4, %v5395_v6  ;;  %v4516_v60 = vpop.eup %4515 }
 0x85a   :  { %v3797_v54 = vadd.f32 %v3796_v8, %v3795_v52 }
 0x85c   :  { %4517 = vtanh.f32 %v3797_v54  ;;  %3845 = vst [vmem:[#allocation3] sm:$0x3] %v3797_v54 }
 0x869   :  { %v4518_v47 = vpop.eup %4517 }
 0x86a   :  { %v3799_v50 = vmul.f32 %v4518_v47, %v4516_v60 }
 0x86c   :  { %v3800_v3 = vpack.c.bf16 %v3799_v50, %v3799_v50  ;;  %3844 = vst [vmem:[#allocation2] sm:$0x3] %v3799_v50 }
 0x86e   :  { %v3808_v10 = vrot.slane %v3800_v3, %v4811_v30 }
 0x870   :  { %v3815_v11 = vrot.slane %v3808_v10, %v4811_v30  ;;  %v3841_v30 = vld [vmem:[%s5454_s4 + $0x4] sm:$0x8] }
 0x872   :  { %v3817_v51 = vunpack.i.h.s16 %v3815_v11  ;;  %v4203_v45 = vpack.i.b16 %v3815_v11, %v3815_v11 }
 0x874   :  { %v3819_v57 = vpack.i.b16 %v3817_v51, %v3817_v51  ;;  %v3826_v6 = vrot.slane %v4203_v45, %v4818_v46 }
 0x876   :  { %v3833_v7 = vrot.slane %v3819_v57, %v4818_v46  ;;  %v3839_v9 = vsel %vm3837_vm1, %v3826_v6, %v3838_v12 }
 0x877   :  { %3840 = vst [vmem:[%s5454_s4] sm:$0x8] %v3839_v9 }
 0x878   :  { %v3842_v2 = vsel %vm3837_vm1, %v3833_v7, %v3841_v30 }
 0x879   :  { %3843 = vst [vmem:[%s5454_s4 + $0x4] sm:$0x8] %v3842_v2 }
 0x87a   :  { %3850 = vsyncpa [#allocation5], 1 }
 0x87b   :  { %3851 = vsyncpa [#allocation7], 1 }

</bundles_post_ra>
